<compile_context>
chip_gen: v7x
topology: tpu7x:2x2x1
jax: 0.10.0
libtpu: 0.0.40
codegen_flags: <defaults>
</compile_context>

<pallas_src>
import math

import jax
import jax.numpy as jnp
from jax.experimental import pallas as pl
from jax.experimental.pallas import tpu as pltpu

CPAD = 128   # padded channel count (lane-dense)
TAPS = 16    # 3x3 = 9 conv taps, zero-padded to 16 for an aligned contraction dim


def _convmnist_kernel(xc_ref, w1_ref, b1_ref, w2_ref, b2_ref, o_ref, pad_ref):
    bm, hp, wp, cpad = pad_ref.shape
    h_mid, w_mid = hp - 2, wp - 2          # spatial size after first pool
    h_in, w_in = 2 * h_mid, 2 * w_mid      # conv1 spatial size
    taps = w1_ref.shape[0]

    def relu_pool(acc, bias, h, w):
        # acc: (bm*h*w, cpad) conv output, rows are (bm, h, w) row-major; bias: (1, cpad)
        a = jnp.maximum(acc + bias, 0.0)
        a = jnp.max(a.reshape(bm * h * (w // 2), 2, cpad), axis=1)     # 2x pool along W
        a = jnp.max(a.reshape(bm, h // 2, 2, w // 2, cpad), axis=2)    # 2x pool along H
        return a                                                       # (bm, h//2, w//2, cpad)

    # ---- block 1: conv1 as one im2col matmul on the MXU (bf16 in, f32 acc) ----
    x = xc_ref[...].reshape(bm * h_in * w_in, taps)
    a1 = jnp.dot(x, w1_ref[...], preferred_element_type=jnp.float32)
    p1 = relu_pool(a1, b1_ref[...], h_in, w_in)          # (bm, h_mid, w_mid, cpad) f32

    # zero-padded (padding=1) layer-2 input, kept resident in VMEM scratch
    pad_ref[...] = jnp.zeros_like(pad_ref)
    pad_ref[:, 1:1 + h_mid, 1:1 + w_mid, :] = p1

    # ---- block 2: conv2 as 9 shifted-tap matmuls on the MXU ----
    acc = jnp.zeros((bm * h_mid * w_mid, cpad), jnp.float32)
    for t in range(9):
        dy, dx = t // 3, t % 3
        patch = pad_ref[:, dy:dy + h_mid, dx:dx + w_mid, :]
        patch = patch.reshape(bm * h_mid * w_mid, cpad).astype(jnp.bfloat16)
        acc = acc + jnp.dot(patch, w2_ref[t], preferred_element_type=jnp.float32)

    o_ref[...] = relu_pool(acc, b2_ref[...], h_mid, w_mid).astype(o_ref.dtype)


def _prep_params(w1, b1, w2, b2):
    """Repack PyTorch-layout conv params into padded, MXU-friendly operands."""
    c1 = w1.shape[0]                        # 32
    c2, cin2 = w2.shape[0], w2.shape[1]     # 64, 32
    # conv1 weight (C1, 1, 3, 3) -> (9, C1) -> zero-pad to (TAPS, CPAD), bf16
    w1k = jnp.transpose(w1, (2, 3, 1, 0)).reshape(9, c1)
    w1k = jnp.pad(w1k, ((0, TAPS - 9), (0, CPAD - c1))).astype(jnp.bfloat16)
    b1k = jnp.pad(b1, (0, CPAD - c1)).reshape(1, CPAD).astype(jnp.float32)
    # conv2 weight (C2, C1, 3, 3) -> (9, C1, C2) -> zero-pad to (9, CPAD, CPAD), bf16
    w2k = jnp.transpose(w2, (2, 3, 1, 0)).reshape(9, cin2, c2)
    w2k = jnp.pad(w2k, ((0, 0), (0, CPAD - cin2), (0, CPAD - c2))).astype(jnp.bfloat16)
    b2k = jnp.pad(b2, (0, CPAD - c2)).reshape(1, CPAD).astype(jnp.float32)
    return w1k, b1k, w2k, b2k


def _im2col_3x3(x):
    """x: (B, H, W) single-channel input -> (B, H*W, TAPS) bf16 patches (padding=1)."""
    B, H, W = x.shape
    xp = jnp.pad(x, ((0, 0), (1, 1), (1, 1)))
    cols = [xp[:, dy:dy + H, dx:dx + W].reshape(B, H * W)
            for dy in range(3) for dx in range(3)]
    cols = jnp.stack(cols, axis=-1)                          # (B, H*W, 9)
    cols = jnp.pad(cols, ((0, 0), (0, 0), (0, TAPS - 9)))
    return cols.astype(jnp.bfloat16)


def convmnist_forward(x, w1, b1, w2, b2):
    """x: (B, 1, H, W) f32 NCHW -> (B, 64, H//4, W//4) f32 NCHW (matches ConvMNIST)."""
    B, cin, H, W = x.shape
    assert cin == 1 and H % 4 == 0 and W % 4 == 0
    c2 = w2.shape[0]
    h_mid, w_mid = H // 2, W // 2
    h_out, w_out = H // 4, W // 4

    # batch tile: largest divisor of B that is <= 8 (amortizes grid-step overhead,
    # enlarges the matmul M dimension fed to the MXU)
    bm = 1
    for cand in (8, 4, 2, 1):
        if B % cand == 0:
            bm = cand
            break

    xc = _im2col_3x3(x[:, 0])
    w1k, b1k, w2k, b2k = _prep_params(w1, b1, w2, b2)

    out = pl.pallas_call(
        _convmnist_kernel,
        out_shape=jax.ShapeDtypeStruct((B, h_out, w_out, CPAD), jnp.float32),
        grid_spec=pltpu.PrefetchScalarGridSpec(
            num_scalar_prefetch=0,
            grid=(B // bm,),
            in_specs=[
                pl.BlockSpec((bm, H * W, TAPS), lambda b: (b, 0, 0)),   # im2col patches
                pl.BlockSpec((TAPS, CPAD), lambda b: (0, 0)),           # conv1 weight (resident)
                pl.BlockSpec((1, CPAD), lambda b: (0, 0)),              # conv1 bias
                pl.BlockSpec((9, CPAD, CPAD), lambda b: (0, 0, 0)),     # conv2 weight (resident)
                pl.BlockSpec((1, CPAD), lambda b: (0, 0)),              # conv2 bias
            ],
            out_specs=pl.BlockSpec((bm, h_out, w_out, CPAD), lambda b: (b, 0, 0, 0)),
            scratch_shapes=[pltpu.VMEM((bm, h_mid + 2, w_mid + 2, CPAD), jnp.float32)],
        ),
        compiler_params=pltpu.CompilerParams(
            dimension_semantics=("parallel",),
            vmem_limit_bytes=32 * 1024 * 1024,
        ),
    )(xc, w1k, b1k, w2k, b2k)

    out = out[:, :, :, :c2]                    # drop lane padding (128 -> 64 channels)
    return jnp.transpose(out, (0, 3, 1, 2))    # NHWC -> NCHW


def _ref_forward(x, w1, b1, w2, b2):
    """Pure-JAX reference (f32 math, bf16 rounding at the same points as the kernel)."""
    bf = lambda a: a.astype(jnp.bfloat16).astype(jnp.float32)

    def conv3x3(a, w):          # a: NHWC, w: (Cout, Cin, 3, 3)
        return jax.lax.conv_general_dilated(
            a, jnp.transpose(w, (2, 3, 1, 0)), window_strides=(1, 1),
            padding="SAME", dimension_numbers=("NHWC", "HWIO", "NHWC"))

    def pool(a):
        B, H, W, C = a.shape
        return a.reshape(B, H // 2, 2, W // 2, 2, C).max(axis=(2, 4))

    h = jnp.transpose(x, (0, 2, 3, 1))                       # NCHW -> NHWC
    h = pool(jnp.maximum(conv3x3(bf(h), bf(w1)) + b1, 0.0))
    h = pool(jnp.maximum(conv3x3(bf(h), bf(w2)) + b2, 0.0))
    return jnp.transpose(h, (0, 3, 1, 2))                    # NHWC -> NCHW


def init_convmnist_params(key):
    """Deterministic init mirroring torch Conv2d defaults (kaiming_uniform(a=sqrt(5)))."""
    ks = jax.random.split(key, 4)

    def conv_init(kw, kb, cout, cin, ksz=3):
        bound = 1.0 / math.sqrt(cin * ksz * ksz)
        w = jax.random.uniform(kw, (cout, cin, ksz, ksz), jnp.float32, -bound, bound)
        b = jax.random.uniform(kb, (cout,), jnp.float32, -bound, bound)
        return w, b

    w1, b1 = conv_init(ks[0], ks[1], 32, 1)
    w2, b2 = conv_init(ks[2], ks[3], 64, 32)
    return w1, b1, w2, b2


if __name__ == "__main__":
    B, H, W = 2, 16, 16
    key = jax.random.PRNGKey(0)
    kx, kp = jax.random.split(key)
    x = jax.random.normal(kx, (B, 1, H, W), jnp.float32)
    w1, b1, w2, b2 = init_convmnist_params(kp)

    fwd = jax.jit(convmnist_forward)
    y = fwd(x, w1, b1, w2, b2)
    jax.block_until_ready(y)

    y_ref = _ref_forward(x, w1, b1, w2, b2)
    assert y.shape == (B, 64, H // 4, W // 4), y.shape
    assert jnp.allclose(y, y_ref, rtol=2e-2, atol=2e-2), float(jnp.max(jnp.abs(y - y_ref)))

    print("KERNEL_OK")
</pallas_src>

<mosaic_0001>
module attributes {stable_mosaic.version = 11 : i64} {
  func.func @_convmnist_kernel(%arg0: i32, %arg1: memref<2x256x16xbf16, #tpu.memory_space<vmem>>, %arg2: memref<16x128xbf16, #tpu.memory_space<vmem>>, %arg3: memref<1x128xf32, #tpu.memory_space<vmem>>, %arg4: memref<9x128x128xbf16, #tpu.memory_space<vmem>>, %arg5: memref<1x128xf32, #tpu.memory_space<vmem>>, %arg6: memref<2x4x4x128xf32, #tpu.memory_space<vmem>>, %arg7: memref<2x10x10x128xf32, #tpu.memory_space<vmem>>) attributes {dimension_semantics = [#tpu.dimension_semantics<parallel>], iteration_bounds = array<i64: 1>, scalar_prefetch = 0 : i64, scratch_operands = 1 : i64, tpu.core_type = #tpu.core_type<tc>, window_params = [{transform_indices = @transform_0, window_bounds = array<i64: 2, 256, 16>}, {pipeline_mode = #tpu.pipeline_mode<synchronous>, transform_indices = @transform_1, window_bounds = array<i64: 16, 128>}, {pipeline_mode = #tpu.pipeline_mode<synchronous>, transform_indices = @transform_2, window_bounds = array<i64: 1, 128>}, {pipeline_mode = #tpu.pipeline_mode<synchronous>, transform_indices = @transform_3, window_bounds = array<i64: 9, 128, 128>}, {pipeline_mode = #tpu.pipeline_mode<synchronous>, transform_indices = @transform_4, window_bounds = array<i64: 1, 128>}, {transform_indices = @transform_5, window_bounds = array<i64: 2, 4, 4, 128>}]} {
    %c0 = arith.constant 0 : index
    %c0_0 = arith.constant 0 : index
    %c0_1 = arith.constant 0 : index
    %0 = vector.load %arg1[%c0, %c0_0, %c0_1] : memref<2x256x16xbf16, #tpu.memory_space<vmem>>, vector<2x256x16xbf16>
    %1 = vector.shape_cast %0 : vector<2x256x16xbf16> to vector<512x16xbf16>
    %c0_2 = arith.constant 0 : index
    %c0_3 = arith.constant 0 : index
    %2 = vector.load %arg2[%c0_2, %c0_3] : memref<16x128xbf16, #tpu.memory_space<vmem>>, vector<16x128xbf16>
    %cst = arith.constant dense<0.000000e+00> : vector<512x128xf32>
    %3 = tpu.matmul %1, %2, %cst {dimension_numbers = #tpu.dot_dimension_numbers<[1], [0], [0], [1], [0, 0, 1, 1], [], []>} : vector<512x16xbf16>, vector<16x128xbf16>, vector<512x128xf32> -> vector<512x128xf32>
    %c0_4 = arith.constant 0 : index
    %c0_5 = arith.constant 0 : index
    %4 = vector.load %arg3[%c0_4, %c0_5] : memref<1x128xf32, #tpu.memory_space<vmem>>, vector<1x128xf32>
    %5 = vector.broadcast %4 : vector<1x128xf32> to vector<512x128xf32>
    %6 = arith.addf %3, %5 : vector<512x128xf32>
    %cst_6 = arith.constant 0.000000e+00 : f32
    %7 = vector.broadcast %cst_6 : f32 to vector<512x128xf32>
    %8 = arith.maximumf %6, %7 : vector<512x128xf32>
    %9 = vector.shape_cast %8 : vector<512x128xf32> to vector<256x2x128xf32>
    %cst_7 = arith.constant dense<0xFF800000> : vector<256x128xf32>
    %10 = vector.multi_reduction <maximumf>, %9, %cst_7 [1] : vector<256x2x128xf32> to vector<256x128xf32>
    %11 = vector.shape_cast %10 : vector<256x128xf32> to vector<2x8x2x8x128xf32>
    %cst_8 = arith.constant dense<0xFF800000> : vector<2x8x8x128xf32>
    %12 = vector.multi_reduction <maximumf>, %11, %cst_8 [2] : vector<2x8x2x8x128xf32> to vector<2x8x8x128xf32>
    %cst_9 = arith.constant 0.000000e+00 : f32
    %13 = vector.broadcast %cst_9 : f32 to vector<2x10x10x128xf32>
    %c0_10 = arith.constant 0 : index
    %c0_11 = arith.constant 0 : index
    %c0_12 = arith.constant 0 : index
    %c0_13 = arith.constant 0 : index
    %14 = vector.load %arg7[%c0_10, %c0_11, %c0_12, %c0_13] : memref<2x10x10x128xf32, #tpu.memory_space<vmem>>, vector<2x10x10x128xf32>
    tpu.vector_store %arg7[%c0_10, %c0_11, %c0_12, %c0_13], %13 {strides = array<i32>} : memref<2x10x10x128xf32, #tpu.memory_space<vmem>>, vector<2x10x10x128xf32>,
    %c0_14 = arith.constant 0 : index
    %c1 = arith.constant 1 : index
    %c1_15 = arith.constant 1 : index
    %c0_16 = arith.constant 0 : index
    %15 = vector.load %arg7[%c0_14, %c1, %c1_15, %c0_16] : memref<2x10x10x128xf32, #tpu.memory_space<vmem>>, vector<2x8x8x128xf32>
    tpu.vector_store %arg7[%c0_14, %c1, %c1_15, %c0_16], %12 {strides = array<i32>} : memref<2x10x10x128xf32, #tpu.memory_space<vmem>>, vector<2x8x8x128xf32>,
    %cst_17 = arith.constant 0.000000e+00 : f32
    %16 = vector.broadcast %cst_17 : f32 to vector<128x128xf32>
    %c0_18 = arith.constant 0 : index
    %c0_19 = arith.constant 0 : index
    %c0_20 = arith.constant 0 : index
    %c0_21 = arith.constant 0 : index
    %17 = vector.load %arg7[%c0_18, %c0_19, %c0_20, %c0_21] : memref<2x10x10x128xf32, #tpu.memory_space<vmem>>, vector<2x8x8x128xf32>
    %18 = vector.shape_cast %17 : vector<2x8x8x128xf32> to vector<128x128xf32>
    %19 = arith.truncf %18 : vector<128x128xf32> to vector<128x128xbf16>
    %c0_22 = arith.constant 0 : index
    %c0_23 = arith.constant 0 : index
    %c0_24 = arith.constant 0 : index
    %20 = vector.load %arg4[%c0_22, %c0_23, %c0_24] : memref<9x128x128xbf16, #tpu.memory_space<vmem>>, vector<1x128x128xbf16>
    %21 = vector.shape_cast %20 : vector<1x128x128xbf16> to vector<128x128xbf16>
    %cst_25 = arith.constant dense<0.000000e+00> : vector<128x128xf32>
    %22 = tpu.matmul %19, %21, %cst_25 {dimension_numbers = #tpu.dot_dimension_numbers<[1], [0], [0], [1], [0, 0, 1, 1], [], []>} : vector<128x128xbf16>, vector<128x128xbf16>, vector<128x128xf32> -> vector<128x128xf32>
    %23 = arith.addf %16, %22 : vector<128x128xf32>
    %c0_26 = arith.constant 0 : index
    %c0_27 = arith.constant 0 : index
    %c1_28 = arith.constant 1 : index
    %c0_29 = arith.constant 0 : index
    %24 = vector.load %arg7[%c0_26, %c0_27, %c1_28, %c0_29] : memref<2x10x10x128xf32, #tpu.memory_space<vmem>>, vector<2x8x8x128xf32>
    %25 = vector.shape_cast %24 : vector<2x8x8x128xf32> to vector<128x128xf32>
    %26 = arith.truncf %25 : vector<128x128xf32> to vector<128x128xbf16>
    %c1_30 = arith.constant 1 : index
    %c0_31 = arith.constant 0 : index
    %c0_32 = arith.constant 0 : index
    %27 = vector.load %arg4[%c1_30, %c0_31, %c0_32] : memref<9x128x128xbf16, #tpu.memory_space<vmem>>, vector<1x128x128xbf16>
    %28 = vector.shape_cast %27 : vector<1x128x128xbf16> to vector<128x128xbf16>
    %cst_33 = arith.constant dense<0.000000e+00> : vector<128x128xf32>
    %29 = tpu.matmul %26, %28, %cst_33 {dimension_numbers = #tpu.dot_dimension_numbers<[1], [0], [0], [1], [0, 0, 1, 1], [], []>} : vector<128x128xbf16>, vector<128x128xbf16>, vector<128x128xf32> -> vector<128x128xf32>
    %30 = arith.addf %23, %29 : vector<128x128xf32>
    %c0_34 = arith.constant 0 : index
    %c0_35 = arith.constant 0 : index
    %c2 = arith.constant 2 : index
    %c0_36 = arith.constant 0 : index
    %31 = vector.load %arg7[%c0_34, %c0_35, %c2, %c0_36] : memref<2x10x10x128xf32, #tpu.memory_space<vmem>>, vector<2x8x8x128xf32>
    %32 = vector.shape_cast %31 : vector<2x8x8x128xf32> to vector<128x128xf32>
    %33 = arith.truncf %32 : vector<128x128xf32> to vector<128x128xbf16>
    %c2_37 = arith.constant 2 : index
    %c0_38 = arith.constant 0 : index
    %c0_39 = arith.constant 0 : index
    %34 = vector.load %arg4[%c2_37, %c0_38, %c0_39] : memref<9x128x128xbf16, #tpu.memory_space<vmem>>, vector<1x128x128xbf16>
    %35 = vector.shape_cast %34 : vector<1x128x128xbf16> to vector<128x128xbf16>
    %cst_40 = arith.constant dense<0.000000e+00> : vector<128x128xf32>
    %36 = tpu.matmul %33, %35, %cst_40 {dimension_numbers = #tpu.dot_dimension_numbers<[1], [0], [0], [1], [0, 0, 1, 1], [], []>} : vector<128x128xbf16>, vector<128x128xbf16>, vector<128x128xf32> -> vector<128x128xf32>
    %37 = arith.addf %30, %36 : vector<128x128xf32>
    %c0_41 = arith.constant 0 : index
    %c1_42 = arith.constant 1 : index
    %c0_43 = arith.constant 0 : index
    %c0_44 = arith.constant 0 : index
    %38 = vector.load %arg7[%c0_41, %c1_42, %c0_43, %c0_44] : memref<2x10x10x128xf32, #tpu.memory_space<vmem>>, vector<2x8x8x128xf32>
    %39 = vector.shape_cast %38 : vector<2x8x8x128xf32> to vector<128x128xf32>
    %40 = arith.truncf %39 : vector<128x128xf32> to vector<128x128xbf16>
    %c3 = arith.constant 3 : index
    %c0_45 = arith.constant 0 : index
    %c0_46 = arith.constant 0 : index
    %41 = vector.load %arg4[%c3, %c0_45, %c0_46] : memref<9x128x128xbf16, #tpu.memory_space<vmem>>, vector<1x128x128xbf16>
    %42 = vector.shape_cast %41 : vector<1x128x128xbf16> to vector<128x128xbf16>
    %cst_47 = arith.constant dense<0.000000e+00> : vector<128x128xf32>
    %43 = tpu.matmul %40, %42, %cst_47 {dimension_numbers = #tpu.dot_dimension_numbers<[1], [0], [0], [1], [0, 0, 1, 1], [], []>} : vector<128x128xbf16>, vector<128x128xbf16>, vector<128x128xf32> -> vector<128x128xf32>
    %44 = arith.addf %37, %43 : vector<128x128xf32>
    %c0_48 = arith.constant 0 : index
    %c1_49 = arith.constant 1 : index
    %c1_50 = arith.constant 1 : index
    %c0_51 = arith.constant 0 : index
    %45 = vector.load %arg7[%c0_48, %c1_49, %c1_50, %c0_51] : memref<2x10x10x128xf32, #tpu.memory_space<vmem>>, vector<2x8x8x128xf32>
    %46 = vector.shape_cast %45 : vector<2x8x8x128xf32> to vector<128x128xf32>
    %47 = arith.truncf %46 : vector<128x128xf32> to vector<128x128xbf16>
    %c4 = arith.constant 4 : index
    %c0_52 = arith.constant 0 : index
    %c0_53 = arith.constant 0 : index
    %48 = vector.load %arg4[%c4, %c0_52, %c0_53] : memref<9x128x128xbf16, #tpu.memory_space<vmem>>, vector<1x128x128xbf16>
    %49 = vector.shape_cast %48 : vector<1x128x128xbf16> to vector<128x128xbf16>
    %cst_54 = arith.constant dense<0.000000e+00> : vector<128x128xf32>
    %50 = tpu.matmul %47, %49, %cst_54 {dimension_numbers = #tpu.dot_dimension_numbers<[1], [0], [0], [1], [0, 0, 1, 1], [], []>} : vector<128x128xbf16>, vector<128x128xbf16>, vector<128x128xf32> -> vector<128x128xf32>
    %51 = arith.addf %44, %50 : vector<128x128xf32>
    %c0_55 = arith.constant 0 : index
    %c1_56 = arith.constant 1 : index
    %c2_57 = arith.constant 2 : index
    %c0_58 = arith.constant 0 : index
    %52 = vector.load %arg7[%c0_55, %c1_56, %c2_57, %c0_58] : memref<2x10x10x128xf32, #tpu.memory_space<vmem>>, vector<2x8x8x128xf32>
    %53 = vector.shape_cast %52 : vector<2x8x8x128xf32> to vector<128x128xf32>
    %54 = arith.truncf %53 : vector<128x128xf32> to vector<128x128xbf16>
    %c5 = arith.constant 5 : index
    %c0_59 = arith.constant 0 : index
    %c0_60 = arith.constant 0 : index
    %55 = vector.load %arg4[%c5, %c0_59, %c0_60] : memref<9x128x128xbf16, #tpu.memory_space<vmem>>, vector<1x128x128xbf16>
    %56 = vector.shape_cast %55 : vector<1x128x128xbf16> to vector<128x128xbf16>
    %cst_61 = arith.constant dense<0.000000e+00> : vector<128x128xf32>
    %57 = tpu.matmul %54, %56, %cst_61 {dimension_numbers = #tpu.dot_dimension_numbers<[1], [0], [0], [1], [0, 0, 1, 1], [], []>} : vector<128x128xbf16>, vector<128x128xbf16>, vector<128x128xf32> -> vector<128x128xf32>
    %58 = arith.addf %51, %57 : vector<128x128xf32>
    %c0_62 = arith.constant 0 : index
    %c2_63 = arith.constant 2 : index
    %c0_64 = arith.constant 0 : index
    %c0_65 = arith.constant 0 : index
    %59 = vector.load %arg7[%c0_62, %c2_63, %c0_64, %c0_65] : memref<2x10x10x128xf32, #tpu.memory_space<vmem>>, vector<2x8x8x128xf32>
    %60 = vector.shape_cast %59 : vector<2x8x8x128xf32> to vector<128x128xf32>
    %61 = arith.truncf %60 : vector<128x128xf32> to vector<128x128xbf16>
    %c6 = arith.constant 6 : index
    %c0_66 = arith.constant 0 : index
    %c0_67 = arith.constant 0 : index
    %62 = vector.load %arg4[%c6, %c0_66, %c0_67] : memref<9x128x128xbf16, #tpu.memory_space<vmem>>, vector<1x128x128xbf16>
    %63 = vector.shape_cast %62 : vector<1x128x128xbf16> to vector<128x128xbf16>
    %cst_68 = arith.constant dense<0.000000e+00> : vector<128x128xf32>
    %64 = tpu.matmul %61, %63, %cst_68 {dimension_numbers = #tpu.dot_dimension_numbers<[1], [0], [0], [1], [0, 0, 1, 1], [], []>} : vector<128x128xbf16>, vector<128x128xbf16>, vector<128x128xf32> -> vector<128x128xf32>
    %65 = arith.addf %58, %64 : vector<128x128xf32>
    %c0_69 = arith.constant 0 : index
    %c2_70 = arith.constant 2 : index
    %c1_71 = arith.constant 1 : index
    %c0_72 = arith.constant 0 : index
    %66 = vector.load %arg7[%c0_69, %c2_70, %c1_71, %c0_72] : memref<2x10x10x128xf32, #tpu.memory_space<vmem>>, vector<2x8x8x128xf32>
    %67 = vector.shape_cast %66 : vector<2x8x8x128xf32> to vector<128x128xf32>
    %68 = arith.truncf %67 : vector<128x128xf32> to vector<128x128xbf16>
    %c7 = arith.constant 7 : index
    %c0_73 = arith.constant 0 : index
    %c0_74 = arith.constant 0 : index
    %69 = vector.load %arg4[%c7, %c0_73, %c0_74] : memref<9x128x128xbf16, #tpu.memory_space<vmem>>, vector<1x128x128xbf16>
    %70 = vector.shape_cast %69 : vector<1x128x128xbf16> to vector<128x128xbf16>
    %cst_75 = arith.constant dense<0.000000e+00> : vector<128x128xf32>
    %71 = tpu.matmul %68, %70, %cst_75 {dimension_numbers = #tpu.dot_dimension_numbers<[1], [0], [0], [1], [0, 0, 1, 1], [], []>} : vector<128x128xbf16>, vector<128x128xbf16>, vector<128x128xf32> -> vector<128x128xf32>
    %72 = arith.addf %65, %71 : vector<128x128xf32>
    %c0_76 = arith.constant 0 : index
    %c2_77 = arith.constant 2 : index
    %c2_78 = arith.constant 2 : index
    %c0_79 = arith.constant 0 : index
    %73 = vector.load %arg7[%c0_76, %c2_77, %c2_78, %c0_79] : memref<2x10x10x128xf32, #tpu.memory_space<vmem>>, vector<2x8x8x128xf32>
    %74 = vector.shape_cast %73 : vector<2x8x8x128xf32> to vector<128x128xf32>
    %75 = arith.truncf %74 : vector<128x128xf32> to vector<128x128xbf16>
    %c8 = arith.constant 8 : index
    %c0_80 = arith.constant 0 : index
    %c0_81 = arith.constant 0 : index
    %76 = vector.load %arg4[%c8, %c0_80, %c0_81] : memref<9x128x128xbf16, #tpu.memory_space<vmem>>, vector<1x128x128xbf16>
    %77 = vector.shape_cast %76 : vector<1x128x128xbf16> to vector<128x128xbf16>
    %cst_82 = arith.constant dense<0.000000e+00> : vector<128x128xf32>
    %78 = tpu.matmul %75, %77, %cst_82 {dimension_numbers = #tpu.dot_dimension_numbers<[1], [0], [0], [1], [0, 0, 1, 1], [], []>} : vector<128x128xbf16>, vector<128x128xbf16>, vector<128x128xf32> -> vector<128x128xf32>
    %79 = arith.addf %72, %78 : vector<128x128xf32>
    %c0_83 = arith.constant 0 : index
    %c0_84 = arith.constant 0 : index
    %80 = vector.load %arg5[%c0_83, %c0_84] : memref<1x128xf32, #tpu.memory_space<vmem>>, vector<1x128xf32>
    %81 = vector.broadcast %80 : vector<1x128xf32> to vector<128x128xf32>
    %82 = arith.addf %79, %81 : vector<128x128xf32>
    %cst_85 = arith.constant 0.000000e+00 : f32
    %83 = vector.broadcast %cst_85 : f32 to vector<128x128xf32>
    %84 = arith.maximumf %82, %83 : vector<128x128xf32>
    %85 = vector.shape_cast %84 : vector<128x128xf32> to vector<64x2x128xf32>
    %cst_86 = arith.constant dense<0xFF800000> : vector<64x128xf32>
    %86 = vector.multi_reduction <maximumf>, %85, %cst_86 [1] : vector<64x2x128xf32> to vector<64x128xf32>
    %87 = vector.shape_cast %86 : vector<64x128xf32> to vector<2x4x2x4x128xf32>
    %cst_87 = arith.constant dense<0xFF800000> : vector<2x4x4x128xf32>
    %88 = vector.multi_reduction <maximumf>, %87, %cst_87 [2] : vector<2x4x2x4x128xf32> to vector<2x4x4x128xf32>
    %c0_88 = arith.constant 0 : index
    %c0_89 = arith.constant 0 : index
    %c0_90 = arith.constant 0 : index
    %c0_91 = arith.constant 0 : index
    %89 = vector.load %arg6[%c0_88, %c0_89, %c0_90, %c0_91] : memref<2x4x4x128xf32, #tpu.memory_space<vmem>>, vector<2x4x4x128xf32>
    tpu.vector_store %arg6[%c0_88, %c0_89, %c0_90, %c0_91], %88 {strides = array<i32>} : memref<2x4x4x128xf32, #tpu.memory_space<vmem>>, vector<2x4x4x128xf32>,
    return
  }
  func.func @transform_0(%arg0: i32) -> (i32, i32, i32) {
    %c0_i32 = arith.constant 0 : i32
    %c0_i32_0 = arith.constant 0 : i32
    %c0_i32_1 = arith.constant 0 : i32
    return %arg0, %c0_i32, %c0_i32_0 : i32, i32, i32
  }
  func.func @transform_1(%arg0: i32) -> (i32, i32) {
    %c0_i32 = arith.constant 0 : i32
    %c0_i32_0 = arith.constant 0 : i32
    %c0_i32_1 = arith.constant 0 : i32
    return %c0_i32, %c0_i32_0 : i32, i32
  }
  func.func @transform_2(%arg0: i32) -> (i32, i32) {
    %c0_i32 = arith.constant 0 : i32
    %c0_i32_0 = arith.constant 0 : i32
    %c0_i32_1 = arith.constant 0 : i32
    return %c0_i32, %c0_i32_0 : i32, i32
  }
  func.func @transform_3(%arg0: i32) -> (i32, i32, i32) {
    %c0_i32 = arith.constant 0 : i32
    %c0_i32_0 = arith.constant 0 : i32
    %c0_i32_1 = arith.constant 0 : i32
    %c0_i32_2 = arith.constant 0 : i32
    return %c0_i32, %c0_i32_0, %c0_i32_1 : i32, i32, i32
  }
  func.func @transform_4(%arg0: i32) -> (i32, i32) {
    %c0_i32 = arith.constant 0 : i32
    %c0_i32_0 = arith.constant 0 : i32
    %c0_i32_1 = arith.constant 0 : i32
    return %c0_i32, %c0_i32_0 : i32, i32
  }
  func.func @transform_5(%arg0: i32) -> (i32, i32, i32, i32) {
    %c0_i32 = arith.constant 0 : i32
    %c0_i32_0 = arith.constant 0 : i32
    %c0_i32_1 = arith.constant 0 : i32
    %c0_i32_2 = arith.constant 0 : i32
    return %arg0, %c0_i32, %c0_i32_0, %c0_i32_1 : i32, i32, i32, i32
  }
}

</mosaic_0001>

<bundles_post_ra>
// kernel: convmnist_forward.1
= control target key start
LH: loop header
LB: loop body
LE: loop exit
PB: predicated region body
PF: predicated region fallthrough
CT: control target
= control target key end

     0   :  { %vm260_vm0 = vcmask 130048   ;;  %v8132_v33 = vmov 0.0   ;;  %v8133_v34 = vmov 1983009808   ;;  %v778_v36 = vlaneseq  ;;  %s10111_s1 = inlined_call_operand.vmem [shape: bf16[16,128], index: 1, kind: input, shape index: {}]   ;;  %s10112_s0 = inlined_call_operand.vmem [shape: bf16[2,256,16], index: 0, kind: input, shape index: {}]   ;;  %s10113_s2 = inlined_call_operand.vmem [shape: f32[1,128], index: 2, kind: input, shape index: {}]   ;;  %s10114_s3 = inlined_call_operand.vmem [shape: bf16[9,128,128], index: 3, kind: input, shape index: {}]   ;;  %s10115_s4 = inlined_call_operand.vmem [shape: f32[1,128], index: 4, kind: input, shape index: {}]   ;;  %s10116_s5 = inlined_call_operand.vmem [shape: f32[2,4,4,128], index: 5, kind: output, shape index: {}]  }
   0x1   :  { %v8020_v0 = vld [vmem:[%s10111_s1] sm:$0xff]   ;;  %v8022_v2 = vld [vmem:[%s10112_s0 + $0x8] sm:$0xff]   ;;  %v8023_v3 = vld [vmem:[%s10112_s0 + $0x10] sm:$0xff]   ;;  %4041 = vst [vmem:[#allocation2 + $0x10] sm:$0xff] %v8132_v33  ;;  %v776_v35 = vunpack.c.l.s4 %v8133_v34  ;;  %vm2118_vm1 = vcmask 1041408   ;;  %vm4207_vm2 = vcmask 1041409  }
   0x2   :  { %v8021_v1 = vld [vmem:[%s10112_s0] sm:$0xff]   ;;  %7536 = vmatprep.subr.bf16.mxu0 %v8020_v0  ;;  %v8024_v4 = vld [vmem:[%s10112_s0 + $0x18] sm:$0xff]   ;;  %v8026_v6 = vld [vmem:[%s10112_s0 + $0x28] sm:$0xff]   ;;  %4042 = vst [vmem:[#allocation2 + $0x18] sm:$0x3] %v8132_v33  ;;  %v779_v38 = vshrl.u32 %v778_v36, 7 }
   0x3   :  { %7537 = vmatpush3.bf16.msra.mxu0 %v8020_v0  ;;  %7538 = vmatprep.mubr.msk.bf16.mxu0 %vm260_vm0, %v8021_v1  ;;  %v8025_v5 = vld [vmem:[%s10112_s0 + $0x20] sm:$0xff]   ;;  %v8027_v7 = vld [vmem:[%s10112_s0 + $0x30] sm:$0xff]   ;;  %v8028_v8 = vld [vmem:[%s10112_s0 + $0x38] sm:$0xff]   ;;  %4039 = vst [vmem:[#allocation2] sm:$0xff] %v8132_v33  ;;  %v777_v37 = vunpack.c.0.s8 %v776_v35  ;;  %vm4209_vm3 = vcmask 1042434   ;;  %vm4211_vm4 = vcmask 1043459  }
   0x4   :  { %v8029_v9 = vld [vmem:[%s10112_s0 + $0x40] sm:$0xff]   ;;  %v8030_v10 = vld [vmem:[%s10112_s0 + $0x48] sm:$0xff]   ;;  %v8031_v11 = vld [vmem:[%s10112_s0 + $0x50] sm:$0xff]   ;;  %4040 = vst [vmem:[#allocation2 + $0x8] sm:$0x3] %v8132_v33  ;;  %vm4213_vm5 = vcmask 1044484  }
   0x5   :  { %v8032_v12 = vld [vmem:[%s10112_s0 + $0x58] sm:$0xff]   ;;  %v8033_v13 = vld [vmem:[%s10112_s0 + $0x60] sm:$0xff]   ;;  %v8034_v14 = vld [vmem:[%s10112_s0 + $0x68] sm:$0xff]   ;;  %4043 = vst [vmem:[#allocation2 + $0x20] sm:$0xff] %v8132_v33  ;;  %v8304_v43 = vsub.s32 %v777_v37, %v779_v38  ;;  %vm4215_vm6 = vcmask 1045509   ;;  %vm4217_vm7 = vcmask 1046534  }
   0x6   :  { %7539 = vmatmul.mubr.msk.bf16.vlgmr.msra.gmra.mrb[0].mxu0 %vm260_vm0, %v8022_v2  ;;  %v8035_v15 = vld [vmem:[%s10112_s0 + $0x70] sm:$0xff]   ;;  %v8036_v16 = vld [vmem:[%s10112_s0 + $0x78] sm:$0xff]   ;;  %v8037_v17 = vld [vmem:[%s10112_s0 + $0x80] sm:$0xff]   ;;  %4044 = vst [vmem:[#allocation2 + $0x28] sm:$0x3] %v8132_v33  ;;  %vm4219_vm8 = vcmask 1047559  }
   0x7   :  { %7542 = vmatprep.mubr.msk.bf16.mxu0 %vm260_vm0, %v8023_v3  ;;  %v8038_v18 = vld [vmem:[%s10112_s0 + $0x88] sm:$0xff]   ;;  %v8039_v19 = vld [vmem:[%s10112_s0 + $0x90] sm:$0xff]   ;;  %v8040_v20 = vld [vmem:[%s10112_s0 + $0x98] sm:$0xff]   ;;  %4045 = vst [vmem:[#allocation2 + $0x30] sm:$0xff] %v8132_v33 }
   0x8   :  { %v8041_v21 = vld [vmem:[%s10112_s0 + $0xa0] sm:$0xff]   ;;  %v8042_v22 = vld [vmem:[%s10112_s0 + $0xa8] sm:$0xff]   ;;  %v8043_v23 = vld [vmem:[%s10112_s0 + $0xb0] sm:$0xff]   ;;  %4046 = vst [vmem:[#allocation2 + $0x38] sm:$0x3] %v8132_v33 }
   0x9   :  { %v8044_v24 = vld [vmem:[%s10112_s0 + $0xb8] sm:$0xff]   ;;  %v8045_v25 = vld [vmem:[%s10112_s0 + $0xc0] sm:$0xff]   ;;  %v8046_v26 = vld [vmem:[%s10112_s0 + $0xc8] sm:$0xff]   ;;  %4047 = vst [vmem:[#allocation2 + $0x40] sm:$0xff] %v8132_v33 }
   0xa   :  { %v8047_v27 = vld [vmem:[%s10112_s0 + $0xd0] sm:$0xff]   ;;  %v8048_v28 = vld [vmem:[%s10112_s0 + $0xd8] sm:$0xff]   ;;  %v8049_v29 = vld [vmem:[%s10112_s0 + $0xe0] sm:$0xff]   ;;  %4048 = vst [vmem:[#allocation2 + $0x48] sm:$0x3] %v8132_v33 }
   0xb   :  { %v8050_v30 = vld [vmem:[%s10112_s0 + $0xe8] sm:$0xff]   ;;  %v8051_v31 = vld [vmem:[%s10112_s0 + $0xf0] sm:$0xff]   ;;  %v8052_v32 = vld [vmem:[%s10112_s0 + $0xf8] sm:$0xff]   ;;  %4049 = vst [vmem:[#allocation2 + $0x50] sm:$0xff] %v8132_v33 }
   0xc   :  { %4050 = vst [vmem:[#allocation2 + $0x58] sm:$0x3] %v8132_v33  ;;  %4051 = vst [vmem:[#allocation2 + $0x60] sm:$0xff] %v8132_v33  ;;  %v8298_v39 = vld [vmem:[%s10113_s2] ss:$0 sm:$0xff] }
   0xd   :  { %4052 = vst [vmem:[#allocation2 + $0x68] sm:$0x3] %v8132_v33  ;;  %4053 = vst [vmem:[#allocation2 + $0x70] sm:$0xff] %v8132_v33  ;;  %v8053_v41 = vld [vmem:[%s10114_s3 + $0x40] sm:$0xff]  }
   0xe   :  { %7543 = vmatmul.mubr.msk.bf16.gmra.mrb[4].mxu0 %vm260_vm0, %v8024_v4  ;;  %4054 = vst [vmem:[#allocation2 + $0x78] sm:$0x3] %v8132_v33  ;;  %4055 = vst [vmem:[#allocation2 + $0x80] sm:$0xff] %v8132_v33  ;;  %7602 = vmatprep.subr.bf16.mxu0 %v8053_v41 }
   0xf   :  { %7546 = vmatprep.mubr.msk.bf16.mxu0 %vm260_vm0, %v8025_v5  ;;  %4056 = vst [vmem:[#allocation2 + $0x88] sm:$0x3] %v8132_v33  ;;  %4057 = vst [vmem:[#allocation2 + $0x90] sm:$0xff] %v8132_v33  ;;  %7603 = vmatpush3.bf16.msra.mxu0 %v8053_v41 }
  0x10   :  { %4058 = vst [vmem:[#allocation2 + $0x98] sm:$0x3] %v8132_v33  ;;  %4059 = vst [vmem:[#allocation2 + $0xa0] sm:$0xff] %v8132_v33 }
  0x11   :  { %4060 = vst [vmem:[#allocation2 + $0xa8] sm:$0x3] %v8132_v33  ;;  %4061 = vst [vmem:[#allocation2 + $0xb0] sm:$0xff] %v8132_v33 }
  0x12   :  { %4062 = vst [vmem:[#allocation2 + $0xb8] sm:$0x3] %v8132_v33  ;;  %4063 = vst [vmem:[#allocation2 + $0xc0] sm:$0xff] %v8132_v33 }
  0x13   :  { %4064 = vst [vmem:[#allocation2 + $0xc8] sm:$0x3] %v8132_v33  ;;  %4065 = vst [vmem:[#allocation2 + $0xd0] sm:$0xff] %v8132_v33 }
  0x14   :  { %4066 = vst [vmem:[#allocation2 + $0xd8] sm:$0x3] %v8132_v33  ;;  %4067 = vst [vmem:[#allocation2 + $0xe0] sm:$0xff] %v8132_v33 }
  0x15   :  { %4068 = vst [vmem:[#allocation2 + $0xe8] sm:$0x3] %v8132_v33  ;;  %4069 = vst [vmem:[#allocation2 + $0xf0] sm:$0xff] %v8132_v33 }
  0x16   :  { %7547 = vmatmul.mubr.msk.bf16.gmra.mrb[8].mxu0 %vm260_vm0, %v8026_v6  ;;  %4070 = vst [vmem:[#allocation2 + $0xf8] sm:$0x3] %v8132_v33  ;;  %4071 = vst [vmem:[#allocation2 + $0x100] sm:$0xff] %v8132_v33 }
  0x17   :  { %7550 = vmatprep.mubr.msk.bf16.mxu0 %vm260_vm0, %v8027_v7  ;;  %4072 = vst [vmem:[#allocation2 + $0x108] sm:$0x3] %v8132_v33  ;;  %4073 = vst [vmem:[#allocation2 + $0x110] sm:$0xff] %v8132_v33 }
  0x18   :  { %4074 = vst [vmem:[#allocation2 + $0x118] sm:$0x3] %v8132_v33  ;;  %4075 = vst [vmem:[#allocation2 + $0x120] sm:$0xff] %v8132_v33 }
  0x19   :  { %4076 = vst [vmem:[#allocation2 + $0x128] sm:$0x3] %v8132_v33  ;;  %4077 = vst [vmem:[#allocation2 + $0x130] sm:$0xff] %v8132_v33 }
  0x1a   :  { %4078 = vst [vmem:[#allocation2 + $0x138] sm:$0x3] %v8132_v33 }
  0x1e   :  { %7551 = vmatmul.mubr.msk.bf16.gmra.mrb[12].mxu0 %vm260_vm0, %v8028_v8 }
  0x1f   :  { %7554 = vmatprep.mubr.msk.bf16.mxu0 %vm260_vm0, %v8029_v9 }
  0x26   :  { %7555 = vmatmul.mubr.msk.bf16.gmra.mrb[16].mxu0 %vm260_vm0, %v8030_v10 }
  0x27   :  { %7558 = vmatprep.mubr.msk.bf16.mxu0 %vm260_vm0, %v8031_v11 }
  0x2e   :  { %7559 = vmatmul.mubr.msk.bf16.gmra.mrb[20].mxu0 %vm260_vm0, %v8032_v12 }
  0x2f   :  { %7562 = vmatprep.mubr.msk.bf16.mxu0 %vm260_vm0, %v8033_v13 }
  0x36   :  { %7563 = vmatmul.mubr.msk.bf16.gmra.mrb[24].mxu0 %vm260_vm0, %v8034_v14 }
  0x37   :  { %7566 = vmatprep.mubr.msk.bf16.mxu0 %vm260_vm0, %v8035_v15 }
  0x3e   :  { %7567 = vmatmul.mubr.msk.bf16.gmra.mrb[28].mxu0 %vm260_vm0, %v8036_v16 }
  0x3f   :  { %7570 = vmatprep.mubr.msk.bf16.mxu0 %vm260_vm0, %v8037_v17 }
  0x46   :  { %7571 = vmatmul.mubr.msk.bf16.gmra.mrb[32].mxu0 %vm260_vm0, %v8038_v18 }
  0x47   :  { %7574 = vmatprep.mubr.msk.bf16.mxu0 %vm260_vm0, %v8039_v19 }
  0x4e   :  { %7575 = vmatmul.mubr.msk.bf16.gmra.mrb[36].mxu0 %vm260_vm0, %v8040_v20 }
  0x4f   :  { %7578 = vmatprep.mubr.msk.bf16.mxu0 %vm260_vm0, %v8041_v21 }
  0x56   :  { %7579 = vmatmul.mubr.msk.bf16.gmra.mrb[40].mxu0 %vm260_vm0, %v8042_v22 }
  0x57   :  { %7582 = vmatprep.mubr.msk.bf16.mxu0 %vm260_vm0, %v8043_v23 }
  0x5e   :  { %7583 = vmatmul.mubr.msk.bf16.gmra.mrb[44].mxu0 %vm260_vm0, %v8044_v24 }
  0x5f   :  { %7586 = vmatprep.mubr.msk.bf16.mxu0 %vm260_vm0, %v8045_v25 }
  0x66   :  { %7587 = vmatmul.mubr.msk.bf16.gmra.mrb[48].mxu0 %vm260_vm0, %v8046_v26 }
  0x67   :  { %7590 = vmatprep.mubr.msk.bf16.mxu0 %vm260_vm0, %v8047_v27 }
  0x6e   :  { %7591 = vmatmul.mubr.msk.bf16.gmra.mrb[52].mxu0 %vm260_vm0, %v8048_v28 }
  0x6f   :  { %7594 = vmatprep.mubr.msk.bf16.mxu0 %vm260_vm0, %v8049_v29 }
  0x76   :  { %7595 = vmatmul.mubr.msk.bf16.gmra.mrb[56].mxu0 %vm260_vm0, %v8050_v30  ;;  %v8054_v30 = vld [vmem:[%s10114_s3 + $0x48] sm:$0xff]  }
  0x77   :  { %7598 = vmatprep.mubr.msk.bf16.mxu0 %vm260_vm0, %v8051_v31  ;;  %7604 = vmatprep.subr.bf16.mxu0 %v8054_v30 }
  0x78   :  { %7605 = vmatpush3.bf16.msra.mxu0 %v8054_v30 }
  0x7e   :  { %7599 = vmatmul.mubr.msk.bf16.gmra.mrb[60].mxu0 %vm260_vm0, %v8052_v32 }
  0xd9   :  { %v7540_v40 = vpop.f32.mrb[0].mxu0 }
  0xda   :  { %v400_v42 = vadd.f32 %v7540_v40, %v8298_v39  ;;  %v391_v44 = vpop.f32.mrb[1].mxu0 }
  0xdb   :  { %v392_v45 = vadd.f32 %v8298_v39, %v391_v44  ;;  %v7541_v46 = vpop.f32.mrb[2].mxu0 }
  0xdc   :  { %v648_v47 = vmax.f32 %v400_v42, 0.0  ;;  %v403_v48 = vadd.f32 %v7541_v46, %v8298_v39  ;;  %v394_v49 = vpop.f32.mrb[3].mxu0 }
  0xdd   :  { %v646_v50 = vmax.f32 %v392_v45, 0.0  ;;  %v395_v51 = vadd.f32 %v8298_v39, %v394_v49 }
  0xde   :  { %v808_v52 = vcombine.high %v648_v47, %v648_v47  ;;  %v815_v53 = vrot.slane %v648_v47, %v8304_v43  ;;  %v8310_v54 = vmax.f32 %v403_v48, 0.0 }
  0xdf   :  { %v774_v55 = vcombine.high %v646_v50, %v646_v50  ;;  %v781_v56 = vrot.slane %v646_v50, %v8304_v43  ;;  %v8313_v57 = vmax.f32 %v395_v51, 0.0 }
  0xe0   :  { %v822_v58 = vrot.slane %v808_v52, %v8304_v43  ;;  %v823_v59 = vcombine.high %v815_v53, %v815_v53  ;;  %v2175_v60 = vsel %vm2118_vm1, %v815_v53, -inf  ;;  %v825_v61 = vcombine.high %v8310_v54, %v8310_v54 }
  0xe1   :  { %v2176_v62 = vrot.slane %v2175_v60, 4  ;;  %v788_v63 = vrot.slane %v774_v55, %v8304_v43  ;;  %v789_v0 = vcombine.high %v781_v56, %v781_v56  ;;  %v2119_v1 = vsel %vm2118_vm1, %v781_v56, -inf  ;;  %v8321_v2 = vpop.f32.mrb[4].mxu0 }
  0xe2   :  { %v824_v3 = vcombine.high %v822_v58, %v822_v58  ;;  %v2182_v4 = vsel %vm2118_vm1, %v823_v59, -inf  ;;  %v2189_v5 = vsel %vm2118_vm1, %v822_v58, -inf  ;;  %v2120_v6 = vrot.slane %v2119_v1, 4  ;;  %v8325_v7 = vpop.f32.mrb[5].mxu0 }
  0xe3   :  { %v2177_v8 = vmax.f32 %v2175_v60, %v2176_v62  ;;  %v2183_v9 = vrot.slane %v2182_v4, 4  ;;  %v2190_v10 = vrot.slane %v2189_v5, 4  ;;  %v790_v11 = vcombine.high %v788_v63, %v788_v63  ;;  %v8327_v12 = vpop.f32.mrb[6].mxu0 }
  0xe4   :  { %v2196_v13 = vsel %vm2118_vm1, %v824_v3, -inf  ;;  %v2121_v14 = vmax.f32 %v2119_v1, %v2120_v6  ;;  %v2126_v15 = vsel %vm2118_vm1, %v789_v0, -inf  ;;  %v2133_v16 = vsel %vm2118_vm1, %v788_v63, -inf  ;;  %v8332_v17 = vpop.f32.mrb[7].mxu0 }
  0xe5   :  { %v2178_v18 = vrot.slane %v2177_v8, 2  ;;  %v2184_v19 = vmax.f32 %v2182_v4, %v2183_v9  ;;  %v2191_v20 = vmax.f32 %v2189_v5, %v2190_v10  ;;  %v2197_v21 = vrot.slane %v2196_v13, 4 }
  0xe6   :  { %v2122_v22 = vrot.slane %v2121_v14, 2  ;;  %v2127_v23 = vrot.slane %v2126_v15, 4  ;;  %v2134_v24 = vrot.slane %v2133_v16, 4  ;;  %v2140_v25 = vsel %vm2118_vm1, %v790_v11, -inf }
  0xe7   :  { %v2179_v26 = vmax.f32 %v2177_v8, %v2178_v18  ;;  %v2185_v27 = vrot.slane %v2184_v19, 2  ;;  %v2192_v28 = vrot.slane %v2191_v20, 2  ;;  %v2198_v29 = vmax.f32 %v2196_v13, %v2197_v21 }
  0xe8   :  { %v2123_v31 = vmax.f32 %v2121_v14, %v2122_v22  ;;  %v2128_v32 = vmax.f32 %v2126_v15, %v2127_v23  ;;  %v2135_v33 = vmax.f32 %v2133_v16, %v2134_v24  ;;  %v2141_v34 = vrot.slane %v2140_v25, 4 }
  0xe9   :  { %v2180_v35 = vrot.slane %v2179_v26, 1  ;;  %v2186_v36 = vmax.f32 %v2184_v19, %v2185_v27  ;;  %v2193_v37 = vmax.f32 %v2191_v20, %v2192_v28  ;;  %v2199_v38 = vrot.slane %v2198_v29, 2  ;;  %v8338_v40 = vpop.f32.mrb[8].mxu0 }
  0xea   :  { %v2124_v41 = vrot.slane %v2123_v31, 1  ;;  %v2129_v42 = vrot.slane %v2128_v32, 2  ;;  %v2136_v44 = vrot.slane %v2135_v33, 2  ;;  %v2142_v45 = vmax.f32 %v2140_v25, %v2141_v34  ;;  %v8340_v46 = vpop.f32.mrb[9].mxu0 }
  0xeb   :  { %v2181_v47 = vmax.f32 %v2179_v26, %v2180_v35  ;;  %v2187_v48 = vrot.slane %v2186_v36, 1  ;;  %v2194_v49 = vrot.slane %v2193_v37, 1  ;;  %v2200_v50 = vmax.f32 %v2198_v29, %v2199_v38  ;;  %v8342_v51 = vpop.f32.mrb[10].mxu0 }
  0xec   :  { %v2125_v52 = vmax.f32 %v2123_v31, %v2124_v41  ;;  %v2130_v53 = vmax.f32 %v2128_v32, %v2129_v42  ;;  %v2137_v55 = vmax.f32 %v2135_v33, %v2136_v44  ;;  %v2143_v56 = vrot.slane %v2142_v45, 2  ;;  %v8344_v58 = vpop.f32.mrb[11].mxu0 }
  0xed   :  { %v2188_v59 = vmax.f32 %v2186_v36, %v2187_v48  ;;  %v2195_v60 = vmax.f32 %v2193_v37, %v2194_v49  ;;  %v2201_v62 = vrot.slane %v2200_v50, 1  ;;  %v832_v63 = vrot.slane %v8310_v54, %v8304_v43 }
  0xee   :  { %v2131_v0 = vrot.slane %v2130_v53, 1  ;;  %v2138_v1 = vrot.slane %v2137_v55, 1  ;;  %v2144_v3 = vmax.f32 %v2142_v45, %v2143_v56  ;;  %v3911_v4 = vmax.f32 %v2125_v52, %v2181_v47 }
  0xef   :  { %v8348_v5 = vmax.f32 %v2200_v50, %v2201_v62  ;;  %v839_v6 = vrot.slane %v825_v61, %v8304_v43  ;;  %v840_v8 = vcombine.high %v832_v63, %v832_v63  ;;  %v2203_v9 = vsel %vm2118_vm1, %v832_v63, -inf }
  0xf0   :  { %v2132_v10 = vmax.f32 %v2130_v53, %v2131_v0  ;;  %v2139_v11 = vmax.f32 %v2137_v55, %v2138_v1  ;;  %v2145_v13 = vrot.slane %v2144_v3, 1  ;;  %v2204_v14 = vrot.slane %v2203_v9, 4 }
  0xf1   :  { %v841_v15 = vcombine.high %v839_v6, %v839_v6  ;;  %v2210_v16 = vsel %vm2118_vm1, %v840_v8, -inf  ;;  %v2217_v18 = vsel %vm2118_vm1, %v839_v6, -inf  ;;  %v791_v19 = vcombine.high %v8313_v57, %v8313_v57  ;;  %v8359_v20 = vpop.f32.mrb[12].mxu0 }
  0xf2   :  { %v2146_v54 = vmax.f32 %v2144_v3, %v2145_v13  ;;  %v3912_v61 = vmax.f32 %v2132_v10, %v2188_v59  ;;  %v3913_v21 = vmax.f32 %v2139_v11, %v2195_v60  ;;  %v2205_v22 = vmax.f32 %v2203_v9, %v2204_v14  ;;  %v8361_v23 = vpop.f32.mrb[13].mxu0 }
  0xf3   :  { %v2211_v24 = vrot.slane %v2210_v16, 4  ;;  %v2218_v25 = vrot.slane %v2217_v18, 4  ;;  %v2224_v26 = vsel %vm2118_vm1, %v841_v15, -inf  ;;  %v798_v27 = vrot.slane %v8313_v57, %v8304_v43  ;;  %v8366_v28 = vpop.f32.mrb[14].mxu0 }
  0xf4   :  { %v3914_v29 = vmax.f32 %v2146_v54, %v8348_v5  ;;  %v4208_v30 = vsel %vm4207_vm2, %v3912_v61, %v3911_v4  ;;  %v2206_v31 = vrot.slane %v2205_v22, 2  ;;  %v2225_v32 = vrot.slane %v2224_v26, 4  ;;  %v8370_v33 = vpop.f32.mrb[15].mxu0 }
  0xf5   :  { %v4210_v34 = vsel %vm4209_vm3, %v3913_v21, %v4208_v30  ;;  %v2212_v35 = vmax.f32 %v2210_v16, %v2211_v24  ;;  %v2219_v36 = vmax.f32 %v2217_v18, %v2218_v25  ;;  %v805_v37 = vrot.slane %v791_v19, %v8304_v43 }
  0xf6   :  { %v2207_v38 = vmax.f32 %v2205_v22, %v2206_v31  ;;  %v2226_v41 = vmax.f32 %v2224_v26, %v2225_v32  ;;  %v806_v42 = vcombine.high %v798_v27, %v798_v27  ;;  %v2147_v57 = vsel %vm2118_vm1, %v798_v27, -inf }
  0xf7   :  { %v2213_v44 = vrot.slane %v2212_v35, 2  ;;  %v2220_v45 = vrot.slane %v2219_v36, 2  ;;  %v807_v47 = vcombine.high %v805_v37, %v805_v37  ;;  %v2148_v48 = vrot.slane %v2147_v57, 4 }
  0xf8   :  { %v2208_v49 = vrot.slane %v2207_v38, 1  ;;  %v2227_v50 = vrot.slane %v2226_v41, 2  ;;  %v2154_v52 = vsel %vm2118_vm1, %v806_v42, -inf  ;;  %v2161_v53 = vsel %vm2118_vm1, %v805_v37, -inf }
  0xf9   :  { %v2214_v55 = vmax.f32 %v2212_v35, %v2213_v44  ;;  %v2221_v56 = vmax.f32 %v2219_v36, %v2220_v45  ;;  %v2149_v59 = vmax.f32 %v2147_v57, %v2148_v48  ;;  %v2155_v60 = vrot.slane %v2154_v52, 4  ;;  %v8377_v62 = vpop.f32.mrb[16].mxu0  ;;  %v8056_v35 = vld [vmem:[%s10114_s3 + $0xc0] sm:$0xff]  }
  0xfa   :  { %v2209_v63 = vmax.f32 %v2207_v38, %v2208_v49  ;;  %v2228_v0 = vmax.f32 %v2226_v41, %v2227_v50  ;;  %v2162_v1 = vrot.slane %v2161_v53, 4  ;;  %v2168_v3 = vsel %vm2118_vm1, %v807_v47, -inf  ;;  %v8380_v4 = vpop.f32.mrb[17].mxu0  ;;  %7698 = vmatprep.subr.bf16.mxu1 %v8056_v35 }
  0xfb   :  { %v2215_v5 = vrot.slane %v2214_v55, 1  ;;  %v2222_v6 = vrot.slane %v2221_v56, 1  ;;  %v2150_v8 = vrot.slane %v2149_v59, 2  ;;  %v2156_v9 = vmax.f32 %v2154_v52, %v2155_v60  ;;  %v8382_v10 = vpop.f32.mrb[18].mxu0  ;;  %7699 = vmatpush3.bf16.msra.mxu1 %v8056_v35 }
  0xfc   :  { %v2229_v11 = vrot.slane %v2228_v0, 1  ;;  %v2163_v13 = vmax.f32 %v2161_v53, %v2162_v1  ;;  %v2169_v14 = vrot.slane %v2168_v3, 4  ;;  %v4212_v15 = vsel %vm4211_vm4, %v3914_v29, %v4210_v34  ;;  %v8405_v48 = vpop.f32.mrb[19].mxu0 }
  0xfd   :  { %v2216_v16 = vmax.f32 %v2214_v55, %v2215_v5  ;;  %v2223_v18 = vmax.f32 %v2221_v56, %v2222_v6  ;;  %v2151_v19 = vmax.f32 %v2149_v59, %v2150_v8  ;;  %v2157_v54 = vrot.slane %v2156_v9, 2 }
  0xfe   :  { %v2230_v61 = vmax.f32 %v2228_v0, %v2229_v11  ;;  %v2164_v21 = vrot.slane %v2163_v13, 2  ;;  %v2170_v22 = vmax.f32 %v2168_v3, %v2169_v14  ;;  %v416_v24 = vadd.f32 %v8321_v2, %v8298_v39  ;;  %v8055_v2 = vld [vmem:[%s10114_s3 + $0x50] sm:$0xff]  }
  0xff   :  { %v2152_v25 = vrot.slane %v2151_v19, 1  ;;  %v2158_v26 = vmax.f32 %v2156_v9, %v2157_v54  ;;  %v408_v27 = vadd.f32 %v8298_v39, %v8325_v7  ;;  %v419_v29 = vadd.f32 %v8327_v12, %v8298_v39  ;;  %7606 = vmatprep.subr.bf16.mxu0 %v8055_v2 }
 0x100   :  { %v2165_v30 = vmax.f32 %v2163_v13, %v2164_v21  ;;  %v2171_v31 = vrot.slane %v2170_v22, 2  ;;  %v652_v32 = vmax.f32 %v416_v24, 0.0  ;;  %v8393_v34 = vadd.f32 %v8298_v39, %v8332_v17  ;;  %7607 = vmatpush3.bf16.msra.mxu0 %v8055_v2 }
 0x101   :  { %v2153_v36 = vmax.f32 %v2151_v19, %v2152_v25  ;;  %v2159_v7 = vrot.slane %v2158_v26, 1  ;;  %v650_v37 = vmax.f32 %v408_v27, 0.0  ;;  %v8401_v38 = vmax.f32 %v419_v29, 0.0 }
 0x102   :  { %v2166_v12 = vrot.slane %v2165_v30, 1  ;;  %v2172_v41 = vmax.f32 %v2170_v22, %v2171_v31  ;;  %v876_v42 = vcombine.high %v652_v32, %v652_v32  ;;  %v883_v57 = vrot.slane %v652_v32, %v8304_v43 }
 0x103   :  { %v2160_v17 = vmax.f32 %v2158_v26, %v2159_v7  ;;  %v3915_v44 = vmax.f32 %v2153_v36, %v2209_v63  ;;  %v842_v45 = vcombine.high %v650_v37, %v650_v37  ;;  %v849_v47 = vrot.slane %v650_v37, %v8304_v43 }
 0x104   :  { %v2167_v49 = vmax.f32 %v2165_v30, %v2166_v12  ;;  %v2173_v50 = vrot.slane %v2172_v41, 1  ;;  %v890_v52 = vrot.slane %v876_v42, %v8304_v43  ;;  %v891_v53 = vcombine.high %v883_v57, %v883_v57  ;;  %v8057_v12 = vld [vmem:[%s10114_s3 + $0x58] sm:$0xff]  }
 0x105   :  { %v3916_v55 = vmax.f32 %v2160_v17, %v2216_v16  ;;  %v4214_v56 = vsel %vm4213_vm5, %v3915_v44, %v4212_v15  ;;  %v2287_v59 = vsel %vm2118_vm1, %v883_v57, -inf  ;;  %v856_v60 = vrot.slane %v842_v45, %v8304_v43  ;;  %7608 = vmatprep.subr.bf16.mxu0 %v8057_v12 }
 0x106   :  { %v2174_v63 = vmax.f32 %v2172_v41, %v2173_v50  ;;  %v3917_v0 = vmax.f32 %v2167_v49, %v2223_v18  ;;  %v892_v1 = vcombine.high %v890_v52, %v890_v52  ;;  %v2288_v3 = vrot.slane %v2287_v59, 4  ;;  %v8058_v41 = vld [vmem:[%s10114_s3 + $0xc8] sm:$0xff]   ;;  %7609 = vmatpush3.bf16.msra.mxu0 %v8057_v12 }
 0x107   :  { %v4216_v5 = vsel %vm4215_vm6, %v3916_v55, %v4214_v56  ;;  %v2294_v6 = vsel %vm2118_vm1, %v891_v53, -inf  ;;  %v2301_v8 = vsel %vm2118_vm1, %v890_v52, -inf  ;;  %v857_v9 = vcombine.high %v849_v47, %v849_v47  ;;  %7700 = vmatprep.subr.bf16.mxu1 %v8058_v41 }
 0x108   :  { %v3918_v11 = vmax.f32 %v2174_v63, %v2230_v61  ;;  %v4218_v13 = vsel %vm4217_vm7, %v3917_v0, %v4216_v5  ;;  %v2289_v14 = vmax.f32 %v2287_v59, %v2288_v3  ;;  %v2295_v15 = vrot.slane %v2294_v6, 4  ;;  %7701 = vmatpush3.bf16.msra.mxu1 %v8058_v41 }
 0x109   :  { %v2302_v16 = vrot.slane %v2301_v8, 4  ;;  %v2308_v19 = vsel %vm2118_vm1, %v892_v1, -inf  ;;  %v858_v54 = vcombine.high %v856_v60, %v856_v60  ;;  %v2231_v18 = vsel %vm2118_vm1, %v849_v47, -inf  ;;  %v8427_v1 = vpop.f32.mrb[20].mxu0 }
 0x10a   :  { %v4220_v21 = vsel %vm4219_vm8, %v3918_v11, %v4218_v13  ;;  %v2290_v22 = vrot.slane %v2289_v14, 2  ;;  %v2296_v24 = vmax.f32 %v2294_v6, %v2295_v15  ;;  %v2309_v25 = vrot.slane %v2308_v19, 4  ;;  %v8439_v41 = vpop.f32.mrb[21].mxu0 }
 0x10b   :  { %4343 = vst [vmem:[#allocation2 + $0x11] sm:$0xff] %v4220_v21  ;;  %v2303_v26 = vmax.f32 %v2301_v8, %v2302_v16  ;;  %v2232_v27 = vrot.slane %v2231_v18, 4  ;;  %v2238_v61 = vsel %vm2118_vm1, %v857_v9, -inf  ;;  %v2245_v29 = vsel %vm2118_vm1, %v856_v60, -inf }
 0x10c   :  { %v2291_v30 = vmax.f32 %v2289_v14, %v2290_v22  ;;  %v2297_v31 = vrot.slane %v2296_v24, 2  ;;  %v2310_v32 = vmax.f32 %v2308_v19, %v2309_v25  ;;  %v2239_v2 = vrot.slane %v2238_v61, 4 }
 0x10d   :  { %v2304_v35 = vrot.slane %v2303_v26, 2  ;;  %v2233_v36 = vmax.f32 %v2231_v18, %v2232_v27  ;;  %v2246_v7 = vrot.slane %v2245_v29, 4  ;;  %v2252_v37 = vsel %vm2118_vm1, %v858_v54, -inf }
 0x10e   :  { %v2292_v42 = vrot.slane %v2291_v30, 1  ;;  %v2298_v57 = vmax.f32 %v2296_v24, %v2297_v31  ;;  %v2311_v17 = vrot.slane %v2310_v32, 2  ;;  %v2240_v44 = vmax.f32 %v2238_v61, %v2239_v2 }
 0x10f   :  { %v2305_v45 = vmax.f32 %v2303_v26, %v2304_v35  ;;  %v2234_v47 = vrot.slane %v2233_v36, 2  ;;  %v2247_v49 = vmax.f32 %v2245_v29, %v2246_v7  ;;  %v2253_v50 = vrot.slane %v2252_v37, 4 }
 0x110   :  { %v2293_v52 = vmax.f32 %v2291_v30, %v2292_v42  ;;  %v2299_v53 = vrot.slane %v2298_v57, 1  ;;  %v2312_v55 = vmax.f32 %v2310_v32, %v2311_v17  ;;  %v2241_v56 = vrot.slane %v2240_v44, 2 }
 0x111   :  { %v2306_v59 = vrot.slane %v2305_v45, 1  ;;  %v2235_v60 = vmax.f32 %v2233_v36, %v2234_v47  ;;  %v2248_v63 = vrot.slane %v2247_v49, 2  ;;  %v2254_v0 = vmax.f32 %v2252_v37, %v2253_v50 }
 0x112   :  { %v2300_v3 = vmax.f32 %v2298_v57, %v2299_v53  ;;  %v2313_v5 = vrot.slane %v2312_v55, 1  ;;  %v2242_v6 = vmax.f32 %v2240_v44, %v2241_v56  ;;  %v893_v8 = vcombine.high %v8401_v38, %v8401_v38 }
 0x113   :  { %v2307_v9 = vmax.f32 %v2305_v45, %v2306_v59  ;;  %v2236_v11 = vrot.slane %v2235_v60, 1  ;;  %v2249_v13 = vmax.f32 %v2247_v49, %v2248_v63  ;;  %v2255_v14 = vrot.slane %v2254_v0, 2 }
 0x114   :  { %v2314_v15 = vmax.f32 %v2312_v55, %v2313_v5  ;;  %v2243_v16 = vrot.slane %v2242_v6, 1  ;;  %v900_v19 = vrot.slane %v8401_v38, %v8304_v43  ;;  %v907_v54 = vrot.slane %v893_v8, %v8304_v43 }
 0x115   :  { %v2237_v18 = vmax.f32 %v2235_v60, %v2236_v11  ;;  %v2250_v21 = vrot.slane %v2249_v13, 1  ;;  %v2256_v22 = vmax.f32 %v2254_v0, %v2255_v14  ;;  %v651_v24 = vmax.f32 %v8393_v34, 0.0 }
 0x116   :  { %v2244_v25 = vmax.f32 %v2242_v6, %v2243_v16  ;;  %v908_v26 = vcombine.high %v900_v19, %v900_v19  ;;  %v909_v27 = vcombine.high %v907_v54, %v907_v54  ;;  %v2315_v61 = vsel %vm2118_vm1, %v900_v19, -inf }
 0x117   :  { %v2251_v29 = vmax.f32 %v2249_v13, %v2250_v21  ;;  %v2257_v30 = vrot.slane %v2256_v22, 1  ;;  %v3919_v31 = vmax.f32 %v2237_v18, %v2293_v52  ;;  %v2316_v32 = vrot.slane %v2315_v61, 4 }
 0x118   :  { %v3920_v2 = vmax.f32 %v2244_v25, %v2300_v3  ;;  %v2322_v35 = vsel %vm2118_vm1, %v908_v26, -inf  ;;  %v2329_v38 = vsel %vm2118_vm1, %v907_v54, -inf  ;;  %v2336_v36 = vsel %vm2118_vm1, %v909_v27, -inf }
 0x119   :  { %v2258_v7 = vmax.f32 %v2256_v22, %v2257_v30  ;;  %v3921_v37 = vmax.f32 %v2251_v29, %v2307_v9  ;;  %v2317_v12 = vmax.f32 %v2315_v61, %v2316_v32  ;;  %v2323_v34 = vrot.slane %v2322_v35, 4 }
 0x11a   :  { %v4221_v42 = vsel %vm4207_vm2, %v3920_v2, %v3919_v31  ;;  %v2330_v57 = vrot.slane %v2329_v38, 4  ;;  %v2337_v17 = vrot.slane %v2336_v36, 4  ;;  %v859_v44 = vcombine.high %v651_v24, %v651_v24 }
 0x11b   :  { %v3922_v45 = vmax.f32 %v2258_v7, %v2314_v15  ;;  %v4222_v47 = vsel %vm4209_vm3, %v3921_v37, %v4221_v42  ;;  %v2318_v49 = vrot.slane %v2317_v12, 2  ;;  %v2324_v50 = vmax.f32 %v2322_v35, %v2323_v34 }
 0x11c   :  { %v2331_v52 = vmax.f32 %v2329_v38, %v2330_v57  ;;  %v2338_v53 = vmax.f32 %v2336_v36, %v2337_v17  ;;  %v866_v55 = vrot.slane %v651_v24, %v8304_v43  ;;  %v873_v56 = vrot.slane %v859_v44, %v8304_v43 }
 0x11d   :  { %v2319_v59 = vmax.f32 %v2317_v12, %v2318_v49  ;;  %v2325_v60 = vrot.slane %v2324_v50, 2  ;;  %v8446_v63 = vsel %vm4211_vm4, %v3922_v45, %v4222_v47  ;;  %v432_v0 = vadd.f32 %v8338_v40, %v8298_v39  ;;  %v8453_v40 = vpop.f32.mrb[22].mxu0 }
 0x11e   :  { %v2332_v3 = vrot.slane %v2331_v52, 2  ;;  %v2339_v5 = vrot.slane %v2338_v53, 2  ;;  %v874_v6 = vcombine.high %v866_v55, %v866_v55  ;;  %v875_v8 = vcombine.high %v873_v56, %v873_v56 }
 0x11f   :  { %v2320_v9 = vrot.slane %v2319_v59, 1  ;;  %v2326_v11 = vmax.f32 %v2324_v50, %v2325_v60  ;;  %v2259_v13 = vsel %vm2118_vm1, %v866_v55, -inf  ;;  %v2273_v14 = vsel %vm2118_vm1, %v873_v56, -inf }
 0x120   :  { %v2333_v15 = vmax.f32 %v2331_v52, %v2332_v3  ;;  %v2340_v16 = vmax.f32 %v2338_v53, %v2339_v5  ;;  %v2260_v19 = vrot.slane %v2259_v13, 4  ;;  %v2266_v54 = vsel %vm2118_vm1, %v874_v6, -inf  ;;  %v8059_v52 = vld [vmem:[%s10114_s3 + $0x60] sm:$0xff]   ;;  %v8060_v53 = vld [vmem:[%s10114_s3 + $0xd0] sm:$0xff]  }
 0x121   :  { %v2321_v18 = vmax.f32 %v2319_v59, %v2320_v9  ;;  %v2327_v21 = vrot.slane %v2326_v11, 1  ;;  %v2267_v22 = vrot.slane %v2266_v54, 4  ;;  %v2274_v24 = vrot.slane %v2273_v14, 4  ;;  %7610 = vmatprep.subr.bf16.mxu0 %v8059_v52  ;;  %7702 = vmatprep.subr.bf16.mxu1 %v8060_v53  ;;  %v8471_v9 = vpop.f32.mrb[23].mxu0 }
 0x122   :  { %v2334_v25 = vrot.slane %v2333_v15, 1  ;;  %v2341_v26 = vrot.slane %v2340_v16, 1  ;;  %v2261_v27 = vmax.f32 %v2259_v13, %v2260_v19  ;;  %v2280_v61 = vsel %vm2118_vm1, %v875_v8, -inf  ;;  %7611 = vmatpush3.bf16.msra.mxu0 %v8059_v52  ;;  %7703 = vmatpush3.bf16.msra.mxu1 %v8060_v53 }
 0x123   :  { %v2328_v29 = vmax.f32 %v2326_v11, %v2327_v21  ;;  %v2268_v30 = vmax.f32 %v2266_v54, %v2267_v22  ;;  %v2275_v31 = vmax.f32 %v2273_v14, %v2274_v24  ;;  %v2281_v32 = vrot.slane %v2280_v61, 4 }
 0x124   :  { %v2335_v2 = vmax.f32 %v2333_v15, %v2334_v25  ;;  %v2342_v35 = vmax.f32 %v2340_v16, %v2341_v26  ;;  %v2262_v38 = vrot.slane %v2261_v27, 2  ;;  %v656_v36 = vmax.f32 %v432_v0, 0.0 }
 0x125   :  { %v2269_v7 = vrot.slane %v2268_v30, 2  ;;  %v2276_v37 = vrot.slane %v2275_v31, 2  ;;  %v2282_v12 = vmax.f32 %v2280_v61, %v2281_v32  ;;  %v424_v34 = vadd.f32 %v8298_v39, %v8340_v46 }
 0x126   :  { %v2263_v42 = vmax.f32 %v2261_v27, %v2262_v38  ;;  %v944_v57 = vcombine.high %v656_v36, %v656_v36  ;;  %v951_v17 = vrot.slane %v656_v36, %v8304_v43  ;;  %v435_v44 = vadd.f32 %v8342_v51, %v8298_v39 }
 0x127   :  { %v2270_v45 = vmax.f32 %v2268_v30, %v2269_v7  ;;  %v2277_v47 = vmax.f32 %v2275_v31, %v2276_v37  ;;  %v2283_v49 = vrot.slane %v2282_v12, 2  ;;  %v654_v50 = vmax.f32 %v424_v34, 0.0 }
 0x128   :  { %v2264_v46 = vrot.slane %v2263_v42, 1  ;;  %v958_v55 = vrot.slane %v944_v57, %v8304_v43  ;;  %v959_v56 = vcombine.high %v951_v17, %v951_v17  ;;  %v2399_v59 = vsel %vm2118_vm1, %v951_v17, -inf }
 0x129   :  { %v2271_v60 = vrot.slane %v2270_v45, 1  ;;  %v2278_v39 = vrot.slane %v2277_v47, 1  ;;  %v2284_v51 = vmax.f32 %v2282_v12, %v2283_v49  ;;  %v2400_v0 = vrot.slane %v2399_v59, 4 }
 0x12a   :  { %v2265_v3 = vmax.f32 %v2263_v42, %v2264_v46  ;;  %v960_v5 = vcombine.high %v958_v55, %v958_v55  ;;  %v2406_v6 = vsel %vm2118_vm1, %v959_v56, -inf  ;;  %v2413_v8 = vsel %vm2118_vm1, %v958_v55, -inf }
 0x12b   :  { %v2272_v11 = vmax.f32 %v2270_v45, %v2271_v60  ;;  %v2279_v13 = vmax.f32 %v2277_v47, %v2278_v39  ;;  %v2285_v14 = vrot.slane %v2284_v51, 1  ;;  %v2401_v15 = vmax.f32 %v2399_v59, %v2400_v0  ;;  %v8062_v0 = vld [vmem:[%s10114_s3 + $0xd8] sm:$0xff]  }
 0x12c   :  { %v3923_v16 = vmax.f32 %v2265_v3, %v2321_v18  ;;  %v2407_v19 = vrot.slane %v2406_v6, 4  ;;  %v2414_v54 = vrot.slane %v2413_v8, 4  ;;  %v2420_v21 = vsel %vm2118_vm1, %v960_v5, -inf  ;;  %7704 = vmatprep.subr.bf16.mxu1 %v8062_v0 }
 0x12d   :  { %v2286_v22 = vmax.f32 %v2284_v51, %v2285_v14  ;;  %v3924_v24 = vmax.f32 %v2272_v11, %v2328_v29  ;;  %v3925_v25 = vmax.f32 %v2279_v13, %v2335_v2  ;;  %v2402_v26 = vrot.slane %v2401_v15, 2  ;;  %7705 = vmatpush3.bf16.msra.mxu1 %v8062_v0 }
 0x12e   :  { %v4224_v27 = vsel %vm4213_vm5, %v3923_v16, %v8446_v63  ;;  %v2408_v61 = vmax.f32 %v2406_v6, %v2407_v19  ;;  %v2415_v30 = vmax.f32 %v2413_v8, %v2414_v54  ;;  %v2421_v31 = vrot.slane %v2420_v21, 4 }
 0x12f   :  { %v3926_v32 = vmax.f32 %v2286_v22, %v2342_v35  ;;  %v4225_v38 = vsel %vm4215_vm6, %v3924_v24, %v4224_v27  ;;  %v2403_v36 = vmax.f32 %v2401_v15, %v2402_v26  ;;  %v910_v7 = vcombine.high %v654_v50, %v654_v50 }
 0x130   :  { %v4226_v18 = vsel %vm4217_vm7, %v3925_v25, %v4225_v38  ;;  %v2409_v37 = vrot.slane %v2408_v61, 2  ;;  %v2416_v12 = vrot.slane %v2415_v30, 2  ;;  %v2422_v34 = vmax.f32 %v2420_v21, %v2421_v31  ;;  %v8504_v21 = vld [vmem:[%s10113_s2] ss:$0 sm:$0xff] }
 0x131   :  { %v4227_v29 = vsel %vm4219_vm8, %v3926_v32, %v4226_v18  ;;  %v2404_v2 = vrot.slane %v2403_v36, 1  ;;  %v917_v42 = vrot.slane %v654_v50, %v8304_v43  ;;  %v924_v63 = vrot.slane %v910_v7, %v8304_v43 }
 0x132   :  { %4344 = vst [vmem:[#allocation2 + $0x21] sm:$0xff] %v4227_v29  ;;  %v2410_v57 = vmax.f32 %v2408_v61, %v2409_v37  ;;  %v2417_v17 = vmax.f32 %v2415_v30, %v2416_v12  ;;  %v2423_v35 = vrot.slane %v2422_v34, 2  ;;  %v657_v45 = vmax.f32 %v435_v44, 0.0  ;;  %v8061_v44 = vld [vmem:[%s10114_s3 + $0x68] sm:$0xff]   ;;  %v8508_v61 = vpop.f32.mrb[24].mxu0 }
 0x133   :  { %v8481_v47 = vmax.f32 %v2403_v36, %v2404_v2  ;;  %v925_v49 = vcombine.high %v917_v42, %v917_v42  ;;  %v926_v52 = vcombine.high %v924_v63, %v924_v63  ;;  %v2343_v53 = vsel %vm2118_vm1, %v917_v42, -inf  ;;  %7612 = vmatprep.subr.bf16.mxu0 %v8061_v44 }
 0x134   :  { %v2411_v46 = vrot.slane %v2410_v57, 1  ;;  %v2418_v55 = vrot.slane %v2417_v17, 1  ;;  %v2424_v56 = vmax.f32 %v2422_v34, %v2423_v35  ;;  %v2344_v59 = vrot.slane %v2343_v53, 4  ;;  %7613 = vmatpush3.bf16.msra.mxu0 %v8061_v44 }
 0x135   :  { %v2350_v60 = vsel %vm2118_vm1, %v925_v49, -inf  ;;  %v2357_v50 = vsel %vm2118_vm1, %v924_v63, -inf  ;;  %v2364_v39 = vsel %vm2118_vm1, %v926_v52, -inf  ;;  %v961_v51 = vcombine.high %v657_v45, %v657_v45  ;;  %v8514_v52 = vpop.f32.mrb[25].mxu0 }
 0x136   :  { %v8493_v3 = vmax.f32 %v2410_v57, %v2411_v46  ;;  %v8495_v5 = vmax.f32 %v2417_v17, %v2418_v55  ;;  %v2425_v6 = vrot.slane %v2424_v56, 1  ;;  %v2345_v8 = vmax.f32 %v2343_v53, %v2344_v59 }
 0x137   :  { %v2351_v11 = vrot.slane %v2350_v60, 4  ;;  %v2358_v13 = vrot.slane %v2357_v50, 4  ;;  %v2365_v14 = vrot.slane %v2364_v39, 4  ;;  %v968_v15 = vrot.slane %v657_v45, %v8304_v43 }
 0x138   :  { %v8498_v16 = vmax.f32 %v2424_v56, %v2425_v6  ;;  %v2346_v19 = vrot.slane %v2345_v8, 2  ;;  %v975_v54 = vrot.slane %v961_v51, %v8304_v43  ;;  %v427_v22 = vadd.f32 %v8504_v21, %v8344_v58 }
 0x139   :  { %v2352_v24 = vmax.f32 %v2350_v60, %v2351_v11  ;;  %v2359_v25 = vmax.f32 %v2357_v50, %v2358_v13  ;;  %v2366_v26 = vmax.f32 %v2364_v39, %v2365_v14  ;;  %v976_v27 = vcombine.high %v968_v15, %v968_v15 }
 0x13a   :  { %v2347_v30 = vmax.f32 %v2345_v8, %v2346_v19  ;;  %v977_v31 = vcombine.high %v975_v54, %v975_v54  ;;  %v2427_v32 = vsel %vm2118_vm1, %v968_v15, -inf  ;;  %v2441_v38 = vsel %vm2118_vm1, %v975_v54, -inf }
 0x13b   :  { %v2353_v36 = vrot.slane %v2352_v24, 2  ;;  %v2360_v7 = vrot.slane %v2359_v25, 2  ;;  %v2367_v18 = vrot.slane %v2366_v26, 2  ;;  %v2428_v37 = vrot.slane %v2427_v32, 4 }
 0x13c   :  { %v2348_v12 = vrot.slane %v2347_v30, 1  ;;  %v2434_v58 = vsel %vm2118_vm1, %v976_v27, -inf  ;;  %v2442_v34 = vrot.slane %v2441_v38, 4  ;;  %v2448_v29 = vsel %vm2118_vm1, %v977_v31, -inf }
 0x13d   :  { %v2354_v2 = vmax.f32 %v2352_v24, %v2353_v36  ;;  %v2361_v42 = vmax.f32 %v2359_v25, %v2360_v7  ;;  %v2368_v63 = vmax.f32 %v2366_v26, %v2367_v18  ;;  %v2429_v57 = vmax.f32 %v2427_v32, %v2428_v37 }
 0x13e   :  { %v2349_v17 = vmax.f32 %v2347_v30, %v2348_v12  ;;  %v2435_v35 = vrot.slane %v2434_v58, 4  ;;  %v2443_v45 = vmax.f32 %v2441_v38, %v2442_v34  ;;  %v2449_v49 = vrot.slane %v2448_v29, 4 }
 0x13f   :  { %v2355_v53 = vrot.slane %v2354_v2, 1  ;;  %v2362_v46 = vrot.slane %v2361_v42, 1  ;;  %v2369_v55 = vrot.slane %v2368_v63, 1  ;;  %v2430_v56 = vrot.slane %v2429_v57, 2 }
 0x140   :  { %v3927_v59 = vmax.f32 %v2349_v17, %v8481_v47  ;;  %v2436_v60 = vmax.f32 %v2434_v58, %v2435_v35  ;;  %v2444_v50 = vrot.slane %v2443_v45, 2  ;;  %v2450_v39 = vmax.f32 %v2448_v29, %v2449_v49 }
 0x141   :  { %v2356_v51 = vmax.f32 %v2354_v2, %v2355_v53  ;;  %v2363_v44 = vmax.f32 %v2361_v42, %v2362_v46  ;;  %v2370_v0 = vmax.f32 %v2368_v63, %v2369_v55  ;;  %v2431_v6 = vmax.f32 %v2429_v57, %v2430_v56  ;;  %v8542_v57 = vpop.f32.mrb[26].mxu0 }
 0x142   :  { %v2437_v8 = vrot.slane %v2436_v60, 2  ;;  %v2445_v11 = vmax.f32 %v2443_v45, %v2444_v50  ;;  %v2451_v13 = vrot.slane %v2450_v39, 2  ;;  %v655_v14 = vmax.f32 %v427_v22, 0.0 }
 0x143   :  { %v3928_v15 = vmax.f32 %v2356_v51, %v8493_v3  ;;  %v3929_v19 = vmax.f32 %v2363_v44, %v8495_v5  ;;  %v3930_v54 = vmax.f32 %v2370_v0, %v8498_v16  ;;  %v2432_v24 = vrot.slane %v2431_v6, 1 }
 0x144   :  { %v2438_v25 = vmax.f32 %v2436_v60, %v2437_v8  ;;  %v2446_v47 = vrot.slane %v2445_v11, 1  ;;  %v2452_v26 = vmax.f32 %v2450_v39, %v2451_v13  ;;  %v927_v27 = vcombine.high %v655_v14, %v655_v14 }
 0x145   :  { %v4228_v30 = vsel %vm4207_vm2, %v3928_v15, %v3927_v59  ;;  %v8521_v31 = vmax.f32 %v2431_v6, %v2432_v24  ;;  %v934_v32 = vrot.slane %v655_v14, %v8304_v43  ;;  %v448_v22 = vadd.f32 %v8504_v21, %v8359_v20  ;;  %v8064_v24 = vld [vmem:[%s10114_s3 + $0xe0] sm:$0xff]  }
 0x146   :  { %v4229_v3 = vsel %vm4209_vm3, %v3929_v19, %v4228_v30  ;;  %v2439_v38 = vrot.slane %v2438_v25, 1  ;;  %v8527_v5 = vmax.f32 %v2445_v11, %v2446_v47  ;;  %v2453_v16 = vrot.slane %v2452_v26, 1  ;;  %7706 = vmatprep.subr.bf16.mxu1 %v8064_v24 }
 0x147   :  { %v941_v36 = vrot.slane %v927_v27, %v8304_v43  ;;  %v942_v7 = vcombine.high %v934_v32, %v934_v32  ;;  %v2371_v18 = vsel %vm2118_vm1, %v934_v32, -inf  ;;  %v8532_v37 = vsel %vm4211_vm4, %v3930_v54, %v4229_v3  ;;  %v8063_v54 = vld [vmem:[%s10114_s3 + $0x70] sm:$0xff]   ;;  %7707 = vmatpush3.bf16.msra.mxu1 %v8064_v24 }
 0x148   :  { %v8534_v12 = vmax.f32 %v2438_v25, %v2439_v38  ;;  %v8536_v58 = vmax.f32 %v2452_v26, %v2453_v16  ;;  %v2372_v34 = vrot.slane %v2371_v18, 4  ;;  %v660_v20 = vmax.f32 %v448_v22, 0.0  ;;  %7614 = vmatprep.subr.bf16.mxu0 %v8063_v54 }
 0x149   :  { %v943_v29 = vcombine.high %v941_v36, %v941_v36  ;;  %v2378_v2 = vsel %vm2118_vm1, %v942_v7, -inf  ;;  %v2385_v42 = vsel %vm2118_vm1, %v941_v36, -inf  ;;  %v440_v63 = vadd.f32 %v8504_v21, %v8361_v23  ;;  %7615 = vmatpush3.bf16.msra.mxu0 %v8063_v54 }
 0x14a   :  { %v2373_v17 = vmax.f32 %v2371_v18, %v2372_v34  ;;  %v2379_v35 = vrot.slane %v2378_v2, 4  ;;  %v2386_v45 = vrot.slane %v2385_v42, 4  ;;  %v1012_v49 = vcombine.high %v660_v20, %v660_v20 }
 0x14b   :  { %v2392_v53 = vsel %vm2118_vm1, %v943_v29, -inf  ;;  %v1019_v46 = vrot.slane %v660_v20, %v8304_v43  ;;  %v658_v55 = vmax.f32 %v440_v63, 0.0  ;;  %v8548_v56 = vadd.f32 %v8504_v21, %v8366_v28 }
 0x14c   :  { %v2374_v59 = vrot.slane %v2373_v17, 2  ;;  %v2380_v60 = vmax.f32 %v2378_v2, %v2379_v35  ;;  %v2387_v50 = vmax.f32 %v2385_v42, %v2386_v45  ;;  %v2393_v39 = vrot.slane %v2392_v53, 4 }
 0x14d   :  { %v1026_v23 = vrot.slane %v1012_v49, %v8304_v43  ;;  %v1027_v51 = vcombine.high %v1019_v46, %v1019_v46  ;;  %v2511_v44 = vsel %vm2118_vm1, %v1019_v46, -inf  ;;  %v978_v0 = vcombine.high %v658_v55, %v658_v55 }
 0x14e   :  { %v2375_v6 = vmax.f32 %v2373_v17, %v2374_v59  ;;  %v2381_v8 = vrot.slane %v2380_v60, 2  ;;  %v2388_v11 = vrot.slane %v2387_v50, 2  ;;  %v2394_v13 = vmax.f32 %v2392_v53, %v2393_v39  ;;  %v8566_v39 = vpop.f32.mrb[27].mxu0 }
 0x14f   :  { %v1028_v14 = vcombine.high %v1026_v23, %v1026_v23  ;;  %v2512_v15 = vrot.slane %v2511_v44, 4  ;;  %v2518_v19 = vsel %vm2118_vm1, %v1027_v51, -inf  ;;  %v2525_v28 = vsel %vm2118_vm1, %v1026_v23, -inf }
 0x150   :  { %v2376_v25 = vrot.slane %v2375_v6, 1  ;;  %v2382_v47 = vmax.f32 %v2380_v60, %v2381_v8  ;;  %v2389_v26 = vmax.f32 %v2387_v50, %v2388_v11  ;;  %v2395_v27 = vrot.slane %v2394_v13, 2 }
 0x151   :  { %v2513_v30 = vmax.f32 %v2511_v44, %v2512_v15  ;;  %v2519_v32 = vrot.slane %v2518_v19, 4  ;;  %v2526_v22 = vrot.slane %v2525_v28, 4  ;;  %v2532_v3 = vsel %vm2118_vm1, %v1028_v14, -inf }
 0x152   :  { %v2377_v38 = vmax.f32 %v2375_v6, %v2376_v25  ;;  %v2383_v16 = vrot.slane %v2382_v47, 1  ;;  %v2390_v36 = vrot.slane %v2389_v26, 1  ;;  %v2396_v7 = vmax.f32 %v2394_v13, %v2395_v27  ;;  %v8065_v25 = vld [vmem:[%s10114_s3 + $0x78] sm:$0xff]  }
 0x153   :  { %v2514_v18 = vrot.slane %v2513_v30, 2  ;;  %v2520_v34 = vmax.f32 %v2518_v19, %v2519_v32  ;;  %v2527_v20 = vmax.f32 %v2525_v28, %v2526_v22  ;;  %v2533_v29 = vrot.slane %v2532_v3, 4  ;;  %7616 = vmatprep.subr.bf16.mxu0 %v8065_v25 }
 0x154   :  { %v2384_v2 = vmax.f32 %v2382_v47, %v2383_v16  ;;  %v2391_v42 = vmax.f32 %v2389_v26, %v2390_v36  ;;  %v2397_v63 = vrot.slane %v2396_v7, 1  ;;  %v3931_v17 = vmax.f32 %v2377_v38, %v8521_v31  ;;  %v8066_v47 = vld [vmem:[%s10114_s3 + $0xe8] sm:$0xff]   ;;  %7617 = vmatpush3.bf16.msra.mxu0 %v8065_v25 }
 0x155   :  { %v2515_v35 = vmax.f32 %v2513_v30, %v2514_v18  ;;  %v2521_v45 = vrot.slane %v2520_v34, 2  ;;  %v2528_v49 = vrot.slane %v2527_v20, 2  ;;  %v2534_v53 = vmax.f32 %v2532_v3, %v2533_v29  ;;  %7708 = vmatprep.subr.bf16.mxu1 %v8066_v47 }
 0x156   :  { %v2398_v46 = vmax.f32 %v2396_v7, %v2397_v63  ;;  %v3932_v59 = vmax.f32 %v2384_v2, %v8534_v12  ;;  %v3933_v60 = vmax.f32 %v2391_v42, %v8527_v5  ;;  %v4231_v50 = vsel %vm4213_vm5, %v3931_v17, %v8532_v37  ;;  %7709 = vmatpush3.bf16.msra.mxu1 %v8066_v47  ;;  %v8596_v63 = vpop.f32.mrb[28].mxu0 }
 0x157   :  { %v2516_v23 = vrot.slane %v2515_v35, 1  ;;  %v2522_v51 = vmax.f32 %v2520_v34, %v2521_v45  ;;  %v2529_v44 = vmax.f32 %v2527_v20, %v2528_v49  ;;  %v2535_v6 = vrot.slane %v2534_v53, 2 }
 0x158   :  { %v3934_v31 = vmax.f32 %v2398_v46, %v8536_v58  ;;  %v4232_v8 = vsel %vm4215_vm6, %v3932_v59, %v4231_v50  ;;  %v985_v11 = vrot.slane %v658_v55, %v8304_v43  ;;  %v992_v13 = vrot.slane %v978_v0, %v8304_v43 }
 0x159   :  { %v4233_v12 = vsel %vm4217_vm7, %v3933_v60, %v4232_v8  ;;  %v8573_v5 = vmax.f32 %v2515_v35, %v2516_v23  ;;  %v2523_v14 = vrot.slane %v2522_v51, 1  ;;  %v2530_v37 = vrot.slane %v2529_v44, 1 }
 0x15a   :  { %v4234_v15 = vsel %vm4219_vm8, %v3934_v31, %v4233_v12  ;;  %v2536_v19 = vmax.f32 %v2534_v53, %v2535_v6  ;;  %v993_v28 = vcombine.high %v985_v11, %v985_v11  ;;  %v994_v54 = vcombine.high %v992_v13, %v992_v13 }
 0x15b   :  { %4345 = vst [vmem:[#allocation2 + $0x31] sm:$0xff] %v4234_v15  ;;  %v8576_v24 = vmax.f32 %v2522_v51, %v2523_v14  ;;  %v8578_v58 = vmax.f32 %v2529_v44, %v2530_v37  ;;  %v2455_v55 = vsel %vm2118_vm1, %v985_v11, -inf  ;;  %v2469_v0 = vsel %vm2118_vm1, %v992_v13, -inf }
 0x15c   :  { %v2537_v26 = vrot.slane %v2536_v19, 1  ;;  %v2456_v27 = vrot.slane %v2455_v55, 4  ;;  %v2462_v30 = vsel %vm2118_vm1, %v993_v28, -inf  ;;  %v2470_v32 = vrot.slane %v2469_v0, 4 }
 0x15d   :  { %v2463_v22 = vrot.slane %v2462_v30, 4  ;;  %v2476_v3 = vsel %vm2118_vm1, %v994_v54, -inf  ;;  %v661_v38 = vmax.f32 %v8548_v56, 0.0  ;;  %v443_v16 = vadd.f32 %v8504_v21, %v8370_v33 }
 0x15e   :  { %v8593_v36 = vmax.f32 %v2536_v19, %v2537_v26  ;;  %v2457_v7 = vmax.f32 %v2455_v55, %v2456_v27  ;;  %v2471_v18 = vmax.f32 %v2469_v0, %v2470_v32  ;;  %v2477_v34 = vrot.slane %v2476_v3, 4  ;;  %v8607_v0 = vpop.f32.mrb[29].mxu0 }
 0x15f   :  { %v2464_v20 = vmax.f32 %v2462_v30, %v2463_v22  ;;  %v1029_v29 = vcombine.high %v661_v38, %v661_v38  ;;  %v1036_v2 = vrot.slane %v661_v38, %v8304_v43  ;;  %v659_v42 = vmax.f32 %v443_v16, 0.0 }
 0x160   :  { %v2458_v56 = vrot.slane %v2457_v7, 2  ;;  %v2472_v17 = vrot.slane %v2471_v18, 2  ;;  %v2478_v35 = vmax.f32 %v2476_v3, %v2477_v34  ;;  %v8600_v33 = vadd.f32 %v8504_v21, %v8377_v62 }
 0x161   :  { %v2465_v45 = vrot.slane %v2464_v20, 2  ;;  %v1043_v49 = vrot.slane %v1029_v29, %v8304_v43  ;;  %v1044_v53 = vcombine.high %v1036_v2, %v1036_v2  ;;  %v2539_v46 = vsel %vm2118_vm1, %v1036_v2, -inf }
 0x162   :  { %v2459_v59 = vmax.f32 %v2457_v7, %v2458_v56  ;;  %v2473_v60 = vmax.f32 %v2471_v18, %v2472_v17  ;;  %v2479_v50 = vrot.slane %v2478_v35, 2  ;;  %v2540_v23 = vrot.slane %v2539_v46, 4 }
 0x163   :  { %v2466_v51 = vmax.f32 %v2464_v20, %v2465_v45  ;;  %v1045_v44 = vcombine.high %v1043_v49, %v1043_v49  ;;  %v2546_v6 = vsel %vm2118_vm1, %v1044_v53, -inf  ;;  %v2553_v31 = vsel %vm2118_vm1, %v1043_v49, -inf }
 0x164   :  { %v2460_v8 = vrot.slane %v2459_v59, 1  ;;  %v2474_v11 = vrot.slane %v2473_v60, 1  ;;  %v2480_v62 = vmax.f32 %v2478_v35, %v2479_v50  ;;  %v2541_v13 = vmax.f32 %v2539_v46, %v2540_v23 }
 0x165   :  { %v2467_v12 = vrot.slane %v2466_v51, 1  ;;  %v2547_v14 = vrot.slane %v2546_v6, 4  ;;  %v2554_v37 = vrot.slane %v2553_v31, 4  ;;  %v2560_v15 = vsel %vm2118_vm1, %v1045_v44, -inf }
 0x166   :  { %v2461_v19 = vmax.f32 %v2459_v59, %v2460_v8  ;;  %v2475_v28 = vmax.f32 %v2473_v60, %v2474_v11  ;;  %v2481_v54 = vrot.slane %v2480_v62, 1  ;;  %v2542_v55 = vrot.slane %v2541_v13, 2  ;;  %v8624_v8 = vpop.f32.mrb[30].mxu0 }
 0x167   :  { %v2468_v25 = vmax.f32 %v2466_v51, %v2467_v12  ;;  %v2548_v47 = vmax.f32 %v2546_v6, %v2547_v14  ;;  %v2555_v26 = vmax.f32 %v2553_v31, %v2554_v37  ;;  %v2561_v27 = vrot.slane %v2560_v15, 4 }
 0x168   :  { %v2482_v30 = vmax.f32 %v2480_v62, %v2481_v54  ;;  %v3935_v32 = vmax.f32 %v2461_v19, %v8573_v5  ;;  %v3937_v22 = vmax.f32 %v2475_v28, %v8578_v58  ;;  %v2543_v3 = vmax.f32 %v2541_v13, %v2542_v55 }
 0x169   :  { %v3936_v38 = vmax.f32 %v2468_v25, %v8576_v24  ;;  %v2549_v16 = vrot.slane %v2548_v47, 2  ;;  %v2556_v7 = vrot.slane %v2555_v26, 2  ;;  %v2562_v18 = vmax.f32 %v2560_v15, %v2561_v27 }
 0x16a   :  { %v3938_v34 = vmax.f32 %v2482_v30, %v8593_v36  ;;  %v2544_v20 = vrot.slane %v2543_v3, 1  ;;  %v995_v29 = vcombine.high %v659_v42, %v659_v42  ;;  %v1002_v2 = vrot.slane %v659_v42, %v8304_v43 }
 0x16b   :  { %v4235_v56 = vsel %vm4207_vm2, %v3936_v38, %v3935_v32  ;;  %v2550_v17 = vmax.f32 %v2548_v47, %v2549_v16  ;;  %v2557_v35 = vmax.f32 %v2555_v26, %v2556_v7  ;;  %v2563_v45 = vrot.slane %v2562_v18, 2 }
 0x16c   :  { %v4236_v5 = vsel %vm4209_vm3, %v3937_v22, %v4235_v56  ;;  %v8616_v58 = vmax.f32 %v2543_v3, %v2544_v20  ;;  %v1009_v24 = vrot.slane %v995_v29, %v8304_v43  ;;  %v1010_v49 = vcombine.high %v1002_v2, %v1002_v2 }
 0x16d   :  { %v2551_v53 = vrot.slane %v2550_v17, 1  ;;  %v2558_v46 = vrot.slane %v2557_v35, 1  ;;  %v2564_v59 = vmax.f32 %v2562_v18, %v2563_v45  ;;  %v2483_v36 = vsel %vm2118_vm1, %v1002_v2, -inf }
 0x16e   :  { %v1011_v60 = vcombine.high %v1009_v24, %v1009_v24  ;;  %v2484_v50 = vrot.slane %v2483_v36, 4  ;;  %v2490_v42 = vsel %vm2118_vm1, %v1010_v49, -inf  ;;  %v2497_v23 = vsel %vm2118_vm1, %v1009_v24, -inf }
 0x16f   :  { %v2552_v51 = vmax.f32 %v2550_v17, %v2551_v53  ;;  %v8622_v44 = vmax.f32 %v2557_v35, %v2558_v46  ;;  %v2565_v6 = vrot.slane %v2564_v59, 1  ;;  %v2491_v31 = vrot.slane %v2490_v42, 4 }
 0x170   :  { %v2485_v11 = vmax.f32 %v2483_v36, %v2484_v50  ;;  %v2498_v62 = vrot.slane %v2497_v23, 4  ;;  %v2504_v13 = vsel %vm2118_vm1, %v1011_v60, -inf  ;;  %v4237_v12 = vsel %vm4211_vm4, %v3938_v34, %v4236_v5 }
 0x171   :  { %v2566_v14 = vmax.f32 %v2564_v59, %v2565_v6  ;;  %v2492_v37 = vmax.f32 %v2490_v42, %v2491_v31  ;;  %v2505_v15 = vrot.slane %v2504_v13, 4  ;;  %v664_v19 = vmax.f32 %v8600_v33, 0.0 }
 0x172   :  { %v2486_v28 = vrot.slane %v2485_v11, 2  ;;  %v2499_v54 = vmax.f32 %v2497_v23, %v2498_v62  ;;  %v456_v55 = vadd.f32 %v8504_v21, %v8380_v4  ;;  %v467_v25 = vadd.f32 %v8504_v21, %v8382_v10  ;;  %v8067_v23 = vld [vmem:[%s10114_s3 + $0xf0] sm:$0xff]  }
 0x173   :  { %v2493_v47 = vrot.slane %v2492_v37, 2  ;;  %v2506_v26 = vmax.f32 %v2504_v13, %v2505_v15  ;;  %v1080_v27 = vcombine.high %v664_v19, %v664_v19  ;;  %v1087_v30 = vrot.slane %v664_v19, %v8304_v43  ;;  %7710 = vmatprep.subr.bf16.mxu1 %v8067_v23 }
 0x174   :  { %v2487_v32 = vmax.f32 %v2485_v11, %v2486_v28  ;;  %v2500_v22 = vrot.slane %v2499_v54, 2  ;;  %v662_v3 = vmax.f32 %v456_v55, 0.0  ;;  %v8634_v38 = vmax.f32 %v467_v25, 0.0  ;;  %v8648_v25 = vpop.f32.mrb[31].mxu0  ;;  %7711 = vmatpush3.bf16.msra.mxu1 %v8067_v23 }
 0x175   :  { %v2494_v16 = vmax.f32 %v2492_v37, %v2493_v47  ;;  %v2507_v33 = vrot.slane %v2506_v26, 2  ;;  %v1094_v7 = vrot.slane %v1080_v27, %v8304_v43  ;;  %v1095_v18 = vcombine.high %v1087_v30, %v1087_v30 }
 0x176   :  { %v2488_v34 = vrot.slane %v2487_v32, 1  ;;  %v2501_v4 = vmax.f32 %v2499_v54, %v2500_v22  ;;  %v2623_v20 = vsel %vm2118_vm1, %v1087_v30, -inf  ;;  %v1046_v10 = vcombine.high %v662_v3, %v662_v3 }
 0x177   :  { %v2495_v29 = vrot.slane %v2494_v16, 1  ;;  %v2508_v2 = vmax.f32 %v2506_v26, %v2507_v33  ;;  %v1096_v56 = vcombine.high %v1094_v7, %v1094_v7  ;;  %v2624_v17 = vrot.slane %v2623_v20, 4 }
 0x178   :  { %v2489_v35 = vmax.f32 %v2487_v32, %v2488_v34  ;;  %v2502_v45 = vrot.slane %v2501_v4, 1  ;;  %v2630_v5 = vsel %vm2118_vm1, %v1095_v18, -inf  ;;  %v2637_v24 = vsel %vm2118_vm1, %v1094_v7, -inf }
 0x179   :  { %v2496_v49 = vmax.f32 %v2494_v16, %v2495_v29  ;;  %v2509_v53 = vrot.slane %v2508_v2, 1  ;;  %v2625_v46 = vmax.f32 %v2623_v20, %v2624_v17  ;;  %v2631_v59 = vrot.slane %v2630_v5, 4 }
 0x17a   :  { %v2503_v36 = vmax.f32 %v2501_v4, %v2502_v45  ;;  %v3939_v60 = vmax.f32 %v2489_v35, %v8616_v58  ;;  %v2638_v50 = vrot.slane %v2637_v24, 4  ;;  %v2644_v42 = vsel %vm2118_vm1, %v1096_v56, -inf  ;;  %v8068_v45 = vld [vmem:[%s10114_s3 + $0xf8] sm:$0xff]  }
 0x17b   :  { %v2510_v6 = vmax.f32 %v2508_v2, %v2509_v53  ;;  %v3940_v31 = vmax.f32 %v2496_v49, %v2552_v51  ;;  %v2626_v11 = vrot.slane %v2625_v46, 2  ;;  %v2632_v62 = vmax.f32 %v2630_v5, %v2631_v59  ;;  %7712 = vmatprep.subr.bf16.mxu1 %v8068_v45 }
 0x17c   :  { %v3941_v13 = vmax.f32 %v2503_v36, %v8622_v44  ;;  %v4238_v37 = vsel %vm4213_vm5, %v3939_v60, %v4237_v12  ;;  %v2639_v15 = vmax.f32 %v2637_v24, %v2638_v50  ;;  %v2645_v19 = vrot.slane %v2644_v42, 4  ;;  %7713 = vmatpush3.bf16.msra.mxu1 %v8068_v45 }
 0x17d   :  { %v3942_v28 = vmax.f32 %v2510_v6, %v2566_v14  ;;  %v4239_v58 = vsel %vm4215_vm6, %v3940_v31, %v4238_v37  ;;  %v2627_v54 = vmax.f32 %v2625_v46, %v2626_v11  ;;  %v2633_v55 = vrot.slane %v2632_v62, 2  ;;  %v8674_v37 = vpop.f32.mrb[32].mxu0 }
 0x17e   :  { %v4240_v47 = vsel %vm4217_vm7, %v3941_v13, %v4239_v58  ;;  %v2640_v51 = vrot.slane %v2639_v15, 2  ;;  %v2646_v26 = vmax.f32 %v2644_v42, %v2645_v19  ;;  %v1053_v27 = vrot.slane %v662_v3, %v8304_v43 }
 0x17f   :  { %v4241_v44 = vsel %vm4219_vm8, %v3942_v28, %v4240_v47  ;;  %v2628_v12 = vrot.slane %v2627_v54, 1  ;;  %v2634_v30 = vmax.f32 %v2632_v62, %v2633_v55  ;;  %v1060_v32 = vrot.slane %v1046_v10, %v8304_v43 }
 0x180   :  { %4346 = vst [vmem:[#allocation2 + $0x41] sm:$0xff] %v4241_v44  ;;  %v2641_v14 = vmax.f32 %v2639_v15, %v2640_v51  ;;  %v2647_v22 = vrot.slane %v2646_v26, 2  ;;  %v1061_v16 = vcombine.high %v1053_v27, %v1053_v27  ;;  %v2567_v33 = vsel %vm2118_vm1, %v1053_v27, -inf }
 0x181   :  { %v8655_v7 = vmax.f32 %v2627_v54, %v2628_v12  ;;  %v2635_v18 = vrot.slane %v2634_v30, 1  ;;  %v1062_v34 = vcombine.high %v1060_v32, %v1060_v32  ;;  %v2568_v4 = vrot.slane %v2567_v33, 4 }
 0x182   :  { %v2642_v20 = vrot.slane %v2641_v14, 1  ;;  %v2648_v29 = vmax.f32 %v2646_v26, %v2647_v22  ;;  %v2574_v3 = vsel %vm2118_vm1, %v1061_v16, -inf  ;;  %v2581_v2 = vsel %vm2118_vm1, %v1060_v32, -inf }
 0x183   :  { %v8659_v56 = vmax.f32 %v2634_v30, %v2635_v18  ;;  %v2569_v10 = vmax.f32 %v2567_v33, %v2568_v4  ;;  %v2575_v17 = vrot.slane %v2574_v3, 4  ;;  %v2582_v35 = vrot.slane %v2581_v2, 4  ;;  %v8680_v18 = vpop.f32.mrb[33].mxu0 }
 0x184   :  { %v2643_v5 = vmax.f32 %v2641_v14, %v2642_v20  ;;  %v2649_v24 = vrot.slane %v2648_v29, 1  ;;  %v2588_v49 = vsel %vm2118_vm1, %v1062_v34, -inf  ;;  %v1097_v53 = vcombine.high %v8634_v38, %v8634_v38 }
 0x185   :  { %v2570_v46 = vrot.slane %v2569_v10, 2  ;;  %v2576_v59 = vmax.f32 %v2574_v3, %v2575_v17  ;;  %v2583_v36 = vmax.f32 %v2581_v2, %v2582_v35  ;;  %v2589_v60 = vrot.slane %v2588_v49, 4 }
 0x186   :  { %v8667_v50 = vmax.f32 %v2648_v29, %v2649_v24  ;;  %v1104_v42 = vrot.slane %v8634_v38, %v8304_v43  ;;  %v1111_v23 = vrot.slane %v1097_v53, %v8304_v43  ;;  %v459_v6 = vadd.f32 %v8504_v21, %v8405_v48 }
 0x187   :  { %v2571_v31 = vmax.f32 %v2569_v10, %v2570_v46  ;;  %v2577_v11 = vrot.slane %v2576_v59, 2  ;;  %v2584_v62 = vrot.slane %v2583_v36, 2  ;;  %v2590_v13 = vmax.f32 %v2588_v49, %v2589_v60 }
 0x188   :  { %v1112_v15 = vcombine.high %v1104_v42, %v1104_v42  ;;  %v1113_v19 = vcombine.high %v1111_v23, %v1111_v23  ;;  %v2651_v28 = vsel %vm2118_vm1, %v1104_v42, -inf  ;;  %v2665_v58 = vsel %vm2118_vm1, %v1111_v23, -inf }
 0x189   :  { %v2572_v54 = vrot.slane %v2571_v31, 1  ;;  %v2578_v38 = vmax.f32 %v2576_v59, %v2577_v11  ;;  %v2585_v55 = vmax.f32 %v2583_v36, %v2584_v62  ;;  %v2591_v47 = vrot.slane %v2590_v13, 2 }
 0x18a   :  { %v2652_v51 = vrot.slane %v2651_v28, 4  ;;  %v2658_v48 = vsel %vm2118_vm1, %v1112_v15, -inf  ;;  %v2666_v26 = vrot.slane %v2665_v58, 4  ;;  %v2672_v27 = vsel %vm2118_vm1, %v1113_v19, -inf }
 0x18b   :  { %v2573_v44 = vmax.f32 %v2571_v31, %v2572_v54  ;;  %v2579_v12 = vrot.slane %v2578_v38, 1  ;;  %v2586_v30 = vrot.slane %v2585_v55, 1  ;;  %v2592_v32 = vmax.f32 %v2590_v13, %v2591_v47 }
 0x18c   :  { %v2653_v14 = vmax.f32 %v2651_v28, %v2652_v51  ;;  %v2659_v22 = vrot.slane %v2658_v48, 4  ;;  %v2667_v16 = vmax.f32 %v2665_v58, %v2666_v26  ;;  %v2673_v33 = vrot.slane %v2672_v27, 4 }
 0x18d   :  { %v2580_v34 = vmax.f32 %v2578_v38, %v2579_v12  ;;  %v2587_v4 = vmax.f32 %v2585_v55, %v2586_v30  ;;  %v2593_v20 = vrot.slane %v2592_v32, 1  ;;  %v3943_v29 = vmax.f32 %v2573_v44, %v8655_v7  ;;  %v4399_v44 = vld [vmem:[#allocation2 + $0x1] sm:$0xff]  ;;  %v4400_v12 = vld [vmem:[#allocation2 + $0x11] sm:$0xff] }
 0x18e   :  { %v2654_v3 = vrot.slane %v2653_v14, 2  ;;  %v2660_v2 = vmax.f32 %v2658_v48, %v2659_v22  ;;  %v2668_v10 = vrot.slane %v2667_v16, 2  ;;  %v2674_v17 = vmax.f32 %v2672_v27, %v2673_v33 }
 0x18f   :  { %v2594_v35 = vmax.f32 %v2592_v32, %v2593_v20  ;;  %v3944_v45 = vmax.f32 %v2580_v34, %v8659_v56  ;;  %v3945_v24 = vmax.f32 %v2587_v4, %v2643_v5  ;;  %v663_v49 = vmax.f32 %v459_v6, 0.0 }
 0x190   :  { %v2655_v53 = vmax.f32 %v2653_v14, %v2654_v3  ;;  %v2661_v46 = vrot.slane %v2660_v2, 2  ;;  %v2669_v59 = vmax.f32 %v2667_v16, %v2668_v10  ;;  %v2675_v36 = vrot.slane %v2674_v17, 2  ;;  %v8704_v16 = vpop.f32.mrb[34].mxu0 }
 0x191   :  { %v3946_v60 = vmax.f32 %v2594_v35, %v8667_v50  ;;  %v4242_v42 = vsel %vm4207_vm2, %v3944_v45, %v3943_v29  ;;  %v1063_v23 = vcombine.high %v663_v49, %v663_v49  ;;  %v1070_v7 = vrot.slane %v663_v49, %v8304_v43 }
 0x192   :  { %v4243_v31 = vsel %vm4209_vm3, %v3945_v24, %v4242_v42  ;;  %v2656_v11 = vrot.slane %v2655_v53, 1  ;;  %v2662_v62 = vmax.f32 %v2660_v2, %v2661_v46  ;;  %v2670_v13 = vrot.slane %v2669_v59, 1 }
 0x193   :  { %v2676_v15 = vmax.f32 %v2674_v17, %v2675_v36  ;;  %v1077_v56 = vrot.slane %v1063_v23, %v8304_v43  ;;  %v1078_v5 = vcombine.high %v1070_v7, %v1070_v7  ;;  %v2595_v6 = vsel %vm2118_vm1, %v1070_v7, -inf }
 0x194   :  { %v8690_v19 = vmax.f32 %v2655_v53, %v2656_v11  ;;  %v2663_v28 = vrot.slane %v2662_v62, 1  ;;  %v8692_v50 = vmax.f32 %v2669_v59, %v2670_v13  ;;  %v2596_v58 = vrot.slane %v2595_v6, 4 }
 0x195   :  { %v2677_v54 = vrot.slane %v2676_v15, 1  ;;  %v1079_v38 = vcombine.high %v1077_v56, %v1077_v56  ;;  %v2602_v55 = vsel %vm2118_vm1, %v1078_v5, -inf  ;;  %v2609_v47 = vsel %vm2118_vm1, %v1077_v56, -inf }
 0x196   :  { %v8696_v51 = vmax.f32 %v2662_v62, %v2663_v28  ;;  %v2597_v48 = vmax.f32 %v2595_v6, %v2596_v58  ;;  %v2603_v26 = vrot.slane %v2602_v55, 4  ;;  %v2610_v27 = vrot.slane %v2609_v47, 4 }
 0x197   :  { %v8698_v30 = vmax.f32 %v2676_v15, %v2677_v54  ;;  %v2616_v32 = vsel %vm2118_vm1, %v1079_v38, -inf  ;;  %v4244_v14 = vsel %vm4211_vm4, %v3946_v60, %v4243_v31  ;;  %v480_v22 = vadd.f32 %v8504_v21, %v8427_v1 }
 0x198   :  { %v2598_v33 = vrot.slane %v2597_v48, 2  ;;  %v2604_v34 = vmax.f32 %v2602_v55, %v2603_v26  ;;  %v2611_v4 = vmax.f32 %v2609_v47, %v2610_v27  ;;  %v2617_v20 = vrot.slane %v2616_v32, 4 }
 0x199   :  { %v668_v29 = vmax.f32 %v480_v22, 0.0  ;;  %v472_v3 = vadd.f32 %v8504_v21, %v8439_v41  ;;  %v483_v2 = vadd.f32 %v8504_v21, %v8453_v40  ;;  %v4415_v10 = vpack.c.bf16 %v4400_v12, %v4399_v44 }
 0x19a   :  { %v2599_v17 = vmax.f32 %v2597_v48, %v2598_v33  ;;  %v2605_v35 = vrot.slane %v2604_v34, 2  ;;  %v2612_v45 = vrot.slane %v2611_v4, 2  ;;  %v2618_v24 = vmax.f32 %v2616_v32, %v2617_v20 }
 0x19b   :  { %v1148_v49 = vcombine.high %v668_v29, %v668_v29  ;;  %v1155_v1 = vrot.slane %v668_v29, %v8304_v43  ;;  %v666_v53 = vmax.f32 %v472_v3, 0.0  ;;  %v8711_v46 = vmax.f32 %v483_v2, 0.0  ;;  %7618 = vmatprep.mubr.bf16.mxu0 %v4415_v10  ;;  %v8726_v2 = vpop.f32.mrb[35].mxu0 }
 0x19c   :  { %v2600_v59 = vrot.slane %v2599_v17, 1  ;;  %v2606_v36 = vmax.f32 %v2604_v34, %v2605_v35  ;;  %v2613_v60 = vmax.f32 %v2611_v4, %v2612_v45  ;;  %v2619_v42 = vrot.slane %v2618_v24, 2 }
 0x19d   :  { %v1162_v41 = vrot.slane %v1148_v49, %v8304_v43  ;;  %v1163_v23 = vcombine.high %v1155_v1, %v1155_v1  ;;  %v2735_v40 = vsel %vm2118_vm1, %v1155_v1, -inf  ;;  %v1114_v7 = vcombine.high %v666_v53, %v666_v53 }
 0x19e   :  { %v2601_v31 = vmax.f32 %v2599_v17, %v2600_v59  ;;  %v2607_v11 = vrot.slane %v2606_v36, 1  ;;  %v2614_v62 = vrot.slane %v2613_v60, 1  ;;  %v2620_v13 = vmax.f32 %v2618_v24, %v2619_v42 }
 0x19f   :  { %v1164_v15 = vcombine.high %v1162_v41, %v1162_v41  ;;  %v2736_v56 = vrot.slane %v2735_v40, 4  ;;  %v2742_v5 = vsel %vm2118_vm1, %v1163_v23, -inf  ;;  %v2749_v6 = vsel %vm2118_vm1, %v1162_v41, -inf }
 0x1a0   :  { %v2608_v28 = vmax.f32 %v2606_v36, %v2607_v11  ;;  %v2615_v58 = vmax.f32 %v2613_v60, %v2614_v62  ;;  %v2621_v54 = vrot.slane %v2620_v13, 1  ;;  %v3947_v38 = vmax.f32 %v2601_v31, %v8690_v19 }
 0x1a1   :  { %v2737_v55 = vmax.f32 %v2735_v40, %v2736_v56  ;;  %v2743_v47 = vrot.slane %v2742_v5, 4  ;;  %v2750_v48 = vrot.slane %v2749_v6, 4  ;;  %v2756_v26 = vsel %vm2118_vm1, %v1164_v15, -inf }
 0x1a2   :  { %v2622_v27 = vmax.f32 %v2620_v13, %v2621_v54  ;;  %v3948_v44 = vmax.f32 %v2608_v28, %v8696_v51  ;;  %v3949_v12 = vmax.f32 %v2615_v58, %v8692_v50  ;;  %v4245_v32 = vsel %vm4213_vm5, %v3947_v38, %v4244_v14 }
 0x1a3   :  { %v2738_v22 = vrot.slane %v2737_v55, 2  ;;  %v2744_v33 = vmax.f32 %v2742_v5, %v2743_v47  ;;  %v2751_v34 = vmax.f32 %v2749_v6, %v2750_v48  ;;  %v2757_v4 = vrot.slane %v2756_v26, 4 }
 0x1a4   :  { %v3950_v20 = vmax.f32 %v2622_v27, %v8698_v30  ;;  %v4246_v19 = vsel %vm4215_vm6, %v3948_v44, %v4245_v32  ;;  %v1121_v29 = vrot.slane %v666_v53, %v8304_v43  ;;  %v1128_v3 = vrot.slane %v1114_v7, %v8304_v43  ;;  %v8740_v27 = vpop.f32.mrb[36].mxu0 }
 0x1a5   :  { %v4247_v51 = vsel %vm4217_vm7, %v3949_v12, %v4246_v19  ;;  %v2739_v10 = vmax.f32 %v2737_v55, %v2738_v22  ;;  %v2745_v50 = vrot.slane %v2744_v33, 2  ;;  %v2752_v17 = vrot.slane %v2751_v34, 2 }
 0x1a6   :  { %v4248_v14 = vsel %vm4219_vm8, %v3950_v20, %v4247_v51  ;;  %v2758_v35 = vmax.f32 %v2756_v26, %v2757_v4  ;;  %v1129_v45 = vcombine.high %v1121_v29, %v1121_v29  ;;  %v1130_v24 = vcombine.high %v1128_v3, %v1128_v3 }
 0x1a7   :  { %4347 = vst [vmem:[#allocation2 + $0x51] sm:$0xff] %v4248_v14  ;;  %v2740_v30 = vrot.slane %v2739_v10, 1  ;;  %v2746_v49 = vmax.f32 %v2744_v33, %v2745_v50  ;;  %v2753_v1 = vmax.f32 %v2751_v34, %v2752_v17  ;;  %v2679_v53 = vsel %vm2118_vm1, %v1121_v29, -inf }
 0x1a8   :  { %v2759_v59 = vrot.slane %v2758_v35, 2  ;;  %v2680_v36 = vrot.slane %v2679_v53, 4  ;;  %v2686_v60 = vsel %vm2118_vm1, %v1129_v45, -inf  ;;  %v2693_v42 = vsel %vm2118_vm1, %v1128_v3, -inf }
 0x1a9   :  { %v2741_v41 = vmax.f32 %v2739_v10, %v2740_v30  ;;  %v2747_v23 = vrot.slane %v2746_v49, 1  ;;  %v2754_v40 = vrot.slane %v2753_v1, 1  ;;  %v2687_v7 = vrot.slane %v2686_v60, 4 }
 0x1aa   :  { %v2760_v31 = vmax.f32 %v2758_v35, %v2759_v59  ;;  %v2681_v11 = vmax.f32 %v2679_v53, %v2680_v36  ;;  %v2694_v62 = vrot.slane %v2693_v42, 4  ;;  %v2700_v13 = vsel %vm2118_vm1, %v1130_v24, -inf }
 0x1ab   :  { %v2748_v15 = vmax.f32 %v2746_v49, %v2747_v23  ;;  %v2755_v56 = vmax.f32 %v2753_v1, %v2754_v40  ;;  %v2688_v5 = vmax.f32 %v2686_v60, %v2687_v7  ;;  %v2701_v6 = vrot.slane %v2700_v13, 4  ;;  %v8747_v60 = vpop.f32.mrb[37].mxu0 }
 0x1ac   :  { %v2761_v28 = vrot.slane %v2760_v31, 1  ;;  %v2682_v58 = vrot.slane %v2681_v11, 2  ;;  %v2695_v54 = vmax.f32 %v2693_v42, %v2694_v62  ;;  %v1165_v38 = vcombine.high %v8711_v46, %v8711_v46 }
 0x1ad   :  { %v2689_v55 = vrot.slane %v2688_v5, 2  ;;  %v2702_v47 = vmax.f32 %v2700_v13, %v2701_v6  ;;  %v1172_v48 = vrot.slane %v8711_v46, %v8304_v43  ;;  %v475_v26 = vadd.f32 %v8504_v21, %v8471_v9 }
 0x1ae   :  { %v2762_v44 = vmax.f32 %v2760_v31, %v2761_v28  ;;  %v2683_v12 = vmax.f32 %v2681_v11, %v2682_v58  ;;  %v2696_v32 = vrot.slane %v2695_v54, 2  ;;  %v1179_v22 = vrot.slane %v1165_v38, %v8304_v43 }
 0x1af   :  { %v2690_v33 = vmax.f32 %v2688_v5, %v2689_v55  ;;  %v2703_v34 = vrot.slane %v2702_v47, 2  ;;  %v1180_v4 = vcombine.high %v1172_v48, %v1172_v48  ;;  %v2763_v20 = vsel %vm2118_vm1, %v1172_v48, -inf }
 0x1b0   :  { %v2684_v19 = vrot.slane %v2683_v12, 1  ;;  %v2697_v29 = vmax.f32 %v2695_v54, %v2696_v32  ;;  %v1181_v3 = vcombine.high %v1179_v22, %v1179_v22  ;;  %v2764_v51 = vrot.slane %v2763_v20, 4  ;;  %v8761_v32 = vld [vmem:[%s10113_s2] ss:$0 sm:$0xff] }
 0x1b1   :  { %v2691_v46 = vrot.slane %v2690_v33, 1  ;;  %v2704_v10 = vmax.f32 %v2702_v47, %v2703_v34  ;;  %v2770_v9 = vsel %vm2118_vm1, %v1180_v4, -inf  ;;  %v2777_v21 = vsel %vm2118_vm1, %v1179_v22, -inf }
 0x1b2   :  { %v2685_v50 = vmax.f32 %v2683_v12, %v2684_v19  ;;  %v2698_v17 = vrot.slane %v2697_v29, 1  ;;  %v2765_v14 = vmax.f32 %v2763_v20, %v2764_v51  ;;  %v2771_v35 = vrot.slane %v2770_v9, 4 }
 0x1b3   :  { %v2692_v45 = vmax.f32 %v2690_v33, %v2691_v46  ;;  %v2705_v24 = vrot.slane %v2704_v10, 1  ;;  %v2778_v30 = vrot.slane %v2777_v21, 4  ;;  %v2784_v49 = vsel %vm2118_vm1, %v1181_v3, -inf }
 0x1b4   :  { %v2699_v1 = vmax.f32 %v2697_v29, %v2698_v17  ;;  %v3951_v53 = vmax.f32 %v2685_v50, %v2741_v41  ;;  %v2766_v59 = vrot.slane %v2765_v14, 2  ;;  %v2772_v36 = vmax.f32 %v2770_v9, %v2771_v35  ;;  %v8772_v50 = vpop.f32.mrb[38].mxu0 }
 0x1b5   :  { %v2706_v42 = vmax.f32 %v2704_v10, %v2705_v24  ;;  %v3952_v23 = vmax.f32 %v2692_v45, %v2748_v15  ;;  %v2779_v40 = vmax.f32 %v2777_v21, %v2778_v30  ;;  %v2785_v7 = vrot.slane %v2784_v49, 4 }
 0x1b6   :  { %v3953_v31 = vmax.f32 %v2699_v1, %v2755_v56  ;;  %v2767_v11 = vmax.f32 %v2765_v14, %v2766_v59  ;;  %v2773_v62 = vrot.slane %v2772_v36, 2  ;;  %v667_v13 = vmax.f32 %v475_v26, 0.0 }
 0x1b7   :  { %v3954_v5 = vmax.f32 %v2706_v42, %v2762_v44  ;;  %v4249_v6 = vsel %vm4207_vm2, %v3952_v23, %v3951_v53  ;;  %v2780_v28 = vrot.slane %v2779_v40, 2  ;;  %v2786_v58 = vmax.f32 %v2784_v49, %v2785_v7 }
 0x1b8   :  { %v4250_v54 = vsel %vm4209_vm3, %v3953_v31, %v4249_v6  ;;  %v2768_v41 = vrot.slane %v2767_v11, 1  ;;  %v2774_v38 = vmax.f32 %v2772_v36, %v2773_v62  ;;  %v1131_v55 = vcombine.high %v667_v13, %v667_v13 }
 0x1b9   :  { %v2781_v47 = vmax.f32 %v2779_v40, %v2780_v28  ;;  %v2787_v48 = vrot.slane %v2786_v58, 2  ;;  %v1138_v15 = vrot.slane %v667_v13, %v8304_v43  ;;  %v8753_v12 = vsel %vm4211_vm4, %v3954_v5, %v4250_v54 }
 0x1ba   :  { %v8755_v56 = vmax.f32 %v2767_v11, %v2768_v41  ;;  %v2775_v26 = vrot.slane %v2774_v38, 1  ;;  %v1145_v44 = vrot.slane %v1131_v55, %v8304_v43  ;;  %v496_v22 = vadd.f32 %v8761_v32, %v8508_v61 }
 0x1bb   :  { %v2782_v33 = vrot.slane %v2781_v47, 1  ;;  %v2788_v34 = vmax.f32 %v2786_v58, %v2787_v48  ;;  %v1146_v4 = vcombine.high %v1138_v15, %v1138_v15  ;;  %v2707_v20 = vsel %vm2118_vm1, %v1138_v15, -inf }
 0x1bc   :  { %v8766_v19 = vmax.f32 %v2774_v38, %v2775_v26  ;;  %v1147_v29 = vcombine.high %v1145_v44, %v1145_v44  ;;  %v2708_v3 = vrot.slane %v2707_v20, 4  ;;  %v2721_v51 = vsel %vm2118_vm1, %v1145_v44, -inf }
 0x1bd   :  { %v8769_v46 = vmax.f32 %v2781_v47, %v2782_v33  ;;  %v2789_v10 = vrot.slane %v2788_v34, 1  ;;  %v2714_v9 = vsel %vm2118_vm1, %v1146_v4, -inf  ;;  %v2722_v21 = vrot.slane %v2721_v51, 4 }
 0x1be   :  { %v2709_v61 = vmax.f32 %v2707_v20, %v2708_v3  ;;  %v2715_v17 = vrot.slane %v2714_v9, 4  ;;  %v2728_v14 = vsel %vm2118_vm1, %v1147_v29, -inf  ;;  %v672_v35 = vmax.f32 %v496_v22, 0.0 }
 0x1bf   :  { %v8775_v45 = vmax.f32 %v2788_v34, %v2789_v10  ;;  %v2723_v24 = vmax.f32 %v2721_v51, %v2722_v21  ;;  %v2729_v30 = vrot.slane %v2728_v14, 4  ;;  %v488_v49 = vadd.f32 %v8761_v32, %v8514_v52 }
 0x1c0   :  { %v2710_v1 = vrot.slane %v2709_v61, 2  ;;  %v2716_v53 = vmax.f32 %v2714_v9, %v2715_v17  ;;  %v1216_v59 = vcombine.high %v672_v35, %v672_v35  ;;  %v1223_v36 = vrot.slane %v672_v35, %v8304_v43 }
 0x1c1   :  { %v2724_v42 = vrot.slane %v2723_v24, 2  ;;  %v2730_v23 = vmax.f32 %v2728_v14, %v2729_v30  ;;  %v670_v40 = vmax.f32 %v488_v49, 0.0  ;;  %v8782_v7 = vadd.f32 %v8761_v32, %v8542_v57 }
 0x1c2   :  { %v2711_v31 = vmax.f32 %v2709_v61, %v2710_v1  ;;  %v2717_v11 = vrot.slane %v2716_v53, 2  ;;  %v1230_v62 = vrot.slane %v1216_v59, %v8304_v43  ;;  %v1231_v13 = vcombine.high %v1223_v36, %v1223_v36  ;;  %v8796_v59 = vpop.f32.mrb[39].mxu0 }
 0x1c3   :  { %v2725_v5 = vmax.f32 %v2723_v24, %v2724_v42  ;;  %v2731_v6 = vrot.slane %v2730_v23, 2  ;;  %v2847_v52 = vsel %vm2118_vm1, %v1223_v36, -inf  ;;  %v1182_v28 = vcombine.high %v670_v40, %v670_v40 }
 0x1c4   :  { %v2712_v58 = vrot.slane %v2711_v31, 1  ;;  %v2718_v54 = vmax.f32 %v2716_v53, %v2717_v11  ;;  %v1232_v41 = vcombine.high %v1230_v62, %v1230_v62  ;;  %v2848_v38 = vrot.slane %v2847_v52, 4 }
 0x1c5   :  { %v2726_v55 = vrot.slane %v2725_v5, 1  ;;  %v2732_v47 = vmax.f32 %v2730_v23, %v2731_v6  ;;  %v2854_v48 = vsel %vm2118_vm1, %v1231_v13, -inf  ;;  %v2861_v57 = vsel %vm2118_vm1, %v1230_v62, -inf }
 0x1c6   :  { %v2713_v15 = vmax.f32 %v2711_v31, %v2712_v58  ;;  %v2719_v26 = vrot.slane %v2718_v54, 1  ;;  %v2849_v44 = vmax.f32 %v2847_v52, %v2848_v38  ;;  %v2855_v22 = vrot.slane %v2854_v48, 4 }
 0x1c7   :  { %v2727_v33 = vmax.f32 %v2725_v5, %v2726_v55  ;;  %v2733_v34 = vrot.slane %v2732_v47, 1  ;;  %v2862_v4 = vrot.slane %v2861_v57, 4  ;;  %v2868_v20 = vsel %vm2118_vm1, %v1232_v41, -inf  ;;  %v4933_v55 = vld [vmem:[#allocation2 + $0x20] sm:$0xff] }
 0x1c8   :  { %v2720_v29 = vmax.f32 %v2718_v54, %v2719_v26  ;;  %v3955_v3 = vmax.f32 %v2713_v15, %v8755_v56  ;;  %v2850_v51 = vrot.slane %v2849_v44, 2  ;;  %v2856_v10 = vmax.f32 %v2854_v48, %v2855_v22 }
 0x1c9   :  { %v2734_v9 = vmax.f32 %v2732_v47, %v2733_v34  ;;  %v3957_v21 = vmax.f32 %v2727_v33, %v8769_v46  ;;  %v2863_v61 = vmax.f32 %v2861_v57, %v2862_v4  ;;  %v2869_v17 = vrot.slane %v2868_v20, 4  ;;  %v4932_v34 = vld [vmem:[#allocation2 + $0x10] sm:$0xff] }
 0x1ca   :  { %v3956_v14 = vmax.f32 %v2720_v29, %v8766_v19  ;;  %v4252_v35 = vsel %vm4213_vm5, %v3955_v3, %v8753_v12  ;;  %v2851_v24 = vmax.f32 %v2849_v44, %v2850_v51  ;;  %v2857_v30 = vrot.slane %v2856_v10, 2 }
 0x1cb   :  { %v3958_v49 = vmax.f32 %v2734_v9, %v8775_v45  ;;  %v2864_v1 = vrot.slane %v2863_v61, 2  ;;  %v2870_v53 = vmax.f32 %v2868_v20, %v2869_v17  ;;  %v1189_v56 = vrot.slane %v670_v40, %v8304_v43 }
 0x1cc   :  { %v4253_v36 = vsel %vm4215_vm6, %v3956_v14, %v4252_v35  ;;  %v2852_v46 = vrot.slane %v2851_v24, 1  ;;  %v2858_v42 = vmax.f32 %v2856_v10, %v2857_v30  ;;  %v1196_v23 = vrot.slane %v1182_v28, %v8304_v43  ;;  %v8820_v35 = vpop.f32.mrb[40].mxu0 }
 0x1cd   :  { %v4254_v19 = vsel %vm4217_vm7, %v3957_v21, %v4253_v36  ;;  %v2865_v31 = vmax.f32 %v2863_v61, %v2864_v1  ;;  %v2871_v12 = vrot.slane %v2870_v53, 2  ;;  %v1197_v11 = vcombine.high %v1189_v56, %v1189_v56 }
 0x1ce   :  { %v4255_v62 = vsel %vm4219_vm8, %v3958_v49, %v4254_v19  ;;  %v8802_v45 = vmax.f32 %v2851_v24, %v2852_v46  ;;  %v2859_v13 = vrot.slane %v2858_v42, 1  ;;  %v1198_v5 = vcombine.high %v1196_v23, %v1196_v23 }
 0x1cf   :  { %4348 = vst [vmem:[#allocation2 + $0x61] sm:$0xff] %v4255_v62  ;;  %v2866_v40 = vrot.slane %v2865_v31, 1  ;;  %v2872_v6 = vmax.f32 %v2870_v53, %v2871_v12  ;;  %v2791_v52 = vsel %vm2118_vm1, %v1189_v56, -inf  ;;  %v2798_v58 = vsel %vm2118_vm1, %v1197_v11, -inf }
 0x1d0   :  { %v8806_v54 = vmax.f32 %v2858_v42, %v2859_v13  ;;  %v2792_v28 = vrot.slane %v2791_v52, 4  ;;  %v2799_v41 = vrot.slane %v2798_v58, 4  ;;  %v2805_v38 = vsel %vm2118_vm1, %v1196_v23, -inf }
 0x1d1   :  { %v2867_v47 = vmax.f32 %v2865_v31, %v2866_v40  ;;  %v2873_v48 = vrot.slane %v2872_v6, 1  ;;  %v2806_v57 = vrot.slane %v2805_v38, 4  ;;  %v2812_v15 = vsel %vm2118_vm1, %v1198_v5, -inf }
 0x1d2   :  { %v2793_v26 = vmax.f32 %v2791_v52, %v2792_v28  ;;  %v2800_v44 = vmax.f32 %v2798_v58, %v2799_v41  ;;  %v2813_v22 = vrot.slane %v2812_v15, 4  ;;  %v673_v33 = vmax.f32 %v8782_v7, 0.0 }
 0x1d3   :  { %v8811_v4 = vmax.f32 %v2872_v6, %v2873_v48  ;;  %v2807_v20 = vmax.f32 %v2805_v38, %v2806_v57  ;;  %v4948_v29 = vpack.c.bf16 %v4933_v55, %v4932_v34  ;;  %v491_v3 = vadd.f32 %v8761_v32, %v8566_v39  ;;  %v8826_v6 = vpop.f32.mrb[41].mxu0 }
 0x1d4   :  { %v2794_v51 = vrot.slane %v2793_v26, 2  ;;  %v2801_v10 = vrot.slane %v2800_v44, 2  ;;  %v2814_v9 = vmax.f32 %v2812_v15, %v2813_v22  ;;  %v1233_v21 = vcombine.high %v673_v33, %v673_v33 }
 0x1d5   :  { %v2808_v61 = vrot.slane %v2807_v20, 2  ;;  %v1240_v17 = vrot.slane %v673_v33, %v8304_v43  ;;  %7714 = vmatprep.mubr.bf16.mxu1 %v4948_v29  ;;  %v671_v14 = vmax.f32 %v491_v3, 0.0  ;;  %v8818_v7 = vadd.f32 %v8761_v32, %v8596_v63 }
 0x1d6   :  { %v2795_v24 = vmax.f32 %v2793_v26, %v2794_v51  ;;  %v2802_v30 = vmax.f32 %v2800_v44, %v2801_v10  ;;  %v2815_v49 = vrot.slane %v2814_v9, 2  ;;  %v1247_v39 = vrot.slane %v1233_v21, %v8304_v43 }
 0x1d7   :  { %v2809_v1 = vmax.f32 %v2807_v20, %v2808_v61  ;;  %v1248_v53 = vcombine.high %v1240_v17, %v1240_v17  ;;  %v2875_v56 = vsel %vm2118_vm1, %v1240_v17, -inf  ;;  %v1199_v36 = vcombine.high %v671_v14, %v671_v14 }
 0x1d8   :  { %v2796_v46 = vrot.slane %v2795_v24, 1  ;;  %v2803_v42 = vrot.slane %v2802_v30, 1  ;;  %v2816_v23 = vmax.f32 %v2814_v9, %v2815_v49  ;;  %v1249_v19 = vcombine.high %v1247_v39, %v1247_v39 }
 0x1d9   :  { %v2810_v31 = vrot.slane %v2809_v1, 1  ;;  %v2876_v12 = vrot.slane %v2875_v56, 4  ;;  %v2882_v63 = vsel %vm2118_vm1, %v1248_v53, -inf  ;;  %v2889_v11 = vsel %vm2118_vm1, %v1247_v39, -inf }
 0x1da   :  { %v2797_v62 = vmax.f32 %v2795_v24, %v2796_v46  ;;  %v2804_v13 = vmax.f32 %v2802_v30, %v2803_v42  ;;  %v2817_v5 = vrot.slane %v2816_v23, 1  ;;  %v2883_v40 = vrot.slane %v2882_v63, 4 }
 0x1db   :  { %v2811_v52 = vmax.f32 %v2809_v1, %v2810_v31  ;;  %v2877_v58 = vmax.f32 %v2875_v56, %v2876_v12  ;;  %v2890_v28 = vrot.slane %v2889_v11, 4  ;;  %v2896_v41 = vsel %vm2118_vm1, %v1249_v19, -inf }
 0x1dc   :  { %v2818_v38 = vmax.f32 %v2816_v23, %v2817_v5  ;;  %v3959_v55 = vmax.f32 %v2797_v62, %v8802_v45  ;;  %v3960_v48 = vmax.f32 %v2804_v13, %v8806_v54  ;;  %v2884_v57 = vmax.f32 %v2882_v63, %v2883_v40  ;;  %v8840_v62 = vpop.f32.mrb[42].mxu0 }
 0x1dd   :  { %v3961_v15 = vmax.f32 %v2811_v52, %v2867_v47  ;;  %v2878_v26 = vrot.slane %v2877_v58, 2  ;;  %v2891_v44 = vmax.f32 %v2889_v11, %v2890_v28  ;;  %v2897_v22 = vrot.slane %v2896_v41, 4 }
 0x1de   :  { %v3962_v33 = vmax.f32 %v2818_v38, %v8811_v4  ;;  %v4256_v34 = vsel %vm4207_vm2, %v3960_v48, %v3959_v55  ;;  %v2885_v20 = vrot.slane %v2884_v57, 2  ;;  %v1206_v29 = vrot.slane %v671_v14, %v8304_v43 }
 0x1df   :  { %v4257_v3 = vsel %vm4209_vm3, %v3961_v15, %v4256_v34  ;;  %v2879_v51 = vmax.f32 %v2877_v58, %v2878_v26  ;;  %v2892_v10 = vrot.slane %v2891_v44, 2  ;;  %v2898_v9 = vmax.f32 %v2896_v41, %v2897_v22 }
 0x1e0   :  { %v2886_v45 = vmax.f32 %v2884_v57, %v2885_v20  ;;  %v1213_v54 = vrot.slane %v1199_v36, %v8304_v43  ;;  %v1214_v21 = vcombine.high %v1206_v29, %v1206_v29  ;;  %v2819_v47 = vsel %vm2118_vm1, %v1206_v29, -inf }
 0x1e1   :  { %v2880_v61 = vrot.slane %v2879_v51, 1  ;;  %v2893_v17 = vmax.f32 %v2891_v44, %v2892_v10  ;;  %v2899_v24 = vrot.slane %v2898_v9, 2  ;;  %v2820_v4 = vrot.slane %v2819_v47, 4 }
 0x1e2   :  { %v2887_v30 = vrot.slane %v2886_v45, 1  ;;  %v1215_v49 = vcombine.high %v1213_v54, %v1213_v54  ;;  %v2826_v39 = vsel %vm2118_vm1, %v1214_v21, -inf  ;;  %v2833_v14 = vsel %vm2118_vm1, %v1213_v54, -inf }
 0x1e3   :  { %v2881_v1 = vmax.f32 %v2879_v51, %v2880_v61  ;;  %v2894_v53 = vrot.slane %v2893_v17, 1  ;;  %v2900_v56 = vmax.f32 %v2898_v9, %v2899_v24  ;;  %v2821_v46 = vmax.f32 %v2819_v47, %v2820_v4 }
 0x1e4   :  { %v2888_v42 = vmax.f32 %v2886_v45, %v2887_v30  ;;  %v2827_v23 = vrot.slane %v2826_v39, 4  ;;  %v2834_v36 = vrot.slane %v2833_v14, 4  ;;  %v2840_v19 = vsel %vm2118_vm1, %v1215_v49, -inf }
 0x1e5   :  { %v2895_v31 = vmax.f32 %v2893_v17, %v2894_v53  ;;  %v2901_v12 = vrot.slane %v2900_v56, 1  ;;  %v2822_v63 = vrot.slane %v2821_v46, 2  ;;  %v2841_v11 = vrot.slane %v2840_v19, 4 }
 0x1e6   :  { %v2828_v13 = vmax.f32 %v2826_v39, %v2827_v23  ;;  %v2835_v5 = vmax.f32 %v2833_v14, %v2834_v36  ;;  %v4258_v40 = vsel %vm4211_vm4, %v3962_v33, %v4257_v3  ;;  %v676_v52 = vmax.f32 %v8818_v7, 0.0 }
 0x1e7   :  { %v2902_v58 = vmax.f32 %v2900_v56, %v2901_v12  ;;  %v2823_v28 = vmax.f32 %v2821_v46, %v2822_v63  ;;  %v2842_v41 = vmax.f32 %v2840_v19, %v2841_v11  ;;  %v504_v38 = vadd.f32 %v8761_v32, %v8607_v0 }
 0x1e8   :  { %v2829_v55 = vrot.slane %v2828_v13, 2  ;;  %v2836_v48 = vrot.slane %v2835_v5, 2  ;;  %v1284_v57 = vcombine.high %v676_v52, %v676_v52  ;;  %v1291_v15 = vrot.slane %v676_v52, %v8304_v43 }
 0x1e9   :  { %v2824_v26 = vrot.slane %v2823_v28, 1  ;;  %v2843_v44 = vrot.slane %v2842_v41, 2  ;;  %v674_v22 = vmax.f32 %v504_v38, 0.0  ;;  %v8849_v34 = vadd.f32 %v8761_v32, %v8624_v8 }
 0x1ea   :  { %v2830_v33 = vmax.f32 %v2828_v13, %v2829_v55  ;;  %v2837_v7 = vmax.f32 %v2835_v5, %v2836_v48  ;;  %v1298_v20 = vrot.slane %v1284_v57, %v8304_v43  ;;  %v1299_v29 = vcombine.high %v1291_v15, %v1291_v15 }
 0x1eb   :  { %v2825_v3 = vmax.f32 %v2823_v28, %v2824_v26  ;;  %v2844_v51 = vmax.f32 %v2842_v41, %v2843_v44  ;;  %v2959_v0 = vsel %vm2118_vm1, %v1291_v15, -inf  ;;  %v1250_v10 = vcombine.high %v674_v22, %v674_v22  ;;  %v8860_v41 = vpop.f32.mrb[43].mxu0 }
 0x1ec   :  { %v2831_v9 = vrot.slane %v2830_v33, 1  ;;  %v2838_v45 = vrot.slane %v2837_v7, 1  ;;  %v1300_v54 = vcombine.high %v1298_v20, %v1298_v20  ;;  %v2960_v21 = vrot.slane %v2959_v0, 4 }
 0x1ed   :  { %v2845_v47 = vrot.slane %v2844_v51, 1  ;;  %v3963_v61 = vmax.f32 %v2825_v3, %v2881_v1  ;;  %v2966_v17 = vsel %vm2118_vm1, %v1299_v29, -inf  ;;  %v2973_v8 = vsel %vm2118_vm1, %v1298_v20, -inf }
 0x1ee   :  { %v2832_v24 = vmax.f32 %v2830_v33, %v2831_v9  ;;  %v2839_v4 = vmax.f32 %v2837_v7, %v2838_v45  ;;  %v2961_v30 = vmax.f32 %v2959_v0, %v2960_v21  ;;  %v2967_v49 = vrot.slane %v2966_v17, 4  ;;  %v4402_v9 = vld [vmem:[#allocation2 + $0x31] sm:$0xff] }
 0x1ef   :  { %v2846_v39 = vmax.f32 %v2844_v51, %v2845_v47  ;;  %v4259_v14 = vsel %vm4213_vm5, %v3963_v61, %v4258_v40  ;;  %v2974_v53 = vrot.slane %v2973_v8, 4  ;;  %v2980_v56 = vsel %vm2118_vm1, %v1300_v54, -inf }
 0x1f0   :  { %v3964_v46 = vmax.f32 %v2832_v24, %v2888_v42  ;;  %v3965_v23 = vmax.f32 %v2839_v4, %v2895_v31  ;;  %v2962_v36 = vrot.slane %v2961_v30, 2  ;;  %v2968_v19 = vmax.f32 %v2966_v17, %v2967_v49  ;;  %v4401_v4 = vld [vmem:[#allocation2 + $0x21] sm:$0xff] }
 0x1f1   :  { %v3966_v12 = vmax.f32 %v2846_v39, %v2902_v58  ;;  %v2975_v1 = vmax.f32 %v2973_v8, %v2974_v53  ;;  %v2981_v63 = vrot.slane %v2980_v56, 4  ;;  %v1257_v11 = vrot.slane %v674_v22, %v8304_v43 }
 0x1f2   :  { %v4260_v13 = vsel %vm4215_vm6, %v3964_v46, %v4259_v14  ;;  %v2963_v5 = vmax.f32 %v2961_v30, %v2962_v36  ;;  %v2969_v52 = vrot.slane %v2968_v19, 2  ;;  %v1264_v28 = vrot.slane %v1250_v10, %v8304_v43  ;;  %v8872_v36 = vpop.f32.mrb[44].mxu0 }
 0x1f3   :  { %v4261_v40 = vsel %vm4217_vm7, %v3965_v23, %v4260_v13  ;;  %v2976_v38 = vrot.slane %v2975_v1, 2  ;;  %v2982_v42 = vmax.f32 %v2980_v56, %v2981_v63  ;;  %v1265_v31 = vcombine.high %v1257_v11, %v1257_v11 }
 0x1f4   :  { %v4262_v55 = vsel %vm4219_vm8, %v3966_v12, %v4261_v40  ;;  %v2964_v58 = vrot.slane %v2963_v5, 1  ;;  %v2970_v48 = vmax.f32 %v2968_v19, %v2969_v52  ;;  %v1266_v57 = vcombine.high %v1264_v28, %v1264_v28 }
 0x1f5   :  { %4349 = vst [vmem:[#allocation2 + $0x71] sm:$0xff] %v4262_v55  ;;  %v2977_v15 = vmax.f32 %v2975_v1, %v2976_v38  ;;  %v2983_v26 = vrot.slane %v2982_v42, 2  ;;  %v2903_v44 = vsel %vm2118_vm1, %v1257_v11, -inf  ;;  %v2910_v22 = vsel %vm2118_vm1, %v1265_v31, -inf }
 0x1f6   :  { %v8866_v33 = vmax.f32 %v2963_v5, %v2964_v58  ;;  %v2971_v7 = vrot.slane %v2970_v48, 1  ;;  %v2904_v20 = vrot.slane %v2903_v44, 4  ;;  %v2911_v29 = vrot.slane %v2910_v22, 4 }
 0x1f7   :  { %v2978_v3 = vrot.slane %v2977_v15, 1  ;;  %v2984_v51 = vmax.f32 %v2982_v42, %v2983_v26  ;;  %v2917_v0 = vsel %vm2118_vm1, %v1264_v28, -inf  ;;  %v2924_v10 = vsel %vm2118_vm1, %v1266_v57, -inf }
 0x1f8   :  { %v2972_v45 = vmax.f32 %v2970_v48, %v2971_v7  ;;  %v2905_v54 = vmax.f32 %v2903_v44, %v2904_v20  ;;  %v2912_v21 = vmax.f32 %v2910_v22, %v2911_v29  ;;  %v2918_v47 = vrot.slane %v2917_v0, 4 }
 0x1f9   :  { %v2979_v61 = vmax.f32 %v2977_v15, %v2978_v3  ;;  %v2985_v17 = vrot.slane %v2984_v51, 1  ;;  %v2925_v8 = vrot.slane %v2924_v10, 4  ;;  %v677_v24 = vmax.f32 %v8849_v34, 0.0 }
 0x1fa   :  { %v2906_v30 = vrot.slane %v2905_v54, 2  ;;  %v2913_v49 = vrot.slane %v2912_v21, 2  ;;  %v2919_v39 = vmax.f32 %v2917_v0, %v2918_v47  ;;  %v4416_v14 = vpack.c.bf16 %v4402_v9, %v4401_v4  ;;  %v8882_v0 = vpop.f32.mrb[45].mxu0 }
 0x1fb   :  { %v2986_v53 = vmax.f32 %v2984_v51, %v2985_v17  ;;  %v2926_v56 = vmax.f32 %v2924_v10, %v2925_v8  ;;  %v1301_v46 = vcombine.high %v677_v24, %v677_v24  ;;  %v1308_v23 = vrot.slane %v677_v24, %v8304_v43 }
 0x1fc   :  { %v2907_v19 = vmax.f32 %v2905_v54, %v2906_v30  ;;  %v2914_v12 = vmax.f32 %v2912_v21, %v2913_v49  ;;  %v2920_v1 = vrot.slane %v2919_v39, 2  ;;  %7619 = vmatmul.mubr.bf16.vlgmr.msra.gmra.mrb[64].mxu0 %v4416_v14  ;;  %v507_v63 = vadd.f32 %v8761_v32, %v8648_v25 }
 0x1fd   :  { %v2927_v34 = vrot.slane %v2926_v56, 2  ;;  %v1315_v11 = vrot.slane %v1301_v46, %v8304_v43  ;;  %v1316_v13 = vcombine.high %v1308_v23, %v1308_v23  ;;  %v2987_v5 = vsel %vm2118_vm1, %v1308_v23, -inf }
 0x1fe   :  { %v2908_v52 = vrot.slane %v2907_v19, 1  ;;  %v2915_v28 = vrot.slane %v2914_v12, 1  ;;  %v2921_v40 = vmax.f32 %v2919_v39, %v2920_v1  ;;  %v2988_v38 = vrot.slane %v2987_v5, 4 }
 0x1ff   :  { %v2928_v42 = vmax.f32 %v2926_v56, %v2927_v34  ;;  %v1317_v31 = vcombine.high %v1315_v11, %v1315_v11  ;;  %v2994_v55 = vsel %vm2118_vm1, %v1316_v13, -inf  ;;  %v3001_v58 = vsel %vm2118_vm1, %v1315_v11, -inf }
 0x200   :  { %v2909_v48 = vmax.f32 %v2907_v19, %v2908_v52  ;;  %v2916_v57 = vmax.f32 %v2914_v12, %v2915_v28  ;;  %v2922_v15 = vrot.slane %v2921_v40, 1  ;;  %v2989_v25 = vmax.f32 %v2987_v5, %v2988_v38 }
 0x201   :  { %v2929_v26 = vrot.slane %v2928_v42, 1  ;;  %v2995_v44 = vrot.slane %v2994_v55, 4  ;;  %v3002_v22 = vrot.slane %v3001_v58, 4  ;;  %v3008_v7 = vsel %vm2118_vm1, %v1317_v31, -inf }
 0x202   :  { %v2923_v20 = vmax.f32 %v2921_v40, %v2922_v15  ;;  %v3967_v29 = vmax.f32 %v2909_v48, %v8866_v33  ;;  %v3968_v3 = vmax.f32 %v2916_v57, %v2972_v45  ;;  %v2990_v51 = vrot.slane %v2989_v25, 2  ;;  %v8902_v48 = vpop.f32.mrb[46].mxu0 }
 0x203   :  { %v2930_v10 = vmax.f32 %v2928_v42, %v2929_v26  ;;  %v2996_v9 = vmax.f32 %v2994_v55, %v2995_v44  ;;  %v3003_v54 = vmax.f32 %v3001_v58, %v3002_v22  ;;  %v3009_v21 = vrot.slane %v3008_v7, 4 }
 0x204   :  { %v3969_v47 = vmax.f32 %v2923_v20, %v2979_v61  ;;  %v4263_v17 = vsel %vm4207_vm2, %v3968_v3, %v3967_v29  ;;  %v2991_v8 = vmax.f32 %v2989_v25, %v2990_v51  ;;  %v675_v24 = vmax.f32 %v507_v63, 0.0 }
 0x205   :  { %v3970_v4 = vmax.f32 %v2930_v10, %v2986_v53  ;;  %v2997_v30 = vrot.slane %v2996_v9, 2  ;;  %v3004_v49 = vrot.slane %v3003_v54, 2  ;;  %v3010_v39 = vmax.f32 %v3008_v7, %v3009_v21 }
 0x206   :  { %v4264_v14 = vsel %vm4209_vm3, %v3969_v47, %v4263_v17  ;;  %v2992_v33 = vrot.slane %v2991_v8, 1  ;;  %v1267_v45 = vcombine.high %v675_v24, %v675_v24  ;;  %v1274_v56 = vrot.slane %v675_v24, %v8304_v43 }
 0x207   :  { %v2998_v46 = vmax.f32 %v2996_v9, %v2997_v30  ;;  %v3005_v23 = vmax.f32 %v3003_v54, %v3004_v49  ;;  %v3011_v19 = vrot.slane %v3010_v39, 2  ;;  %v8888_v12 = vsel %vm4211_vm4, %v3970_v4, %v4264_v14 }
 0x208   :  { %v8890_v61 = vmax.f32 %v2991_v8, %v2992_v33  ;;  %v1281_v1 = vrot.slane %v1267_v45, %v8304_v43  ;;  %v1282_v53 = vcombine.high %v1274_v56, %v1274_v56  ;;  %v2931_v63 = vsel %vm2118_vm1, %v1274_v56, -inf }
 0x209   :  { %v2999_v34 = vrot.slane %v2998_v46, 1  ;;  %v3006_v11 = vrot.slane %v3005_v23, 1  ;;  %v3012_v13 = vmax.f32 %v3010_v39, %v3011_v19  ;;  %v2932_v5 = vrot.slane %v2931_v63, 4 }
 0x20a   :  { %v1283_v52 = vcombine.high %v1281_v1, %v1281_v1  ;;  %v2938_v28 = vsel %vm2118_vm1, %v1282_v53, -inf  ;;  %v2945_v40 = vsel %vm2118_vm1, %v1281_v1, -inf  ;;  %v528_v38 = vadd.f32 %v8761_v32, %v8674_v37 }
 0x20b   :  { %v8898_v42 = vmax.f32 %v2998_v46, %v2999_v34  ;;  %v8900_v31 = vmax.f32 %v3005_v23, %v3006_v11  ;;  %v3013_v55 = vrot.slane %v3012_v13, 1  ;;  %v2933_v58 = vmax.f32 %v2931_v63, %v2932_v5 }
 0x20c   :  { %v2939_v57 = vrot.slane %v2938_v28, 4  ;;  %v2946_v15 = vrot.slane %v2945_v40, 4  ;;  %v2952_v25 = vsel %vm2118_vm1, %v1283_v52, -inf  ;;  %v680_v26 = vmax.f32 %v528_v38, 0.0 }
 0x20d   :  { %v8905_v44 = vmax.f32 %v3012_v13, %v3013_v55  ;;  %v2934_v22 = vrot.slane %v2933_v58, 2  ;;  %v2953_v7 = vrot.slane %v2952_v25, 4  ;;  %v520_v37 = vadd.f32 %v8761_v32, %v8680_v18 }
 0x20e   :  { %v2940_v20 = vmax.f32 %v2938_v28, %v2939_v57  ;;  %v2947_v29 = vmax.f32 %v2945_v40, %v2946_v15  ;;  %v1352_v3 = vcombine.high %v680_v26, %v680_v26  ;;  %v1359_v51 = vrot.slane %v680_v26, %v8304_v43 }
 0x20f   :  { %v2935_v10 = vmax.f32 %v2933_v58, %v2934_v22  ;;  %v2954_v9 = vmax.f32 %v2952_v25, %v2953_v7  ;;  %v678_v54 = vmax.f32 %v520_v37, 0.0  ;;  %v8912_v21 = vadd.f32 %v8761_v32, %v8704_v16 }
 0x210   :  { %v2941_v47 = vrot.slane %v2940_v20, 2  ;;  %v2948_v17 = vrot.slane %v2947_v29, 2  ;;  %v1366_v8 = vrot.slane %v1352_v3, %v8304_v43  ;;  %v1367_v24 = vcombine.high %v1359_v51, %v1359_v51  ;;  %v8926_v3 = vpop.f32.mrb[47].mxu0 }
 0x211   :  { %v2936_v4 = vrot.slane %v2935_v10, 1  ;;  %v2955_v30 = vrot.slane %v2954_v9, 2  ;;  %v3071_v18 = vsel %vm2118_vm1, %v1359_v51, -inf  ;;  %v1318_v49 = vcombine.high %v678_v54, %v678_v54 }
 0x212   :  { %v2942_v39 = vmax.f32 %v2940_v20, %v2941_v47  ;;  %v2949_v14 = vmax.f32 %v2947_v29, %v2948_v17  ;;  %v1368_v33 = vcombine.high %v1366_v8, %v1366_v8  ;;  %v3072_v45 = vrot.slane %v3071_v18, 4 }
 0x213   :  { %v2937_v56 = vmax.f32 %v2935_v10, %v2936_v4  ;;  %v2956_v46 = vmax.f32 %v2954_v9, %v2955_v30  ;;  %v3078_v23 = vsel %vm2118_vm1, %v1367_v24, -inf  ;;  %v3085_v16 = vsel %vm2118_vm1, %v1366_v8, -inf }
 0x214   :  { %v2943_v19 = vrot.slane %v2942_v39, 1  ;;  %v2950_v1 = vrot.slane %v2949_v14, 1  ;;  %v3073_v53 = vmax.f32 %v3071_v18, %v3072_v45  ;;  %v3079_v63 = vrot.slane %v3078_v23, 4 }
 0x215   :  { %v2957_v34 = vrot.slane %v2956_v46, 1  ;;  %v3971_v11 = vmax.f32 %v2937_v56, %v8890_v61  ;;  %v3086_v13 = vrot.slane %v3085_v16, 4  ;;  %v3092_v5 = vsel %vm2118_vm1, %v1368_v33, -inf  ;;  %v4935_v56 = vld [vmem:[#allocation2 + $0x40] sm:$0xff] }
 0x216   :  { %v2944_v52 = vmax.f32 %v2942_v39, %v2943_v19  ;;  %v2951_v28 = vmax.f32 %v2949_v14, %v2950_v1  ;;  %v3074_v40 = vrot.slane %v3073_v53, 2  ;;  %v3080_v38 = vmax.f32 %v3078_v23, %v3079_v63 }
 0x217   :  { %v2958_v55 = vmax.f32 %v2956_v46, %v2957_v34  ;;  %v4266_v58 = vsel %vm4213_vm5, %v3971_v11, %v8888_v12  ;;  %v3087_v57 = vmax.f32 %v3085_v16, %v3086_v13  ;;  %v3093_v15 = vrot.slane %v3092_v5, 4  ;;  %v4934_v11 = vld [vmem:[#allocation2 + $0x30] sm:$0xff] }
 0x218   :  { %v3972_v25 = vmax.f32 %v2944_v52, %v8898_v42  ;;  %v3973_v26 = vmax.f32 %v2951_v28, %v8900_v31  ;;  %v3075_v22 = vmax.f32 %v3073_v53, %v3074_v40  ;;  %v3081_v7 = vrot.slane %v3080_v38, 2 }
 0x219   :  { %v3974_v61 = vmax.f32 %v2958_v55, %v8905_v44  ;;  %v3088_v37 = vrot.slane %v3087_v57, 2  ;;  %v3094_v20 = vmax.f32 %v3092_v5, %v3093_v15  ;;  %v1325_v29 = vrot.slane %v678_v54, %v8304_v43 }
 0x21a   :  { %v4267_v51 = vsel %vm4215_vm6, %v3972_v25, %v4266_v58  ;;  %v3076_v10 = vrot.slane %v3075_v22, 1  ;;  %v3082_v12 = vmax.f32 %v3080_v38, %v3081_v7  ;;  %v1332_v9 = vrot.slane %v1318_v49, %v8304_v43 }
 0x21b   :  { %v4268_v42 = vsel %vm4217_vm7, %v3973_v26, %v4267_v51  ;;  %v3089_v47 = vmax.f32 %v3087_v57, %v3088_v37  ;;  %v3095_v31 = vrot.slane %v3094_v20, 2  ;;  %v1333_v17 = vcombine.high %v1325_v29, %v1325_v29  ;;  %v8950_v26 = vpop.f32.mrb[48].mxu0 }
 0x21c   :  { %v4269_v8 = vsel %vm4219_vm8, %v3974_v61, %v4268_v42  ;;  %v8932_v44 = vmax.f32 %v3075_v22, %v3076_v10  ;;  %v3083_v24 = vrot.slane %v3082_v12, 1  ;;  %v1334_v4 = vcombine.high %v1332_v9, %v1332_v9 }
 0x21d   :  { %4350 = vst [vmem:[#allocation2 + $0x81] sm:$0xff] %v4269_v8  ;;  %v3090_v54 = vrot.slane %v3089_v47, 1  ;;  %v3096_v30 = vmax.f32 %v3094_v20, %v3095_v31  ;;  %v3015_v18 = vsel %vm2118_vm1, %v1325_v29, -inf  ;;  %v3022_v39 = vsel %vm2118_vm1, %v1333_v17, -inf }
 0x21e   :  { %v8936_v14 = vmax.f32 %v3082_v12, %v3083_v24  ;;  %v3016_v49 = vrot.slane %v3015_v18, 4  ;;  %v3023_v33 = vrot.slane %v3022_v39, 4  ;;  %v3029_v45 = vsel %vm2118_vm1, %v1332_v9, -inf }
 0x21f   :  { %v3091_v46 = vmax.f32 %v3089_v47, %v3090_v54  ;;  %v3097_v23 = vrot.slane %v3096_v30, 1  ;;  %v3030_v16 = vrot.slane %v3029_v45, 4  ;;  %v3036_v19 = vsel %vm2118_vm1, %v1334_v4, -inf  ;;  %v8956_v54 = vpop.f32.mrb[49].mxu0 }
 0x220   :  { %v3017_v1 = vmax.f32 %v3015_v18, %v3016_v49  ;;  %v3024_v53 = vmax.f32 %v3022_v39, %v3023_v33  ;;  %v3037_v63 = vrot.slane %v3036_v19, 4  ;;  %v681_v34 = vmax.f32 %v8912_v21, 0.0 }
 0x221   :  { %v8941_v13 = vmax.f32 %v3096_v30, %v3097_v23  ;;  %v3031_v5 = vmax.f32 %v3029_v45, %v3030_v16  ;;  %v4949_v52 = vpack.c.bf16 %v4935_v56, %v4934_v11  ;;  %v523_v28 = vadd.f32 %v8761_v32, %v8726_v2 }
 0x222   :  { %v3018_v40 = vrot.slane %v3017_v1, 2  ;;  %v3025_v38 = vrot.slane %v3024_v53, 2  ;;  %v3038_v55 = vmax.f32 %v3036_v19, %v3037_v63  ;;  %v1369_v58 = vcombine.high %v681_v34, %v681_v34 }
 0x223   :  { %v3032_v57 = vrot.slane %v3031_v5, 2  ;;  %v1376_v15 = vrot.slane %v681_v34, %v8304_v43  ;;  %7715 = vmatmul.mubr.bf16.vlgmr.msra.gmra.mrb[0].mxu1 %v4949_v52  ;;  %v679_v25 = vmax.f32 %v523_v28, 0.0  ;;  %v8948_v21 = vadd.f32 %v8761_v32, %v8740_v27 }
 0x224   :  { %v3019_v22 = vmax.f32 %v3017_v1, %v3018_v40  ;;  %v3026_v7 = vmax.f32 %v3024_v53, %v3025_v38  ;;  %v3039_v61 = vrot.slane %v3038_v55, 2  ;;  %v1383_v2 = vrot.slane %v1369_v58, %v8304_v43 }
 0x225   :  { %v3033_v37 = vmax.f32 %v3031_v5, %v3032_v57  ;;  %v1384_v20 = vcombine.high %v1376_v15, %v1376_v15  ;;  %v3099_v29 = vsel %vm2118_vm1, %v1376_v15, -inf  ;;  %v1335_v51 = vcombine.high %v679_v25, %v679_v25 }
 0x226   :  { %v3020_v10 = vrot.slane %v3019_v22, 1  ;;  %v3027_v12 = vrot.slane %v3026_v7, 1  ;;  %v3040_v9 = vmax.f32 %v3038_v55, %v3039_v61  ;;  %v1385_v42 = vcombine.high %v1383_v2, %v1383_v2 }
 0x227   :  { %v3034_v47 = vrot.slane %v3033_v37, 1  ;;  %v3100_v31 = vrot.slane %v3099_v29, 4  ;;  %v3106_v27 = vsel %vm2118_vm1, %v1384_v20, -inf  ;;  %v3113_v32 = vsel %vm2118_vm1, %v1383_v2, -inf }
 0x228   :  { %v3021_v17 = vmax.f32 %v3019_v22, %v3020_v10  ;;  %v3028_v8 = vmax.f32 %v3026_v7, %v3027_v12  ;;  %v3041_v24 = vrot.slane %v3040_v9, 1  ;;  %v3107_v4 = vrot.slane %v3106_v27, 4 }
 0x229   :  { %v3035_v30 = vmax.f32 %v3033_v37, %v3034_v47  ;;  %v3101_v18 = vmax.f32 %v3099_v29, %v3100_v31  ;;  %v3114_v39 = vrot.slane %v3113_v32, 4  ;;  %v3120_v49 = vsel %vm2118_vm1, %v1385_v42, -inf }
 0x22a   :  { %v3042_v33 = vmax.f32 %v3040_v9, %v3041_v24  ;;  %v3975_v45 = vmax.f32 %v3021_v17, %v8932_v44  ;;  %v3976_v56 = vmax.f32 %v3028_v8, %v8936_v14  ;;  %v3108_v23 = vmax.f32 %v3106_v27, %v3107_v4 }
 0x22b   :  { %v3977_v16 = vmax.f32 %v3035_v30, %v3091_v46  ;;  %v3102_v19 = vrot.slane %v3101_v18, 2  ;;  %v3115_v1 = vmax.f32 %v3113_v32, %v3114_v39  ;;  %v3121_v53 = vrot.slane %v3120_v49, 4  ;;  %v8970_v32 = vpop.f32.mrb[50].mxu0 }
 0x22c   :  { %v3978_v63 = vmax.f32 %v3042_v33, %v8941_v13  ;;  %v4270_v34 = vsel %vm4207_vm2, %v3976_v56, %v3975_v45  ;;  %v3109_v11 = vrot.slane %v3108_v23, 2  ;;  %v1342_v5 = vrot.slane %v679_v25, %v8304_v43 }
 0x22d   :  { %v4271_v52 = vsel %vm4209_vm3, %v3977_v16, %v4270_v34  ;;  %v3103_v28 = vmax.f32 %v3101_v18, %v3102_v19  ;;  %v3116_v40 = vrot.slane %v3115_v1, 2  ;;  %v3122_v38 = vmax.f32 %v3120_v49, %v3121_v53  ;;  %v8977_v49 = vld [vmem:[%s10113_s2] ss:$0 sm:$0xff] }
 0x22e   :  { %v3110_v44 = vmax.f32 %v3108_v23, %v3109_v11  ;;  %v1349_v14 = vrot.slane %v1335_v51, %v8304_v43  ;;  %v1350_v55 = vcombine.high %v1342_v5, %v1342_v5  ;;  %v3043_v46 = vsel %vm2118_vm1, %v1342_v5, -inf }
 0x22f   :  { %v3104_v58 = vrot.slane %v3103_v28, 1  ;;  %v3117_v57 = vmax.f32 %v3115_v1, %v3116_v40  ;;  %v3123_v15 = vrot.slane %v3122_v38, 2  ;;  %v3044_v13 = vrot.slane %v3043_v46, 4 }
 0x230   :  { %v3111_v22 = vrot.slane %v3110_v44, 1  ;;  %v1351_v7 = vcombine.high %v1349_v14, %v1349_v14  ;;  %v3050_v61 = vsel %vm2118_vm1, %v1350_v55, -inf  ;;  %v3057_v25 = vsel %vm2118_vm1, %v1349_v14, -inf }
 0x231   :  { %v3105_v2 = vmax.f32 %v3103_v28, %v3104_v58  ;;  %v3118_v37 = vrot.slane %v3117_v57, 1  ;;  %v3124_v20 = vmax.f32 %v3122_v38, %v3123_v15  ;;  %v3045_v29 = vmax.f32 %v3043_v46, %v3044_v13 }
 0x232   :  { %v3112_v10 = vmax.f32 %v3110_v44, %v3111_v22  ;;  %v3051_v12 = vrot.slane %v3050_v61, 4  ;;  %v3058_v51 = vrot.slane %v3057_v25, 4  ;;  %v3064_v9 = vsel %vm2118_vm1, %v1351_v7, -inf }
 0x233   :  { %v3119_v42 = vmax.f32 %v3117_v57, %v3118_v37  ;;  %v3125_v47 = vrot.slane %v3124_v20, 1  ;;  %v3046_v31 = vrot.slane %v3045_v29, 2  ;;  %v3065_v27 = vrot.slane %v3064_v9, 4 }
 0x234   :  { %v3052_v17 = vmax.f32 %v3050_v61, %v3051_v12  ;;  %v3059_v8 = vmax.f32 %v3057_v25, %v3058_v51  ;;  %v4272_v24 = vsel %vm4211_vm4, %v3978_v63, %v4271_v52  ;;  %v684_v4 = vmax.f32 %v8948_v21, 0.0 }
 0x235   :  { %v3126_v30 = vmax.f32 %v3124_v20, %v3125_v47  ;;  %v3047_v18 = vmax.f32 %v3045_v29, %v3046_v31  ;;  %v3066_v39 = vmax.f32 %v3064_v9, %v3065_v27  ;;  %v536_v33 = vadd.f32 %v8977_v49, %v8747_v60 }
 0x236   :  { %v3053_v45 = vrot.slane %v3052_v17, 2  ;;  %v3060_v56 = vrot.slane %v3059_v8, 2  ;;  %v1420_v23 = vcombine.high %v684_v4, %v684_v4  ;;  %v1427_v16 = vrot.slane %v684_v4, %v8304_v43 }
 0x237   :  { %v3048_v19 = vrot.slane %v3047_v18, 1  ;;  %v3067_v1 = vrot.slane %v3066_v39, 2  ;;  %v682_v53 = vmax.f32 %v536_v33, 0.0  ;;  %v8984_v21 = vadd.f32 %v8977_v49, %v8772_v50 }
 0x238   :  { %v3054_v63 = vmax.f32 %v3052_v17, %v3053_v45  ;;  %v3061_v34 = vmax.f32 %v3059_v8, %v3060_v56  ;;  %v1434_v11 = vrot.slane %v1420_v23, %v8304_v43  ;;  %v1435_v5 = vcombine.high %v1427_v16, %v1427_v16 }
 0x239   :  { %v3049_v52 = vmax.f32 %v3047_v18, %v3048_v19  ;;  %v3068_v28 = vmax.f32 %v3066_v39, %v3067_v1  ;;  %v3183_v60 = vsel %vm2118_vm1, %v1427_v16, -inf  ;;  %v1386_v40 = vcombine.high %v682_v53, %v682_v53  ;;  %v8995_v39 = vpop.f32.mrb[51].mxu0 }
 0x23a   :  { %v3055_v38 = vrot.slane %v3054_v63, 1  ;;  %v3062_v44 = vrot.slane %v3061_v34, 1  ;;  %v1436_v14 = vcombine.high %v1434_v11, %v1434_v11  ;;  %v3184_v55 = vrot.slane %v3183_v60, 4 }
 0x23b   :  { %v3069_v46 = vrot.slane %v3068_v28, 1  ;;  %v3979_v58 = vmax.f32 %v3049_v52, %v3105_v2  ;;  %v3190_v57 = vsel %vm2118_vm1, %v1435_v5, -inf  ;;  %v3197_v50 = vsel %vm2118_vm1, %v1434_v11, -inf }
 0x23c   :  { %v3056_v15 = vmax.f32 %v3054_v63, %v3055_v38  ;;  %v3063_v13 = vmax.f32 %v3061_v34, %v3062_v44  ;;  %v3185_v22 = vmax.f32 %v3183_v60, %v3184_v55  ;;  %v3191_v7 = vrot.slane %v3190_v57, 4  ;;  %v4404_v38 = vld [vmem:[#allocation2 + $0x51] sm:$0xff] }
 0x23d   :  { %v3070_v61 = vmax.f32 %v3068_v28, %v3069_v46  ;;  %v4273_v25 = vsel %vm4213_vm5, %v3979_v58, %v4272_v24  ;;  %v3198_v37 = vrot.slane %v3197_v50, 4  ;;  %v3204_v20 = vsel %vm2118_vm1, %v1436_v14, -inf }
 0x23e   :  { %v3980_v29 = vmax.f32 %v3056_v15, %v3112_v10  ;;  %v3981_v12 = vmax.f32 %v3063_v13, %v3119_v42  ;;  %v3186_v51 = vrot.slane %v3185_v22, 2  ;;  %v3192_v9 = vmax.f32 %v3190_v57, %v3191_v7  ;;  %v4403_v13 = vld [vmem:[#allocation2 + $0x41] sm:$0xff] }
 0x23f   :  { %v3982_v47 = vmax.f32 %v3070_v61, %v3126_v30  ;;  %v3199_v2 = vmax.f32 %v3197_v50, %v3198_v37  ;;  %v3205_v31 = vrot.slane %v3204_v20, 4  ;;  %v1393_v27 = vrot.slane %v682_v53, %v8304_v43 }
 0x240   :  { %v4274_v17 = vsel %vm4215_vm6, %v3980_v29, %v4273_v25  ;;  %v3187_v8 = vmax.f32 %v3185_v22, %v3186_v51  ;;  %v3193_v4 = vrot.slane %v3192_v9, 2  ;;  %v1400_v18 = vrot.slane %v1386_v40, %v8304_v43  ;;  %v9007_v51 = vpop.f32.mrb[52].mxu0 }
 0x241   :  { %v4275_v24 = vsel %vm4217_vm7, %v3981_v12, %v4274_v17  ;;  %v3200_v33 = vrot.slane %v3199_v2, 2  ;;  %v3206_v10 = vmax.f32 %v3204_v20, %v3205_v31  ;;  %v1401_v42 = vcombine.high %v1393_v27, %v1393_v27 }
 0x242   :  { %v4276_v45 = vsel %vm4219_vm8, %v3982_v47, %v4275_v24  ;;  %v3188_v30 = vrot.slane %v3187_v8, 1  ;;  %v3194_v56 = vmax.f32 %v3192_v9, %v3193_v4  ;;  %v1402_v23 = vcombine.high %v1400_v18, %v1400_v18 }
 0x243   :  { %4351 = vst [vmem:[#allocation2 + $0xb1] sm:$0xff] %v4276_v45  ;;  %v3201_v16 = vmax.f32 %v3199_v2, %v3200_v33  ;;  %v3207_v19 = vrot.slane %v3206_v10, 2  ;;  %v3127_v1 = vsel %vm2118_vm1, %v1393_v27, -inf  ;;  %v3134_v53 = vsel %vm2118_vm1, %v1401_v42, -inf }
 0x244   :  { %v9001_v63 = vmax.f32 %v3187_v8, %v3188_v30  ;;  %v3195_v34 = vrot.slane %v3194_v56, 1  ;;  %v3128_v11 = vrot.slane %v3127_v1, 4  ;;  %v3135_v5 = vrot.slane %v3134_v53, 4 }
 0x245   :  { %v3202_v52 = vrot.slane %v3201_v16, 1  ;;  %v3208_v28 = vmax.f32 %v3206_v10, %v3207_v19  ;;  %v3141_v60 = vsel %vm2118_vm1, %v1400_v18, -inf  ;;  %v3148_v40 = vsel %vm2118_vm1, %v1402_v23, -inf }
 0x246   :  { %v3196_v44 = vmax.f32 %v3194_v56, %v3195_v34  ;;  %v3129_v14 = vmax.f32 %v3127_v1, %v3128_v11  ;;  %v3136_v55 = vmax.f32 %v3134_v53, %v3135_v5  ;;  %v3142_v46 = vrot.slane %v3141_v60, 4 }
 0x247   :  { %v3203_v58 = vmax.f32 %v3201_v16, %v3202_v52  ;;  %v3209_v57 = vrot.slane %v3208_v28, 1  ;;  %v3149_v50 = vrot.slane %v3148_v40, 4  ;;  %v685_v15 = vmax.f32 %v8984_v21, 0.0 }
 0x248   :  { %v3130_v22 = vrot.slane %v3129_v14, 2  ;;  %v3137_v7 = vrot.slane %v3136_v55, 2  ;;  %v3143_v61 = vmax.f32 %v3141_v60, %v3142_v46  ;;  %v4417_v25 = vpack.c.bf16 %v4404_v38, %v4403_v13  ;;  %v9017_v60 = vpop.f32.mrb[53].mxu0 }
 0x249   :  { %v3210_v37 = vmax.f32 %v3208_v28, %v3209_v57  ;;  %v3150_v20 = vmax.f32 %v3148_v40, %v3149_v50  ;;  %v1437_v29 = vcombine.high %v685_v15, %v685_v15  ;;  %v1444_v12 = vrot.slane %v685_v15, %v8304_v43 }
 0x24a   :  { %v3131_v9 = vmax.f32 %v3129_v14, %v3130_v22  ;;  %v3138_v47 = vmax.f32 %v3136_v55, %v3137_v7  ;;  %v3144_v2 = vrot.slane %v3143_v61, 2  ;;  %7622 = vmatprep.mubr.bf16.mxu0 %v4417_v25  ;;  %v539_v31 = vadd.f32 %v8977_v49, %v8796_v59 }
 0x24b   :  { %v3151_v21 = vrot.slane %v3150_v20, 2  ;;  %v1451_v27 = vrot.slane %v1437_v29, %v8304_v43  ;;  %v1452_v17 = vcombine.high %v1444_v12, %v1444_v12  ;;  %v3211_v8 = vsel %vm2118_vm1, %v1444_v12, -inf }
 0x24c   :  { %v3132_v4 = vrot.slane %v3131_v9, 1  ;;  %v3139_v18 = vrot.slane %v3138_v47, 1  ;;  %v3145_v24 = vmax.f32 %v3143_v61, %v3144_v2  ;;  %v3212_v33 = vrot.slane %v3211_v8, 4 }
 0x24d   :  { %v3152_v10 = vmax.f32 %v3150_v20, %v3151_v21  ;;  %v1453_v42 = vcombine.high %v1451_v27, %v1451_v27  ;;  %v3218_v45 = vsel %vm2118_vm1, %v1452_v17, -inf  ;;  %v3225_v30 = vsel %vm2118_vm1, %v1451_v27, -inf }
 0x24e   :  { %v3133_v56 = vmax.f32 %v3131_v9, %v3132_v4  ;;  %v3140_v23 = vmax.f32 %v3138_v47, %v3139_v18  ;;  %v3146_v16 = vrot.slane %v3145_v24, 1  ;;  %v3213_v59 = vmax.f32 %v3211_v8, %v3212_v33 }
 0x24f   :  { %v3153_v19 = vrot.slane %v3152_v10, 1  ;;  %v3219_v1 = vrot.slane %v3218_v45, 4  ;;  %v3226_v53 = vrot.slane %v3225_v30, 4  ;;  %v3232_v34 = vsel %vm2118_vm1, %v1453_v42, -inf }
 0x250   :  { %v3147_v11 = vmax.f32 %v3145_v24, %v3146_v16  ;;  %v3983_v5 = vmax.f32 %v3133_v56, %v9001_v63  ;;  %v3984_v52 = vmax.f32 %v3140_v23, %v3196_v44  ;;  %v3214_v28 = vrot.slane %v3213_v59, 2  ;;  %v9037_v56 = vpop.f32.mrb[54].mxu0 }
 0x251   :  { %v3154_v40 = vmax.f32 %v3152_v10, %v3153_v19  ;;  %v3220_v38 = vmax.f32 %v3218_v45, %v3219_v1  ;;  %v3227_v14 = vmax.f32 %v3225_v30, %v3226_v53  ;;  %v3233_v55 = vrot.slane %v3232_v34, 4 }
 0x252   :  { %v3985_v46 = vmax.f32 %v3147_v11, %v3203_v58  ;;  %v4277_v57 = vsel %vm4207_vm2, %v3984_v52, %v3983_v5  ;;  %v3215_v50 = vmax.f32 %v3213_v59, %v3214_v28  ;;  %v683_v15 = vmax.f32 %v539_v31, 0.0 }
 0x253   :  { %v3986_v13 = vmax.f32 %v3154_v40, %v3210_v37  ;;  %v3221_v22 = vrot.slane %v3220_v38, 2  ;;  %v3228_v7 = vrot.slane %v3227_v14, 2  ;;  %v3234_v61 = vmax.f32 %v3232_v34, %v3233_v55 }
 0x254   :  { %v4278_v25 = vsel %vm4209_vm3, %v3985_v46, %v4277_v57  ;;  %v3216_v63 = vrot.slane %v3215_v50, 1  ;;  %v1403_v44 = vcombine.high %v683_v15, %v683_v15  ;;  %v1410_v20 = vrot.slane %v683_v15, %v8304_v43 }
 0x255   :  { %v3222_v29 = vmax.f32 %v3220_v38, %v3221_v22  ;;  %v3229_v12 = vmax.f32 %v3227_v14, %v3228_v7  ;;  %v3235_v9 = vrot.slane %v3234_v61, 2  ;;  %v9023_v47 = vsel %vm4211_vm4, %v3986_v13, %v4278_v25 }
 0x256   :  { %v9025_v58 = vmax.f32 %v3215_v50, %v3216_v63  ;;  %v1417_v2 = vrot.slane %v1403_v44, %v8304_v43  ;;  %v1418_v37 = vcombine.high %v1410_v20, %v1410_v20  ;;  %v3155_v31 = vsel %vm2118_vm1, %v1410_v20, -inf }
 0x257   :  { %v3223_v21 = vrot.slane %v3222_v29, 1  ;;  %v3230_v27 = vrot.slane %v3229_v12, 1  ;;  %v3236_v17 = vmax.f32 %v3234_v61, %v3235_v9  ;;  %v3156_v8 = vrot.slane %v3155_v31, 4 }
 0x258   :  { %v1419_v4 = vcombine.high %v1417_v2, %v1417_v2  ;;  %v3162_v18 = vsel %vm2118_vm1, %v1418_v37, -inf  ;;  %v3169_v24 = vsel %vm2118_vm1, %v1417_v2, -inf  ;;  %v560_v33 = vadd.f32 %v8977_v49, %v8820_v35 }
 0x259   :  { %v9033_v10 = vmax.f32 %v3222_v29, %v3223_v21  ;;  %v9035_v42 = vmax.f32 %v3229_v12, %v3230_v27  ;;  %v3237_v45 = vrot.slane %v3236_v17, 1  ;;  %v3157_v30 = vmax.f32 %v3155_v31, %v3156_v8 }
 0x25a   :  { %v3163_v23 = vrot.slane %v3162_v18, 4  ;;  %v3170_v16 = vrot.slane %v3169_v24, 4  ;;  %v3176_v59 = vsel %vm2118_vm1, %v1419_v4, -inf  ;;  %v688_v19 = vmax.f32 %v560_v33, 0.0 }
 0x25b   :  { %v9040_v1 = vmax.f32 %v3236_v17, %v3237_v45  ;;  %v3158_v53 = vrot.slane %v3157_v30, 2  ;;  %v3177_v34 = vrot.slane %v3176_v59, 4  ;;  %v552_v35 = vadd.f32 %v8977_v49, %v8826_v6 }
 0x25c   :  { %v3164_v11 = vmax.f32 %v3162_v18, %v3163_v23  ;;  %v3171_v5 = vmax.f32 %v3169_v24, %v3170_v16  ;;  %v1488_v52 = vcombine.high %v688_v19, %v688_v19  ;;  %v1495_v28 = vrot.slane %v688_v19, %v8304_v43 }
 0x25d   :  { %v3159_v40 = vmax.f32 %v3157_v30, %v3158_v53  ;;  %v3178_v38 = vmax.f32 %v3176_v59, %v3177_v34  ;;  %v686_v14 = vmax.f32 %v552_v35, 0.0  ;;  %v9047_v55 = vadd.f32 %v8977_v49, %v8840_v62 }
 0x25e   :  { %v3165_v46 = vrot.slane %v3164_v11, 2  ;;  %v3172_v57 = vrot.slane %v3171_v5, 2  ;;  %v1502_v50 = vrot.slane %v1488_v52, %v8304_v43  ;;  %v1503_v15 = vcombine.high %v1495_v28, %v1495_v28  ;;  %v9061_v52 = vpop.f32.mrb[55].mxu0 }
 0x25f   :  { %v3160_v13 = vrot.slane %v3159_v40, 1  ;;  %v3179_v22 = vrot.slane %v3178_v38, 2  ;;  %v3295_v6 = vsel %vm2118_vm1, %v1495_v28, -inf  ;;  %v1454_v7 = vcombine.high %v686_v14, %v686_v14 }
 0x260   :  { %v3166_v61 = vmax.f32 %v3164_v11, %v3165_v46  ;;  %v3173_v25 = vmax.f32 %v3171_v5, %v3172_v57  ;;  %v1504_v63 = vcombine.high %v1502_v50, %v1502_v50  ;;  %v3296_v44 = vrot.slane %v3295_v6, 4 }
 0x261   :  { %v3161_v20 = vmax.f32 %v3159_v40, %v3160_v13  ;;  %v3180_v29 = vmax.f32 %v3178_v38, %v3179_v22  ;;  %v3302_v12 = vsel %vm2118_vm1, %v1503_v15, -inf  ;;  %v3309_v62 = vsel %vm2118_vm1, %v1502_v50, -inf }
 0x262   :  { %v3167_v9 = vrot.slane %v3166_v61, 1  ;;  %v3174_v2 = vrot.slane %v3173_v25, 1  ;;  %v3297_v37 = vmax.f32 %v3295_v6, %v3296_v44  ;;  %v3303_v31 = vrot.slane %v3302_v12, 4 }
 0x263   :  { %v3181_v21 = vrot.slane %v3180_v29, 1  ;;  %v3987_v27 = vmax.f32 %v3161_v20, %v9025_v58  ;;  %v3310_v17 = vrot.slane %v3309_v62, 4  ;;  %v3316_v8 = vsel %vm2118_vm1, %v1504_v63, -inf  ;;  %v4937_v20 = vld [vmem:[#allocation2 + $0x60] sm:$0xff] }
 0x264   :  { %v3168_v4 = vmax.f32 %v3166_v61, %v3167_v9  ;;  %v3175_v18 = vmax.f32 %v3173_v25, %v3174_v2  ;;  %v3298_v24 = vrot.slane %v3297_v37, 2  ;;  %v3304_v33 = vmax.f32 %v3302_v12, %v3303_v31 }
 0x265   :  { %v3182_v45 = vmax.f32 %v3180_v29, %v3181_v21  ;;  %v4280_v30 = vsel %vm4213_vm5, %v3987_v27, %v9023_v47  ;;  %v3311_v23 = vmax.f32 %v3309_v62, %v3310_v17  ;;  %v3317_v16 = vrot.slane %v3316_v8, 4  ;;  %v4936_v27 = vld [vmem:[#allocation2 + $0x50] sm:$0xff] }
 0x266   :  { %v3988_v59 = vmax.f32 %v3168_v4, %v9033_v10  ;;  %v3989_v19 = vmax.f32 %v3175_v18, %v9035_v42  ;;  %v3299_v53 = vmax.f32 %v3297_v37, %v3298_v24  ;;  %v3305_v34 = vrot.slane %v3304_v33, 2 }
 0x267   :  { %v3990_v58 = vmax.f32 %v3182_v45, %v9040_v1  ;;  %v3312_v35 = vrot.slane %v3311_v23, 2  ;;  %v3318_v11 = vmax.f32 %v3316_v8, %v3317_v16  ;;  %v1461_v5 = vrot.slane %v686_v14, %v8304_v43 }
 0x268   :  { %v4281_v28 = vsel %vm4215_vm6, %v3988_v59, %v4280_v30  ;;  %v3300_v40 = vrot.slane %v3299_v53, 1  ;;  %v3306_v47 = vmax.f32 %v3304_v33, %v3305_v34  ;;  %v1468_v38 = vrot.slane %v1454_v7, %v8304_v43 }
 0x269   :  { %v4282_v10 = vsel %vm4217_vm7, %v3989_v19, %v4281_v28  ;;  %v3313_v46 = vmax.f32 %v3311_v23, %v3312_v35  ;;  %v3319_v42 = vrot.slane %v3318_v11, 2  ;;  %v1469_v57 = vcombine.high %v1461_v5, %v1461_v5  ;;  %v9085_v19 = vpop.f32.mrb[56].mxu0 }
 0x26a   :  { %v4283_v50 = vsel %vm4219_vm8, %v3990_v58, %v4282_v10  ;;  %v9067_v1 = vmax.f32 %v3299_v53, %v3300_v40  ;;  %v3307_v15 = vrot.slane %v3306_v47, 1  ;;  %v1470_v13 = vcombine.high %v1468_v38, %v1468_v38 }
 0x26b   :  { %4352 = vst [vmem:[#allocation2 + $0xc1] sm:$0xff] %v4283_v50  ;;  %v3314_v14 = vrot.slane %v3313_v46, 1  ;;  %v3320_v22 = vmax.f32 %v3318_v11, %v3319_v42  ;;  %v3239_v6 = vsel %vm2118_vm1, %v1461_v5, -inf  ;;  %v3246_v61 = vsel %vm2118_vm1, %v1469_v57, -inf }
 0x26c   :  { %v9071_v25 = vmax.f32 %v3306_v47, %v3307_v15  ;;  %v3240_v7 = vrot.slane %v3239_v6, 4  ;;  %v3247_v63 = vrot.slane %v3246_v61, 4  ;;  %v3253_v44 = vsel %vm2118_vm1, %v1468_v38, -inf }
 0x26d   :  { %v3315_v29 = vmax.f32 %v3313_v46, %v3314_v14  ;;  %v3321_v12 = vrot.slane %v3320_v22, 1  ;;  %v3254_v62 = vrot.slane %v3253_v44, 4  ;;  %v3260_v9 = vsel %vm2118_vm1, %v1470_v13, -inf }
 0x26e   :  { %v3241_v2 = vmax.f32 %v3239_v6, %v3240_v7  ;;  %v3248_v37 = vmax.f32 %v3246_v61, %v3247_v63  ;;  %v3261_v31 = vrot.slane %v3260_v9, 4  ;;  %v689_v21 = vmax.f32 %v9047_v55, 0.0 }
 0x26f   :  { %v9076_v17 = vmax.f32 %v3320_v22, %v3321_v12  ;;  %v3255_v8 = vmax.f32 %v3253_v44, %v3254_v62  ;;  %v4950_v4 = vpack.c.bf16 %v4937_v20, %v4936_v27  ;;  %v555_v18 = vadd.f32 %v8977_v49, %v8860_v41  ;;  %v9091_v22 = vpop.f32.mrb[57].mxu0 }
 0x270   :  { %v3242_v24 = vrot.slane %v3241_v2, 2  ;;  %v3249_v33 = vrot.slane %v3248_v37, 2  ;;  %v3262_v45 = vmax.f32 %v3260_v9, %v3261_v31  ;;  %v1505_v30 = vcombine.high %v689_v21, %v689_v21 }
 0x271   :  { %v3256_v23 = vrot.slane %v3255_v8, 2  ;;  %v1512_v16 = vrot.slane %v689_v21, %v8304_v43  ;;  %7718 = vmatprep.mubr.bf16.mxu1 %v4950_v4  ;;  %v687_v59 = vmax.f32 %v555_v18, 0.0  ;;  %v9083_v55 = vadd.f32 %v8977_v49, %v8872_v36 }
 0x272   :  { %v3243_v53 = vmax.f32 %v3241_v2, %v3242_v24  ;;  %v3250_v34 = vmax.f32 %v3248_v37, %v3249_v33  ;;  %v3263_v58 = vrot.slane %v3262_v45, 2  ;;  %v1519_v41 = vrot.slane %v1505_v30, %v8304_v43 }
 0x273   :  { %v3257_v35 = vmax.f32 %v3255_v8, %v3256_v23  ;;  %v1520_v11 = vcombine.high %v1512_v16, %v1512_v16  ;;  %v3323_v5 = vsel %vm2118_vm1, %v1512_v16, -inf  ;;  %v1471_v28 = vcombine.high %v687_v59, %v687_v59 }
 0x274   :  { %v3244_v40 = vrot.slane %v3243_v53, 1  ;;  %v3251_v47 = vrot.slane %v3250_v34, 1  ;;  %v3264_v38 = vmax.f32 %v3262_v45, %v3263_v58  ;;  %v1521_v10 = vcombine.high %v1519_v41, %v1519_v41 }
 0x275   :  { %v3258_v46 = vrot.slane %v3257_v35, 1  ;;  %v3324_v42 = vrot.slane %v3323_v5, 4  ;;  %v3330_v36 = vsel %vm2118_vm1, %v1520_v11, -inf  ;;  %v3337_v57 = vsel %vm2118_vm1, %v1519_v41, -inf }
 0x276   :  { %v3245_v50 = vmax.f32 %v3243_v53, %v3244_v40  ;;  %v3252_v15 = vmax.f32 %v3250_v34, %v3251_v47  ;;  %v3265_v13 = vrot.slane %v3264_v38, 1  ;;  %v3331_v14 = vrot.slane %v3330_v36, 4 }
 0x277   :  { %v3259_v6 = vmax.f32 %v3257_v35, %v3258_v46  ;;  %v3325_v61 = vmax.f32 %v3323_v5, %v3324_v42  ;;  %v3338_v7 = vrot.slane %v3337_v57, 4  ;;  %v3344_v63 = vsel %vm2118_vm1, %v1521_v10, -inf }
 0x278   :  { %v3266_v44 = vmax.f32 %v3264_v38, %v3265_v13  ;;  %v3991_v20 = vmax.f32 %v3245_v50, %v9067_v1  ;;  %v3992_v12 = vmax.f32 %v3252_v15, %v9071_v25  ;;  %v3332_v62 = vmax.f32 %v3330_v36, %v3331_v14  ;;  %v9105_v50 = vpop.f32.mrb[58].mxu0 }
 0x279   :  { %v3993_v9 = vmax.f32 %v3259_v6, %v3315_v29  ;;  %v3326_v2 = vrot.slane %v3325_v61, 2  ;;  %v3339_v37 = vmax.f32 %v3337_v57, %v3338_v7  ;;  %v3345_v31 = vrot.slane %v3344_v63, 4 }
 0x27a   :  { %v3994_v21 = vmax.f32 %v3266_v44, %v9076_v17  ;;  %v4284_v27 = vsel %vm4207_vm2, %v3992_v12, %v3991_v20  ;;  %v3333_v8 = vrot.slane %v3332_v62, 2  ;;  %v1478_v4 = vrot.slane %v687_v59, %v8304_v43 }
 0x27b   :  { %v4285_v18 = vsel %vm4209_vm3, %v3993_v9, %v4284_v27  ;;  %v3327_v24 = vmax.f32 %v3325_v61, %v3326_v2  ;;  %v3340_v33 = vrot.slane %v3339_v37, 2  ;;  %v3346_v45 = vmax.f32 %v3344_v63, %v3345_v31 }
 0x27c   :  { %v3334_v1 = vmax.f32 %v3332_v62, %v3333_v8  ;;  %v1485_v25 = vrot.slane %v1471_v28, %v8304_v43  ;;  %v1486_v30 = vcombine.high %v1478_v4, %v1478_v4  ;;  %v3267_v29 = vsel %vm2118_vm1, %v1478_v4, -inf }
 0x27d   :  { %v3328_v23 = vrot.slane %v3327_v24, 1  ;;  %v3341_v16 = vmax.f32 %v3339_v37, %v3340_v33  ;;  %v3347_v53 = vrot.slane %v3346_v45, 2  ;;  %v3268_v17 = vrot.slane %v3267_v29, 4 }
 0x27e   :  { %v3335_v34 = vrot.slane %v3334_v1, 1  ;;  %v1487_v58 = vcombine.high %v1485_v25, %v1485_v25  ;;  %v3274_v41 = vsel %vm2118_vm1, %v1486_v30, -inf  ;;  %v3281_v59 = vsel %vm2118_vm1, %v1485_v25, -inf }
 0x27f   :  { %v3329_v35 = vmax.f32 %v3327_v24, %v3328_v23  ;;  %v3342_v11 = vrot.slane %v3341_v16, 1  ;;  %v3348_v5 = vmax.f32 %v3346_v45, %v3347_v53  ;;  %v3269_v40 = vmax.f32 %v3267_v29, %v3268_v17 }
 0x280   :  { %v3336_v47 = vmax.f32 %v3334_v1, %v3335_v34  ;;  %v3275_v38 = vrot.slane %v3274_v41, 4  ;;  %v3282_v28 = vrot.slane %v3281_v59, 4  ;;  %v3288_v10 = vsel %vm2118_vm1, %v1487_v58, -inf }
 0x281   :  { %v3343_v46 = vmax.f32 %v3341_v16, %v3342_v11  ;;  %v3349_v42 = vrot.slane %v3348_v5, 1  ;;  %v3270_v36 = vrot.slane %v3269_v40, 2  ;;  %v3289_v57 = vrot.slane %v3288_v10, 4 }
 0x282   :  { %v3276_v15 = vmax.f32 %v3274_v41, %v3275_v38  ;;  %v3283_v13 = vmax.f32 %v3281_v59, %v3282_v28  ;;  %v4286_v14 = vsel %vm4211_vm4, %v3994_v21, %v4285_v18  ;;  %v692_v6 = vmax.f32 %v9083_v55, 0.0 }
 0x283   :  { %v3350_v61 = vmax.f32 %v3348_v5, %v3349_v42  ;;  %v3271_v7 = vmax.f32 %v3269_v40, %v3270_v36  ;;  %v3290_v63 = vmax.f32 %v3288_v10, %v3289_v57  ;;  %v568_v44 = vadd.f32 %v8977_v49, %v8882_v0 }
 0x284   :  { %v3277_v20 = vrot.slane %v3276_v15, 2  ;;  %v3284_v12 = vrot.slane %v3283_v13, 2  ;;  %v1556_v62 = vcombine.high %v692_v6, %v692_v6  ;;  %v1563_v9 = vrot.slane %v692_v6, %v8304_v43 }
 0x285   :  { %v3272_v2 = vrot.slane %v3271_v7, 1  ;;  %v3291_v37 = vrot.slane %v3290_v63, 2  ;;  %v690_v31 = vmax.f32 %v568_v44, 0.0  ;;  %v9114_v27 = vadd.f32 %v8977_v49, %v8902_v48 }
 0x286   :  { %v3278_v21 = vmax.f32 %v3276_v15, %v3277_v20  ;;  %v3285_v55 = vmax.f32 %v3283_v13, %v3284_v12  ;;  %v1570_v8 = vrot.slane %v1556_v62, %v8304_v43  ;;  %v1571_v4 = vcombine.high %v1563_v9, %v1563_v9 }
 0x287   :  { %v3273_v18 = vmax.f32 %v3271_v7, %v3272_v2  ;;  %v3292_v24 = vmax.f32 %v3290_v63, %v3291_v37  ;;  %v3407_v0 = vsel %vm2118_vm1, %v1563_v9, -inf  ;;  %v1522_v33 = vcombine.high %v690_v31, %v690_v31  ;;  %v9125_v63 = vpop.f32.mrb[59].mxu0 }
 0x288   :  { %v3279_v45 = vrot.slane %v3278_v21, 1  ;;  %v3286_v1 = vrot.slane %v3285_v55, 1  ;;  %v1572_v25 = vcombine.high %v1570_v8, %v1570_v8  ;;  %v3408_v30 = vrot.slane %v3407_v0, 4 }
 0x289   :  { %v3293_v29 = vrot.slane %v3292_v24, 1  ;;  %v3995_v23 = vmax.f32 %v3273_v18, %v3329_v35  ;;  %v3414_v16 = vsel %vm2118_vm1, %v1571_v4, -inf  ;;  %v3421_v48 = vsel %vm2118_vm1, %v1570_v8, -inf }
 0x28a   :  { %v3280_v53 = vmax.f32 %v3278_v21, %v3279_v45  ;;  %v3287_v17 = vmax.f32 %v3285_v55, %v3286_v1  ;;  %v3409_v34 = vmax.f32 %v3407_v0, %v3408_v30  ;;  %v3415_v58 = vrot.slane %v3414_v16, 4  ;;  %v4406_v45 = vld [vmem:[#allocation2 + $0x71] sm:$0xff] }
 0x28b   :  { %v3294_v41 = vmax.f32 %v3292_v24, %v3293_v29  ;;  %v4287_v59 = vsel %vm4213_vm5, %v3995_v23, %v4286_v14  ;;  %v3422_v11 = vrot.slane %v3421_v48, 4  ;;  %v3428_v5 = vsel %vm2118_vm1, %v1572_v25, -inf }
 0x28c   :  { %v3996_v40 = vmax.f32 %v3280_v53, %v3336_v47  ;;  %v3997_v38 = vmax.f32 %v3287_v17, %v3343_v46  ;;  %v3410_v28 = vrot.slane %v3409_v34, 2  ;;  %v3416_v10 = vmax.f32 %v3414_v16, %v3415_v58  ;;  %v4405_v17 = vld [vmem:[#allocation2 + $0x61] sm:$0xff] }
 0x28d   :  { %v3998_v42 = vmax.f32 %v3294_v41, %v3350_v61  ;;  %v3423_v35 = vmax.f32 %v3421_v48, %v3422_v11  ;;  %v3429_v36 = vrot.slane %v3428_v5, 4  ;;  %v1529_v57 = vrot.slane %v690_v31, %v8304_v43 }
 0x28e   :  { %v4288_v15 = vsel %vm4215_vm6, %v3996_v40, %v4287_v59  ;;  %v3411_v13 = vmax.f32 %v3409_v34, %v3410_v28  ;;  %v3417_v6 = vrot.slane %v3416_v10, 2  ;;  %v1536_v7 = vrot.slane %v1522_v33, %v8304_v43  ;;  %v9137_v28 = vpop.f32.mrb[60].mxu0 }
 0x28f   :  { %v4289_v14 = vsel %vm4217_vm7, %v3997_v38, %v4288_v15  ;;  %v3424_v44 = vrot.slane %v3423_v35, 2  ;;  %v3430_v47 = vmax.f32 %v3428_v5, %v3429_v36  ;;  %v1537_v46 = vcombine.high %v1529_v57, %v1529_v57 }
 0x290   :  { %v4290_v20 = vsel %vm4219_vm8, %v3998_v42, %v4289_v14  ;;  %v3412_v61 = vrot.slane %v3411_v13, 1  ;;  %v3418_v12 = vmax.f32 %v3416_v10, %v3417_v6  ;;  %v1538_v62 = vcombine.high %v1536_v7, %v1536_v7 }
 0x291   :  { %4353 = vst [vmem:[#allocation2 + $0xd1] sm:$0xff] %v4290_v20  ;;  %v3425_v9 = vmax.f32 %v3423_v35, %v3424_v44  ;;  %v3431_v2 = vrot.slane %v3430_v47, 2  ;;  %v3351_v37 = vsel %vm2118_vm1, %v1529_v57, -inf  ;;  %v3358_v31 = vsel %vm2118_vm1, %v1537_v46, -inf }
 0x292   :  { %v9131_v21 = vmax.f32 %v3411_v13, %v3412_v61  ;;  %v3419_v55 = vrot.slane %v3418_v12, 1  ;;  %v3352_v8 = vrot.slane %v3351_v37, 4  ;;  %v3359_v4 = vrot.slane %v3358_v31, 4 }
 0x293   :  { %v3426_v18 = vrot.slane %v3425_v9, 1  ;;  %v3432_v24 = vmax.f32 %v3430_v47, %v3431_v2  ;;  %v3365_v0 = vsel %vm2118_vm1, %v1536_v7, -inf  ;;  %v3372_v33 = vsel %vm2118_vm1, %v1538_v62, -inf }
 0x294   :  { %v3420_v1 = vmax.f32 %v3418_v12, %v3419_v55  ;;  %v3353_v25 = vmax.f32 %v3351_v37, %v3352_v8  ;;  %v3360_v30 = vmax.f32 %v3358_v31, %v3359_v4  ;;  %v3366_v29 = vrot.slane %v3365_v0, 4 }
 0x295   :  { %v3427_v23 = vmax.f32 %v3425_v9, %v3426_v18  ;;  %v3433_v16 = vrot.slane %v3432_v24, 1  ;;  %v3373_v48 = vrot.slane %v3372_v33, 4  ;;  %v693_v53 = vmax.f32 %v9114_v27, 0.0 }
 0x296   :  { %v3354_v34 = vrot.slane %v3353_v25, 2  ;;  %v3361_v58 = vrot.slane %v3360_v30, 2  ;;  %v3367_v41 = vmax.f32 %v3365_v0, %v3366_v29  ;;  %v4418_v59 = vpack.c.bf16 %v4406_v45, %v4405_v17  ;;  %v9147_v0 = vpop.f32.mrb[61].mxu0 }
 0x297   :  { %v3434_v11 = vmax.f32 %v3432_v24, %v3433_v16  ;;  %v3374_v5 = vmax.f32 %v3372_v33, %v3373_v48  ;;  %v1573_v40 = vcombine.high %v693_v53, %v693_v53  ;;  %v1580_v38 = vrot.slane %v693_v53, %v8304_v43 }
 0x298   :  { %v3355_v10 = vmax.f32 %v3353_v25, %v3354_v34  ;;  %v3362_v42 = vmax.f32 %v3360_v30, %v3361_v58  ;;  %v3368_v35 = vrot.slane %v3367_v41, 2  ;;  %7623 = vmatmul.mubr.bf16.gmra.mrb[68].mxu0 %v4418_v59  ;;  %v571_v36 = vadd.f32 %v8977_v49, %v8926_v3 }
 0x299   :  { %v3375_v27 = vrot.slane %v3374_v5, 2  ;;  %v1587_v57 = vrot.slane %v1573_v40, %v8304_v43  ;;  %v1588_v15 = vcombine.high %v1580_v38, %v1580_v38  ;;  %v3435_v13 = vsel %vm2118_vm1, %v1580_v38, -inf }
 0x29a   :  { %v3356_v6 = vrot.slane %v3355_v10, 1  ;;  %v3363_v7 = vrot.slane %v3362_v42, 1  ;;  %v3369_v14 = vmax.f32 %v3367_v41, %v3368_v35  ;;  %v3436_v44 = vrot.slane %v3435_v13, 4 }
 0x29b   :  { %v3376_v47 = vmax.f32 %v3374_v5, %v3375_v27  ;;  %v1589_v46 = vcombine.high %v1587_v57, %v1587_v57  ;;  %v3442_v20 = vsel %vm2118_vm1, %v1588_v15, -inf  ;;  %v3449_v61 = vsel %vm2118_vm1, %v1587_v57, -inf }
 0x29c   :  { %v3357_v12 = vmax.f32 %v3355_v10, %v3356_v6  ;;  %v3364_v62 = vmax.f32 %v3362_v42, %v3363_v7  ;;  %v3370_v9 = vrot.slane %v3369_v14, 1  ;;  %v3437_v3 = vmax.f32 %v3435_v13, %v3436_v44 }
 0x29d   :  { %v3377_v2 = vrot.slane %v3376_v47, 1  ;;  %v3443_v37 = vrot.slane %v3442_v20, 4  ;;  %v3450_v31 = vrot.slane %v3449_v61, 4  ;;  %v3456_v55 = vsel %vm2118_vm1, %v1589_v46, -inf }
 0x29e   :  { %v3371_v8 = vmax.f32 %v3369_v14, %v3370_v9  ;;  %v3999_v4 = vmax.f32 %v3357_v12, %v9131_v21  ;;  %v4000_v18 = vmax.f32 %v3364_v62, %v3420_v1  ;;  %v3438_v24 = vrot.slane %v3437_v3, 2  ;;  %v9167_v12 = vpop.f32.mrb[62].mxu0 }
 0x29f   :  { %v3378_v33 = vmax.f32 %v3376_v47, %v3377_v2  ;;  %v3444_v45 = vmax.f32 %v3442_v20, %v3443_v37  ;;  %v3451_v25 = vmax.f32 %v3449_v61, %v3450_v31  ;;  %v3457_v30 = vrot.slane %v3456_v55, 4 }
 0x2a0   :  { %v4001_v29 = vmax.f32 %v3371_v8, %v3427_v23  ;;  %v4291_v16 = vsel %vm4207_vm2, %v4000_v18, %v3999_v4  ;;  %v3439_v48 = vmax.f32 %v3437_v3, %v3438_v24  ;;  %v691_v53 = vmax.f32 %v571_v36, 0.0 }
 0x2a1   :  { %v4002_v17 = vmax.f32 %v3378_v33, %v3434_v11  ;;  %v3445_v34 = vrot.slane %v3444_v45, 2  ;;  %v3452_v58 = vrot.slane %v3451_v25, 2  ;;  %v3458_v41 = vmax.f32 %v3456_v55, %v3457_v30 }
 0x2a2   :  { %v4292_v59 = vsel %vm4209_vm3, %v4001_v29, %v4291_v16  ;;  %v3440_v21 = vrot.slane %v3439_v48, 1  ;;  %v1539_v1 = vcombine.high %v691_v53, %v691_v53  ;;  %v1546_v5 = vrot.slane %v691_v53, %v8304_v43 }
 0x2a3   :  { %v3446_v40 = vmax.f32 %v3444_v45, %v3445_v34  ;;  %v3453_v38 = vmax.f32 %v3451_v25, %v3452_v58  ;;  %v3459_v10 = vrot.slane %v3458_v41, 2  ;;  %v9153_v42 = vsel %vm4211_vm4, %v4002_v17, %v4292_v59 }
 0x2a4   :  { %v9155_v23 = vmax.f32 %v3439_v48, %v3440_v21  ;;  %v1553_v35 = vrot.slane %v1539_v1, %v8304_v43  ;;  %v1554_v11 = vcombine.high %v1546_v5, %v1546_v5  ;;  %v3379_v36 = vsel %vm2118_vm1, %v1546_v5, -inf }
 0x2a5   :  { %v3447_v27 = vrot.slane %v3446_v40, 1  ;;  %v3454_v57 = vrot.slane %v3453_v38, 1  ;;  %v3460_v15 = vmax.f32 %v3458_v41, %v3459_v10  ;;  %v3380_v13 = vrot.slane %v3379_v36, 4 }
 0x2a6   :  { %v1555_v6 = vcombine.high %v1553_v35, %v1553_v35  ;;  %v3386_v7 = vsel %vm2118_vm1, %v1554_v11, -inf  ;;  %v3393_v14 = vsel %vm2118_vm1, %v1553_v35, -inf  ;;  %v592_v44 = vadd.f32 %v8977_v49, %v8950_v26 }
 0x2a7   :  { %v9163_v47 = vmax.f32 %v3446_v40, %v3447_v27  ;;  %v9165_v46 = vmax.f32 %v3453_v38, %v3454_v57  ;;  %v3461_v20 = vrot.slane %v3460_v15, 1  ;;  %v3381_v61 = vmax.f32 %v3379_v36, %v3380_v13 }
 0x2a8   :  { %v3387_v62 = vrot.slane %v3386_v7, 4  ;;  %v3394_v9 = vrot.slane %v3393_v14, 4  ;;  %v3400_v3 = vsel %vm2118_vm1, %v1555_v6, -inf  ;;  %v696_v2 = vmax.f32 %v592_v44, 0.0 }
 0x2a9   :  { %v9170_v37 = vmax.f32 %v3460_v15, %v3461_v20  ;;  %v3382_v31 = vrot.slane %v3381_v61, 2  ;;  %v3401_v55 = vrot.slane %v3400_v3, 4  ;;  %v584_v26 = vadd.f32 %v8977_v49, %v8956_v54 }
 0x2aa   :  { %v3388_v8 = vmax.f32 %v3386_v7, %v3387_v62  ;;  %v3395_v4 = vmax.f32 %v3393_v14, %v3394_v9  ;;  %v1624_v18 = vcombine.high %v696_v2, %v696_v2  ;;  %v1631_v24 = vrot.slane %v696_v2, %v8304_v43 }
 0x2ab   :  { %v3383_v33 = vmax.f32 %v3381_v61, %v3382_v31  ;;  %v3402_v45 = vmax.f32 %v3400_v3, %v3401_v55  ;;  %v694_v25 = vmax.f32 %v584_v26, 0.0  ;;  %v9177_v30 = vadd.f32 %v8977_v49, %v8970_v32 }
 0x2ac   :  { %v3389_v29 = vrot.slane %v3388_v8, 2  ;;  %v3396_v16 = vrot.slane %v3395_v4, 2  ;;  %v1638_v48 = vrot.slane %v1624_v18, %v8304_v43  ;;  %v1639_v53 = vcombine.high %v1631_v24, %v1631_v24 }
 0x2ad   :  { %v3384_v17 = vrot.slane %v3383_v33, 1  ;;  %v3403_v34 = vrot.slane %v3402_v45, 2  ;;  %v3519_v54 = vsel %vm2118_vm1, %v1631_v24, -inf  ;;  %v1590_v58 = vcombine.high %v694_v25, %v694_v25 }
 0x2ae   :  { %v3390_v41 = vmax.f32 %v3388_v8, %v3389_v29  ;;  %v3397_v59 = vmax.f32 %v3395_v4, %v3396_v16  ;;  %v1640_v21 = vcombine.high %v1638_v48, %v1638_v48  ;;  %v3520_v1 = vrot.slane %v3519_v54, 4  ;;  %v9191_v4 = vpop.f32.mrb[63].mxu0 }
 0x2af   :  { %v3385_v5 = vmax.f32 %v3383_v33, %v3384_v17  ;;  %v3404_v40 = vmax.f32 %v3402_v45, %v3403_v34  ;;  %v3526_v38 = vsel %vm2118_vm1, %v1639_v53, -inf  ;;  %v3533_v32 = vsel %vm2118_vm1, %v1638_v48, -inf }
 0x2b0   :  { %v3391_v49 = vrot.slane %v3390_v41, 1  ;;  %v3398_v10 = vrot.slane %v3397_v59, 1  ;;  %v3521_v35 = vmax.f32 %v3519_v54, %v3520_v1  ;;  %v3527_v11 = vrot.slane %v3526_v38, 4 }
 0x2b1   :  { %v3405_v36 = vrot.slane %v3404_v40, 1  ;;  %v4003_v27 = vmax.f32 %v3385_v5, %v9155_v23  ;;  %v3534_v57 = vrot.slane %v3533_v32, 4  ;;  %v3540_v15 = vsel %vm2118_vm1, %v1640_v21, -inf  ;;  %v4939_v5 = vld [vmem:[#allocation2 + $0x80] sm:$0xff] }
 0x2b2   :  { %v3392_v13 = vmax.f32 %v3390_v41, %v3391_v49  ;;  %v3399_v6 = vmax.f32 %v3397_v59, %v3398_v10  ;;  %v3522_v7 = vrot.slane %v3521_v35, 2  ;;  %v3528_v14 = vmax.f32 %v3526_v38, %v3527_v11 }
 0x2b3   :  { %v3406_v44 = vmax.f32 %v3404_v40, %v3405_v36  ;;  %v4294_v20 = vsel %vm4213_vm5, %v4003_v27, %v9153_v42  ;;  %v3535_v61 = vmax.f32 %v3533_v32, %v3534_v57  ;;  %v3541_v62 = vrot.slane %v3540_v15, 4  ;;  %v4938_v27 = vld [vmem:[#allocation2 + $0x70] sm:$0xff] }
 0x2b4   :  { %v4004_v9 = vmax.f32 %v3392_v13, %v9163_v47  ;;  %v4005_v3 = vmax.f32 %v3399_v6, %v9165_v46  ;;  %v3523_v2 = vmax.f32 %v3521_v35, %v3522_v7  ;;  %v3529_v31 = vrot.slane %v3528_v14, 2  ;;  %v9216_v6 = vld [vmem:[%s10113_s2] ss:$0 sm:$0xff] }
 0x2b5   :  { %v4006_v23 = vmax.f32 %v3406_v44, %v9170_v37  ;;  %v3536_v55 = vrot.slane %v3535_v61, 2  ;;  %v3542_v26 = vmax.f32 %v3540_v15, %v3541_v62  ;;  %v1597_v8 = vrot.slane %v694_v25, %v8304_v43  ;;  %v8069_v37 = vld [vmem:[%s10114_s3] sm:$0xff]  }
 0x2b6   :  { %v4295_v18 = vsel %vm4215_vm6, %v4004_v9, %v4294_v20  ;;  %v3524_v24 = vrot.slane %v3523_v2, 1  ;;  %v3530_v42 = vmax.f32 %v3528_v14, %v3529_v31  ;;  %v1604_v33 = vrot.slane %v1590_v58, %v8304_v43  ;;  %7634 = vmatprep.subr.bf16.mxu0 %v8069_v37 }
 0x2b7   :  { %v4296_v47 = vsel %vm4217_vm7, %v4005_v3, %v4295_v18  ;;  %v3537_v45 = vmax.f32 %v3535_v61, %v3536_v55  ;;  %v3543_v46 = vrot.slane %v3542_v26, 2  ;;  %v1605_v29 = vcombine.high %v1597_v8, %v1597_v8  ;;  %7635 = vmatpush3.bf16.msra.mxu0 %v8069_v37 }
 0x2b8   :  { %v4297_v16 = vsel %vm4219_vm8, %v4006_v23, %v4296_v47  ;;  %v9200_v25 = vmax.f32 %v3523_v2, %v3524_v24  ;;  %v3531_v48 = vrot.slane %v3530_v42, 1  ;;  %v1606_v53 = vcombine.high %v1604_v33, %v1604_v33 }
 0x2b9   :  { %4354 = vst [vmem:[#allocation2 + $0xe1] sm:$0xff] %v4297_v16  ;;  %v3538_v17 = vrot.slane %v3537_v45, 1  ;;  %v3544_v34 = vmax.f32 %v3542_v26, %v3543_v46  ;;  %v3463_v54 = vsel %vm2118_vm1, %v1597_v8, -inf  ;;  %v3470_v58 = vsel %vm2118_vm1, %v1605_v29, -inf }
 0x2ba   :  { %v9204_v41 = vmax.f32 %v3530_v42, %v3531_v48  ;;  %v3464_v59 = vrot.slane %v3463_v54, 4  ;;  %v3471_v21 = vrot.slane %v3470_v58, 4  ;;  %v3477_v1 = vsel %vm2118_vm1, %v1604_v33, -inf }
 0x2bb   :  { %v9207_v40 = vmax.f32 %v3537_v45, %v3538_v17  ;;  %v3545_v38 = vrot.slane %v3544_v34, 1  ;;  %v3478_v32 = vrot.slane %v3477_v1, 4  ;;  %v3484_v49 = vsel %vm2118_vm1, %v1606_v53, -inf }
 0x2bc   :  { %v3465_v10 = vmax.f32 %v3463_v54, %v3464_v59  ;;  %v3472_v35 = vmax.f32 %v3470_v58, %v3471_v21  ;;  %v3485_v11 = vrot.slane %v3484_v49, 4  ;;  %v697_v36 = vmax.f32 %v9177_v30, 0.0  ;;  %v8070_v30 = vld [vmem:[%s10114_s3 + $0x8] sm:$0xff]  }
 0x2bd   :  { %v9211_v57 = vmax.f32 %v3544_v34, %v3545_v38  ;;  %v3479_v15 = vmax.f32 %v3477_v1, %v3478_v32  ;;  %v4951_v13 = vpack.c.bf16 %v4939_v5, %v4938_v27  ;;  %v587_v7 = vadd.f32 %v9216_v6, %v8995_v39  ;;  %7636 = vmatprep.subr.bf16.mxu0 %v8070_v30  ;;  %v8072_v34 = vld [vmem:[%s10114_s3 + $0x10] sm:$0xff]  }
 0x2be   :  { %v3466_v14 = vrot.slane %v3465_v10, 2  ;;  %v3473_v44 = vrot.slane %v3472_v35, 2  ;;  %v3486_v20 = vmax.f32 %v3484_v49, %v3485_v11  ;;  %v1641_v61 = vcombine.high %v697_v36, %v697_v36  ;;  %7637 = vmatpush3.bf16.msra.mxu0 %v8070_v30  ;;  %v8071_v30 = vld [vmem:[%s10114_s3 + $0x100] sm:$0xff]  }
 0x2bf   :  { %v3480_v62 = vrot.slane %v3479_v15, 2  ;;  %v1648_v9 = vrot.slane %v697_v36, %v8304_v43  ;;  %7719 = vmatmul.mubr.bf16.gmra.mrb[4].mxu1 %v4951_v13  ;;  %v695_v3 = vmax.f32 %v587_v7, 0.0  ;;  %v9226_v2 = vadd.f32 %v9216_v6, %v9007_v51  ;;  %7638 = vmatprep.subr.bf16.mxu0 %v8072_v34 }
 0x2c0   :  { %v3467_v31 = vmax.f32 %v3465_v10, %v3466_v14  ;;  %v3474_v23 = vmax.f32 %v3472_v35, %v3473_v44  ;;  %v3487_v39 = vrot.slane %v3486_v20, 2  ;;  %v1655_v55 = vrot.slane %v1641_v61, %v8304_v43  ;;  %7730 = vmatprep.subr.bf16.mxu1 %v8071_v30 }
 0x2c1   :  { %v3481_v26 = vmax.f32 %v3479_v15, %v3480_v62  ;;  %v1656_v8 = vcombine.high %v1648_v9, %v1648_v9  ;;  %v3547_v18 = vsel %vm2118_vm1, %v1648_v9, -inf  ;;  %v1607_v24 = vcombine.high %v695_v3, %v695_v3  ;;  %7731 = vmatpush3.bf16.msra.mxu1 %v8071_v30 }
 0x2c2   :  { %v3468_v42 = vrot.slane %v3467_v31, 1  ;;  %v3475_v33 = vrot.slane %v3474_v23, 1  ;;  %v3488_v47 = vmax.f32 %v3486_v20, %v3487_v39  ;;  %v1657_v45 = vcombine.high %v1655_v55, %v1655_v55  ;;  %7639 = vmatpush3.bf16.msra.mxu0 %v8072_v34 }
 0x2c3   :  { %v3482_v46 = vrot.slane %v3481_v26, 1  ;;  %v3548_v29 = vrot.slane %v3547_v18, 4  ;;  %v3554_v51 = vsel %vm2118_vm1, %v1656_v8, -inf  ;;  %v3561_v37 = vsel %vm2118_vm1, %v1655_v55, -inf  ;;  %v8076_v8 = vld [vmem:[%s10114_s3 + $0x20] sm:$0xff]  }
 0x2c4   :  { %v3469_v16 = vmax.f32 %v3467_v31, %v3468_v42  ;;  %v3476_v48 = vmax.f32 %v3474_v23, %v3475_v33  ;;  %v3489_v53 = vrot.slane %v3488_v47, 1  ;;  %v3555_v17 = vrot.slane %v3554_v51, 4 }
 0x2c5   :  { %v3483_v54 = vmax.f32 %v3481_v26, %v3482_v46  ;;  %v3549_v58 = vmax.f32 %v3547_v18, %v3548_v29  ;;  %v3562_v59 = vrot.slane %v3561_v37, 4  ;;  %v3568_v21 = vsel %vm2118_vm1, %v1657_v45, -inf }
 0x2c6   :  { %v3490_v1 = vmax.f32 %v3488_v47, %v3489_v53  ;;  %v4007_v5 = vmax.f32 %v3469_v16, %v9200_v25  ;;  %v4008_v38 = vmax.f32 %v3476_v48, %v9204_v41  ;;  %v3556_v32 = vmax.f32 %v3554_v51, %v3555_v17  ;;  %v8074_v25 = vld [vmem:[%s10114_s3 + $0x18] sm:$0xff]  }
 0x2c7   :  { %v4009_v49 = vmax.f32 %v3483_v54, %v9207_v40  ;;  %v3550_v10 = vrot.slane %v3549_v58, 2  ;;  %v3563_v35 = vmax.f32 %v3561_v37, %v3562_v59  ;;  %v3569_v11 = vrot.slane %v3568_v21, 4  ;;  %7640 = vmatprep.subr.bf16.mxu0 %v8074_v25  ;;  %v8078_v59 = vld [vmem:[%s10114_s3 + $0x28] sm:$0xff]  }
 0x2c8   :  { %v4010_v36 = vmax.f32 %v3490_v1, %v9211_v57  ;;  %v4298_v27 = vsel %vm4207_vm2, %v4008_v38, %v4007_v5  ;;  %v3557_v15 = vrot.slane %v3556_v32, 2  ;;  %v1614_v13 = vrot.slane %v695_v3, %v8304_v43  ;;  %7641 = vmatpush3.bf16.msra.mxu0 %v8074_v25 }
 0x2c9   :  { %v4299_v41 = vsel %vm4209_vm3, %v4009_v49, %v4298_v27  ;;  %v3551_v7 = vmax.f32 %v3549_v58, %v3550_v10  ;;  %v3564_v14 = vrot.slane %v3563_v35, 2  ;;  %v3570_v40 = vmax.f32 %v3568_v21, %v3569_v11  ;;  %7642 = vmatprep.subr.bf16.mxu0 %v8076_v8  ;;  %v8073_v58 = vld [vmem:[%s10114_s3 + $0x108] sm:$0xff]  }
 0x2ca   :  { %v3558_v44 = vmax.f32 %v3556_v32, %v3557_v15  ;;  %v1621_v20 = vrot.slane %v1607_v24, %v8304_v43  ;;  %v1622_v61 = vcombine.high %v1614_v13, %v1614_v13  ;;  %v3491_v57 = vsel %vm2118_vm1, %v1614_v13, -inf  ;;  %7732 = vmatprep.subr.bf16.mxu1 %v8073_v58 }
 0x2cb   :  { %v3552_v62 = vrot.slane %v3551_v7, 1  ;;  %v3565_v9 = vmax.f32 %v3563_v35, %v3564_v14  ;;  %v3571_v3 = vrot.slane %v3570_v40, 2  ;;  %v3492_v31 = vrot.slane %v3491_v57, 4  ;;  %7733 = vmatpush3.bf16.msra.mxu1 %v8073_v58 }
 0x2cc   :  { %v3559_v23 = vrot.slane %v3558_v44, 1  ;;  %v1623_v39 = vcombine.high %v1621_v20, %v1621_v20  ;;  %v3498_v55 = vsel %vm2118_vm1, %v1622_v61, -inf  ;;  %v3505_v26 = vsel %vm2118_vm1, %v1621_v20, -inf  ;;  %7643 = vmatpush3.bf16.msra.mxu0 %v8076_v8  ;;  %v8077_v20 = vld [vmem:[%s10114_s3 + $0x118] sm:$0xff]  }
 0x2cd   :  { %v9256_v18 = vmax.f32 %v3551_v7, %v3552_v62  ;;  %v3566_v24 = vrot.slane %v3565_v9, 1  ;;  %v3572_v42 = vmax.f32 %v3570_v40, %v3571_v3  ;;  %v3493_v33 = vmax.f32 %v3491_v57, %v3492_v31  ;;  %7644 = vmatprep.subr.bf16.mxu0 %v8078_v59  ;;  %v8080_v7 = vld [vmem:[%s10114_s3 + $0x30] sm:$0xff]  }
 0x2ce   :  { %v9258_v47 = vmax.f32 %v3558_v44, %v3559_v23  ;;  %v3499_v45 = vrot.slane %v3498_v55, 4  ;;  %v3506_v46 = vrot.slane %v3505_v26, 4  ;;  %v3512_v29 = vsel %vm2118_vm1, %v1623_v39, -inf }
 0x2cf   :  { %v9261_v51 = vmax.f32 %v3565_v9, %v3566_v24  ;;  %v3573_v37 = vrot.slane %v3572_v42, 1  ;;  %v3494_v16 = vrot.slane %v3493_v33, 2  ;;  %v3513_v48 = vrot.slane %v3512_v29, 4  ;;  %v8082_v9 = vld [vmem:[%s10114_s3 + $0x38] sm:$0xff]  }
 0x2d0   :  { %v3500_v53 = vmax.f32 %v3498_v55, %v3499_v45  ;;  %v3507_v17 = vmax.f32 %v3505_v26, %v3506_v46  ;;  %v4300_v34 = vsel %vm4211_vm4, %v4010_v36, %v4299_v41  ;;  %v700_v54 = vmax.f32 %v9226_v2, 0.0  ;;  %7645 = vmatpush3.bf16.msra.mxu0 %v8078_v59  ;;  %v8075_v41 = vld [vmem:[%s10114_s3 + $0x110] sm:$0xff]  }
 0x2d1   :  { %v9271_v21 = vmax.f32 %v3572_v42, %v3573_v37  ;;  %v3495_v1 = vmax.f32 %v3493_v33, %v3494_v16  ;;  %v3514_v5 = vmax.f32 %v3512_v29, %v3513_v48  ;;  %v600_v38 = vadd.f32 %v9216_v6, %v9017_v60  ;;  %7734 = vmatprep.subr.bf16.mxu1 %v8075_v41  ;;  %v8079_v42 = vld [vmem:[%s10114_s3 + $0x120] sm:$0xff]  }
 0x2d2   :  { %v3501_v32 = vrot.slane %v3500_v53, 2  ;;  %v3508_v49 = vrot.slane %v3507_v17, 2  ;;  %v1692_v10 = vcombine.high %v700_v54, %v700_v54  ;;  %v1699_v2 = vrot.slane %v700_v54, %v8304_v43  ;;  %7646 = vmatprep.subr.bf16.mxu0 %v8080_v7  ;;  %7735 = vmatpush3.bf16.msra.mxu1 %v8075_v41 }
 0x2d3   :  { %v3496_v35 = vrot.slane %v3495_v1, 1  ;;  %v3515_v11 = vrot.slane %v3514_v5, 2  ;;  %v698_v36 = vmax.f32 %v600_v38, 0.0  ;;  %v9278_v27 = vadd.f32 %v9216_v6, %v9037_v56  ;;  %7736 = vmatprep.subr.bf16.mxu1 %v8077_v20 }
 0x2d4   :  { %v3502_v15 = vmax.f32 %v3500_v53, %v3501_v32  ;;  %v3509_v13 = vmax.f32 %v3507_v17, %v3508_v49  ;;  %v1706_v60 = vrot.slane %v1692_v10, %v8304_v43  ;;  %v1707_v25 = vcombine.high %v1699_v2, %v1699_v2  ;;  %7647 = vmatpush3.bf16.msra.mxu0 %v8080_v7 }
 0x2d5   :  { %v3497_v14 = vmax.f32 %v3495_v1, %v3496_v35  ;;  %v3516_v40 = vmax.f32 %v3514_v5, %v3515_v11  ;;  %v3631_v56 = vsel %vm2118_vm1, %v1699_v2, -inf  ;;  %v1658_v44 = vcombine.high %v698_v36, %v698_v36  ;;  %7648 = vmatprep.subr.bf16.mxu0 %v8082_v9 }
 0x2d6   :  { %v3503_v61 = vrot.slane %v3502_v15, 1  ;;  %v3510_v57 = vrot.slane %v3509_v13, 1  ;;  %v1708_v30 = vcombine.high %v1706_v60, %v1706_v60  ;;  %v3632_v62 = vrot.slane %v3631_v56, 4  ;;  %7737 = vmatpush3.bf16.msra.mxu1 %v8077_v20 }
 0x2d7   :  { %v3517_v3 = vrot.slane %v3516_v40, 1  ;;  %v4011_v31 = vmax.f32 %v3497_v14, %v9256_v18  ;;  %v3638_v23 = vsel %vm2118_vm1, %v1707_v25, -inf  ;;  %v3645_v39 = vsel %vm2118_vm1, %v1706_v60, -inf  ;;  %v9303_v18 = vld [vmem:[%s10114_s3 + $0x80] sm:$0xff]   ;;  %7738 = vmatprep.subr.bf16.mxu1 %v8079_v42 }
 0x2d8   :  { %v3504_v55 = vmax.f32 %v3502_v15, %v3503_v61  ;;  %v3511_v26 = vmax.f32 %v3509_v13, %v3510_v57  ;;  %v3633_v8 = vmax.f32 %v3631_v56, %v3632_v62  ;;  %v3639_v24 = vrot.slane %v3638_v23, 4  ;;  %7649 = vmatpush3.bf16.msra.mxu0 %v8082_v9  ;;  %v4407_v57 = vld [vmem:[#allocation2 + $0xa1] sm:$0xff] }
 0x2d9   :  { %v3518_v33 = vmax.f32 %v3516_v40, %v3517_v3  ;;  %v4301_v45 = vsel %vm4213_vm5, %v4011_v31, %v4300_v34  ;;  %v3646_v46 = vrot.slane %v3645_v39, 4  ;;  %v3652_v29 = vsel %vm2118_vm1, %v1708_v30, -inf  ;;  %7666 = vmatprep.subr.bf16.mxu0 %v9303_v18  ;;  %v8083_v40 = vld [vmem:[%s10114_s3 + $0x130] sm:$0xff]  }
 0x2da   :  { %v4012_v37 = vmax.f32 %v3504_v55, %v9258_v47  ;;  %v4013_v16 = vmax.f32 %v3511_v26, %v9261_v51  ;;  %v3634_v48 = vrot.slane %v3633_v8, 2  ;;  %v3640_v53 = vmax.f32 %v3638_v23, %v3639_v24  ;;  %v8081_v47 = vld [vmem:[%s10114_s3 + $0x128] sm:$0xff]   ;;  %7739 = vmatpush3.bf16.msra.mxu1 %v8079_v42  ;;  %v4408_v30 = vld [vmem:[#allocation2 + $0xb1] sm:$0xff] }
 0x2db   :  { %v4014_v17 = vmax.f32 %v3518_v33, %v9271_v21  ;;  %v3647_v54 = vmax.f32 %v3645_v39, %v3646_v46  ;;  %v3653_v58 = vrot.slane %v3652_v29, 4  ;;  %v1665_v59 = vrot.slane %v698_v36, %v8304_v43  ;;  %7740 = vmatprep.subr.bf16.mxu1 %v8081_v47 }
 0x2dc   :  { %v4302_v1 = vsel %vm4215_vm6, %v4012_v37, %v4301_v45  ;;  %v3635_v34 = vmax.f32 %v3633_v8, %v3634_v48  ;;  %v3641_v5 = vrot.slane %v3640_v53, 2  ;;  %v1672_v38 = vrot.slane %v1658_v44, %v8304_v43  ;;  %v8085_v45 = vld [vmem:[%s10114_s3 + $0x138] sm:$0xff]  }
 0x2dd   :  { %v4303_v51 = vsel %vm4217_vm7, %v4013_v16, %v4302_v1  ;;  %v3648_v21 = vrot.slane %v3647_v54, 2  ;;  %v3654_v32 = vmax.f32 %v3652_v29, %v3653_v58  ;;  %v1673_v49 = vcombine.high %v1665_v59, %v1665_v59 }
 0x2de   :  { %v9319_v10 = vsel %vm4219_vm8, %v4014_v17, %v4303_v51  ;;  %v3636_v2 = vrot.slane %v3635_v34, 1  ;;  %v3642_v35 = vmax.f32 %v3640_v53, %v3641_v5  ;;  %v1674_v11 = vcombine.high %v1672_v38, %v1672_v38  ;;  %7741 = vmatpush3.bf16.msra.mxu1 %v8081_v47  ;;  %v9345_v51 = vld [vmem:[%s10114_s3 + $0x140] sm:$0xff]  }
 0x2df   :  { %4355 = vst [vmem:[#allocation2 + $0xf1] sm:$0xff] %v9319_v10  ;;  %v3649_v36 = vmax.f32 %v3647_v54, %v3648_v21  ;;  %v3655_v15 = vrot.slane %v3654_v32, 2  ;;  %v3575_v13 = vsel %vm2118_vm1, %v1665_v59, -inf  ;;  %v3582_v60 = vsel %vm2118_vm1, %v1673_v49, -inf  ;;  %7742 = vmatprep.subr.bf16.mxu1 %v8083_v40 }
 0x2e0   :  { %v9324_v25 = vmax.f32 %v3635_v34, %v3636_v2  ;;  %v3643_v41 = vrot.slane %v3642_v35, 1  ;;  %v3576_v7 = vrot.slane %v3575_v13, 4  ;;  %v3583_v14 = vrot.slane %v3582_v60, 4 }
 0x2e1   :  { %v3650_v56 = vrot.slane %v3649_v36, 1  ;;  %v3656_v44 = vmax.f32 %v3654_v32, %v3655_v15  ;;  %v3589_v20 = vsel %vm2118_vm1, %v1672_v38, -inf  ;;  %v3596_v61 = vsel %vm2118_vm1, %v1674_v11, -inf }
 0x2e2   :  { %v3644_v62 = vmax.f32 %v3642_v35, %v3643_v41  ;;  %v3577_v9 = vmax.f32 %v3575_v13, %v3576_v7  ;;  %v3584_v3 = vmax.f32 %v3582_v60, %v3583_v14  ;;  %v3590_v31 = vrot.slane %v3589_v20, 4  ;;  %7743 = vmatpush3.bf16.msra.mxu1 %v8083_v40 }
 0x2e3   :  { %v9331_v23 = vmax.f32 %v3649_v36, %v3650_v56  ;;  %v3657_v39 = vrot.slane %v3656_v44, 1  ;;  %v3597_v55 = vrot.slane %v3596_v61, 4  ;;  %v701_v26 = vmax.f32 %v9278_v27, 0.0  ;;  %7744 = vmatprep.subr.bf16.mxu1 %v8085_v45 }
 0x2e4   :  { %v3578_v8 = vrot.slane %v3577_v9, 2  ;;  %v3585_v24 = vrot.slane %v3584_v3, 2  ;;  %v3591_v42 = vmax.f32 %v3589_v20, %v3590_v31  ;;  %v4419_v33 = vpack.c.bf16 %v4408_v30, %v4407_v57 }
 0x2e5   :  { %v3658_v46 = vmax.f32 %v3656_v44, %v3657_v39  ;;  %v3598_v29 = vmax.f32 %v3596_v61, %v3597_v55  ;;  %v1709_v37 = vcombine.high %v701_v26, %v701_v26  ;;  %v1716_v16 = vrot.slane %v701_v26, %v8304_v43 }
 0x2e6   :  { %v3579_v48 = vmax.f32 %v3577_v9, %v3578_v8  ;;  %v3586_v53 = vmax.f32 %v3584_v3, %v3585_v24  ;;  %v3592_v17 = vrot.slane %v3591_v42, 2  ;;  %7626 = vmatprep.mubr.bf16.mxu0 %v4419_v33  ;;  %v603_v27 = vadd.f32 %v9216_v6, %v9061_v52  ;;  %7745 = vmatpush3.bf16.msra.mxu1 %v8085_v45 }
 0x2e7   :  { %v3599_v54 = vrot.slane %v3598_v29, 2  ;;  %v1723_v58 = vrot.slane %v1709_v37, %v8304_v43  ;;  %v1724_v59 = vcombine.high %v1716_v16, %v1716_v16  ;;  %v3659_v1 = vsel %vm2118_vm1, %v1716_v16, -inf  ;;  %7762 = vmatprep.subr.bf16.mxu1 %v9345_v51 }
 0x2e8   :  { %v3580_v34 = vrot.slane %v3579_v48, 1  ;;  %v3587_v5 = vrot.slane %v3586_v53, 1  ;;  %v3593_v38 = vmax.f32 %v3591_v42, %v3592_v17  ;;  %v3660_v47 = vrot.slane %v3659_v1, 4 }
 0x2e9   :  { %v3600_v21 = vmax.f32 %v3598_v29, %v3599_v54  ;;  %v1725_v32 = vcombine.high %v1723_v58, %v1723_v58  ;;  %v3666_v52 = vsel %vm2118_vm1, %v1724_v59, -inf  ;;  %v3673_v49 = vsel %vm2118_vm1, %v1723_v58, -inf }
 0x2ea   :  { %v3581_v2 = vmax.f32 %v3579_v48, %v3580_v34  ;;  %v3588_v35 = vmax.f32 %v3586_v53, %v3587_v5  ;;  %v3594_v11 = vrot.slane %v3593_v38, 1  ;;  %v3661_v36 = vmax.f32 %v3659_v1, %v3660_v47 }
 0x2eb   :  { %v3601_v15 = vrot.slane %v3600_v21, 1  ;;  %v3667_v13 = vrot.slane %v3666_v52, 4  ;;  %v3674_v60 = vrot.slane %v3673_v49, 4  ;;  %v3680_v41 = vsel %vm2118_vm1, %v1725_v32, -inf }
 0x2ec   :  { %v3595_v7 = vmax.f32 %v3593_v38, %v3594_v11  ;;  %v4015_v14 = vmax.f32 %v3581_v2, %v9324_v25  ;;  %v4016_v40 = vmax.f32 %v3588_v35, %v3644_v62  ;;  %v3662_v56 = vrot.slane %v3661_v36, 2 }
 0x2ed   :  { %v3602_v44 = vmax.f32 %v3600_v21, %v3601_v15  ;;  %v3668_v20 = vmax.f32 %v3666_v52, %v3667_v13  ;;  %v3675_v61 = vmax.f32 %v3673_v49, %v3674_v60  ;;  %v3681_v57 = vrot.slane %v3680_v41, 4 }
 0x2ee   :  { %v4017_v30 = vmax.f32 %v3595_v7, %v9331_v23  ;;  %v4305_v9 = vsel %vm4207_vm2, %v4016_v40, %v4015_v14  ;;  %v3663_v3 = vmax.f32 %v3661_v36, %v3662_v56  ;;  %v699_v31 = vmax.f32 %v603_v27, 0.0 }
 0x2ef   :  { %v4018_v39 = vmax.f32 %v3602_v44, %v3658_v46  ;;  %v3669_v55 = vrot.slane %v3668_v20, 2  ;;  %v3676_v26 = vrot.slane %v3675_v61, 2  ;;  %v3682_v8 = vmax.f32 %v3680_v41, %v3681_v57 }
 0x2f0   :  { %v4306_v25 = vsel %vm4209_vm3, %v4017_v30, %v4305_v9  ;;  %v3664_v62 = vrot.slane %v3663_v3, 1  ;;  %v1675_v24 = vcombine.high %v699_v31, %v699_v31  ;;  %v1682_v42 = vrot.slane %v699_v31, %v8304_v43 }
 0x2f1   :  { %v3670_v33 = vmax.f32 %v3668_v20, %v3669_v55  ;;  %v3677_v45 = vmax.f32 %v3675_v61, %v3676_v26  ;;  %v3683_v29 = vrot.slane %v3682_v8, 2  ;;  %v9357_v37 = vsel %vm4211_vm4, %v4018_v39, %v4306_v25 }
 0x2f2   :  { %v9359_v23 = vmax.f32 %v3663_v3, %v3664_v62  ;;  %v1689_v16 = vrot.slane %v1675_v24, %v8304_v43  ;;  %v1690_v46 = vcombine.high %v1682_v42, %v1682_v42  ;;  %v3603_v48 = vsel %vm2118_vm1, %v1682_v42, -inf }
 0x2f3   :  { %v3671_v53 = vrot.slane %v3670_v33, 1  ;;  %v3678_v17 = vrot.slane %v3677_v45, 1  ;;  %v3684_v27 = vmax.f32 %v3682_v8, %v3683_v29  ;;  %v3604_v54 = vrot.slane %v3603_v48, 4 }
 0x2f4   :  { %v1691_v58 = vcombine.high %v1689_v16, %v1689_v16  ;;  %v3610_v59 = vsel %vm2118_vm1, %v1690_v46, -inf  ;;  %v3617_v1 = vsel %vm2118_vm1, %v1689_v16, -inf  ;;  %v624_v34 = vadd.f32 %v9216_v6, %v9085_v19 }
 0x2f5   :  { %v3672_v5 = vmax.f32 %v3670_v33, %v3671_v53  ;;  %v9367_v38 = vmax.f32 %v3677_v45, %v3678_v17  ;;  %v3685_v47 = vrot.slane %v3684_v27, 1  ;;  %v3605_v21 = vmax.f32 %v3603_v48, %v3604_v54 }
 0x2f6   :  { %v3611_v32 = vrot.slane %v3610_v59, 4  ;;  %v3618_v52 = vrot.slane %v3617_v1, 4  ;;  %v3624_v49 = vsel %vm2118_vm1, %v1691_v58, -inf  ;;  %v704_v2 = vmax.f32 %v624_v34, 0.0 }
 0x2f7   :  { %v3686_v35 = vmax.f32 %v3684_v27, %v3685_v47  ;;  %v3606_v11 = vrot.slane %v3605_v21, 2  ;;  %v3625_v36 = vrot.slane %v3624_v49, 4  ;;  %v616_v15 = vadd.f32 %v9216_v6, %v9091_v22 }
 0x2f8   :  { %v3612_v13 = vmax.f32 %v3610_v59, %v3611_v32  ;;  %v3619_v60 = vmax.f32 %v3617_v1, %v3618_v52  ;;  %v1760_v41 = vcombine.high %v704_v2, %v704_v2  ;;  %v1767_v19 = vrot.slane %v704_v2, %v8304_v43 }
 0x2f9   :  { %v3607_v7 = vmax.f32 %v3605_v21, %v3606_v11  ;;  %v3626_v14 = vmax.f32 %v3624_v49, %v3625_v36  ;;  %v702_v40 = vmax.f32 %v616_v15, 0.0  ;;  %v9375_v56 = vadd.f32 %v9216_v6, %v9105_v50 }
 0x2fa   :  { %v3613_v44 = vrot.slane %v3612_v13, 2  ;;  %v3620_v20 = vrot.slane %v3619_v60, 2  ;;  %v1774_v61 = vrot.slane %v1760_v41, %v8304_v43  ;;  %v1775_v57 = vcombine.high %v1767_v19, %v1767_v19 }
 0x2fb   :  { %v3608_v30 = vrot.slane %v3607_v7, 1  ;;  %v3627_v9 = vrot.slane %v3626_v14, 2  ;;  %v3743_v22 = vsel %vm2118_vm1, %v1767_v19, -inf  ;;  %v1726_v3 = vcombine.high %v702_v40, %v702_v40 }
 0x2fc   :  { %v3614_v31 = vmax.f32 %v3612_v13, %v3613_v44  ;;  %v3621_v39 = vmax.f32 %v3619_v60, %v3620_v20  ;;  %v1776_v55 = vcombine.high %v1774_v61, %v1774_v61  ;;  %v3744_v26 = vrot.slane %v3743_v22, 4 }
 0x2fd   :  { %v3609_v8 = vmax.f32 %v3607_v7, %v3608_v30  ;;  %v3628_v25 = vmax.f32 %v3626_v14, %v3627_v9  ;;  %v3750_v62 = vsel %vm2118_vm1, %v1775_v57, -inf  ;;  %v3757_v50 = vsel %vm2118_vm1, %v1774_v61, -inf }
 0x2fe   :  { %v3615_v24 = vrot.slane %v3614_v31, 1  ;;  %v3622_v42 = vrot.slane %v3621_v39, 1  ;;  %v3745_v33 = vmax.f32 %v3743_v22, %v3744_v26  ;;  %v3751_v45 = vrot.slane %v3750_v62, 4 }
 0x2ff   :  { %v3629_v29 = vrot.slane %v3628_v25, 1  ;;  %v4019_v16 = vmax.f32 %v3609_v8, %v9359_v23  ;;  %v3758_v46 = vrot.slane %v3757_v50, 4  ;;  %v3764_v48 = vsel %vm2118_vm1, %v1776_v55, -inf }
 0x300   :  { %v3616_v53 = vmax.f32 %v3614_v31, %v3615_v24  ;;  %v3623_v17 = vmax.f32 %v3621_v39, %v3622_v42  ;;  %v3746_v27 = vrot.slane %v3745_v33, 2  ;;  %v3752_v54 = vmax.f32 %v3750_v62, %v3751_v45  ;;  %v9403_v24 = vld [vmem:[#allocation2 + $0xb0] sm:$0xff] }
 0x301   :  { %v3630_v58 = vmax.f32 %v3628_v25, %v3629_v29  ;;  %v4308_v59 = vsel %vm4213_vm5, %v4019_v16, %v9357_v37  ;;  %v3759_v1 = vmax.f32 %v3757_v50, %v3758_v46  ;;  %v3765_v34 = vrot.slane %v3764_v48, 4 }
 0x302   :  { %v4020_v47 = vmax.f32 %v3616_v53, %v3672_v5  ;;  %v4021_v21 = vmax.f32 %v3623_v17, %v9367_v38  ;;  %v3747_v32 = vmax.f32 %v3745_v33, %v3746_v27  ;;  %v3753_v52 = vrot.slane %v3752_v54, 2 }
 0x303   :  { %v4022_v49 = vmax.f32 %v3630_v58, %v3686_v35  ;;  %v3760_v23 = vrot.slane %v3759_v1, 2  ;;  %v3766_v2 = vmax.f32 %v3764_v48, %v3765_v34  ;;  %v1733_v11 = vrot.slane %v702_v40, %v8304_v43 }
 0x304   :  { %v4309_v36 = vsel %vm4215_vm6, %v4020_v47, %v4308_v59  ;;  %v3748_v15 = vrot.slane %v3747_v32, 1  ;;  %v3754_v13 = vmax.f32 %v3752_v54, %v3753_v52  ;;  %v1740_v60 = vrot.slane %v1726_v3, %v8304_v43  ;;  %v9399_v3 = vld [vmem:[#allocation2 + $0xc0] sm:$0xff] }
 0x305   :  { %v4310_v37 = vsel %vm4217_vm7, %v4021_v21, %v4309_v36  ;;  %v3761_v41 = vmax.f32 %v3759_v1, %v3760_v23  ;;  %v3767_v19 = vrot.slane %v3766_v2, 2  ;;  %v1741_v5 = vcombine.high %v1733_v11, %v1733_v11 }
 0x306   :  { %v9391_v38 = vsel %vm4219_vm8, %v4022_v49, %v4310_v37  ;;  %v9393_v7 = vmax.f32 %v3747_v32, %v3748_v15  ;;  %v3755_v35 = vrot.slane %v3754_v13, 1  ;;  %v1742_v14 = vcombine.high %v1740_v60, %v1740_v60 }
 0x307   :  { %4356 = vst [vmem:[#allocation2 + $0x101] sm:$0xff] %v9391_v38  ;;  %v3762_v40 = vrot.slane %v3761_v41, 1  ;;  %v3768_v44 = vmax.f32 %v3766_v2, %v3767_v19  ;;  %v3687_v20 = vsel %vm2118_vm1, %v1733_v11, -inf  ;;  %v3694_v61 = vsel %vm2118_vm1, %v1741_v5, -inf }
 0x308   :  { %v3756_v57 = vmax.f32 %v3754_v13, %v3755_v35  ;;  %v3688_v30 = vrot.slane %v3687_v20, 4  ;;  %v3695_v9 = vrot.slane %v3694_v61, 4  ;;  %v3701_v22 = vsel %vm2118_vm1, %v1740_v60, -inf }
 0x309   :  { %v3763_v31 = vmax.f32 %v3761_v41, %v3762_v40  ;;  %v3769_v39 = vrot.slane %v3768_v44, 1  ;;  %v3702_v55 = vrot.slane %v3701_v22, 4  ;;  %v3708_v26 = vsel %vm2118_vm1, %v1742_v14, -inf }
 0x30a   :  { %v3689_v8 = vmax.f32 %v3687_v20, %v3688_v30  ;;  %v3696_v25 = vmax.f32 %v3694_v61, %v3695_v9  ;;  %v3709_v62 = vrot.slane %v3708_v26, 4  ;;  %v705_v50 = vmax.f32 %v9375_v56, 0.0 }
 0x30b   :  { %v9405_v42 = vmax.f32 %v3768_v44, %v3769_v39  ;;  %v3703_v33 = vmax.f32 %v3701_v22, %v3702_v55  ;;  %v4952_v45 = vpack.c.bf16 %v9399_v3, %v9403_v24  ;;  %v619_v29 = vadd.f32 %v9216_v6, %v9125_v63 }
 0x30c   :  { %v3690_v16 = vrot.slane %v3689_v8, 2  ;;  %v3697_v46 = vrot.slane %v3696_v25, 2  ;;  %v3710_v48 = vmax.f32 %v3708_v26, %v3709_v62  ;;  %v1777_v53 = vcombine.high %v705_v50, %v705_v50 }
 0x30d   :  { %v3704_v17 = vrot.slane %v3703_v33, 2  ;;  %v1784_v27 = vrot.slane %v705_v50, %v8304_v43  ;;  %7722 = vmatprep.mubr.bf16.mxu1 %v4952_v45  ;;  %v703_v56 = vmax.f32 %v619_v29, 0.0  ;;  %v9414_v54 = vadd.f32 %v9216_v6, %v9137_v28 }
 0x30e   :  { %v3691_v58 = vmax.f32 %v3689_v8, %v3690_v16  ;;  %v3698_v59 = vmax.f32 %v3696_v25, %v3697_v46  ;;  %v3711_v1 = vrot.slane %v3710_v48, 2  ;;  %v1791_v34 = vrot.slane %v1777_v53, %v8304_v43 }
 0x30f   :  { %v3705_v47 = vmax.f32 %v3703_v33, %v3704_v17  ;;  %v1792_v63 = vcombine.high %v1784_v27, %v1784_v27  ;;  %v3771_v21 = vsel %vm2118_vm1, %v1784_v27, -inf  ;;  %v1743_v32 = vcombine.high %v703_v56, %v703_v56 }
 0x310   :  { %v3692_v52 = vrot.slane %v3691_v58, 1  ;;  %v3699_v49 = vrot.slane %v3698_v59, 1  ;;  %v3712_v23 = vmax.f32 %v3710_v48, %v3711_v1  ;;  %v1793_v2 = vcombine.high %v1791_v34, %v1791_v34 }
 0x311   :  { %v3706_v11 = vrot.slane %v3705_v47, 1  ;;  %v3772_v36 = vrot.slane %v3771_v21, 4  ;;  %v3778_v15 = vsel %vm2118_vm1, %v1792_v63, -inf  ;;  %v3785_v28 = vsel %vm2118_vm1, %v1791_v34, -inf }
 0x312   :  { %v3693_v13 = vmax.f32 %v3691_v58, %v3692_v52  ;;  %v3700_v60 = vmax.f32 %v3698_v59, %v3699_v49  ;;  %v3713_v37 = vrot.slane %v3712_v23, 1  ;;  %v3779_v41 = vrot.slane %v3778_v15, 4 }
 0x313   :  { %v3707_v19 = vmax.f32 %v3705_v47, %v3706_v11  ;;  %v3773_v5 = vmax.f32 %v3771_v21, %v3772_v36  ;;  %v3786_v35 = vrot.slane %v3785_v28, 4  ;;  %v3792_v14 = vsel %vm2118_vm1, %v1793_v2, -inf }
 0x314   :  { %v3714_v40 = vmax.f32 %v3712_v23, %v3713_v37  ;;  %v4023_v44 = vmax.f32 %v3693_v13, %v9393_v7  ;;  %v4024_v20 = vmax.f32 %v3700_v60, %v3756_v57  ;;  %v3780_v61 = vmax.f32 %v3778_v15, %v3779_v41 }
 0x315   :  { %v4025_v30 = vmax.f32 %v3707_v19, %v3763_v31  ;;  %v3774_v9 = vrot.slane %v3773_v5, 2  ;;  %v3787_v22 = vmax.f32 %v3785_v28, %v3786_v35  ;;  %v3793_v39 = vrot.slane %v3792_v14, 4 }
 0x316   :  { %v4026_v55 = vmax.f32 %v3714_v40, %v9405_v42  ;;  %v4312_v26 = vsel %vm4207_vm2, %v4024_v20, %v4023_v44  ;;  %v3781_v8 = vrot.slane %v3780_v61, 2  ;;  %v1750_v25 = vrot.slane %v703_v56, %v8304_v43 }
 0x317   :  { %v4313_v62 = vsel %vm4209_vm3, %v4025_v30, %v4312_v26  ;;  %v3775_v50 = vmax.f32 %v3773_v5, %v3774_v9  ;;  %v3788_v33 = vrot.slane %v3787_v22, 2  ;;  %v3794_v45 = vmax.f32 %v3792_v14, %v3793_v39 }
 0x318   :  { %v3782_v29 = vmax.f32 %v3780_v61, %v3781_v8  ;;  %v1757_v7 = vrot.slane %v1743_v32, %v8304_v43  ;;  %v1758_v57 = vcombine.high %v1750_v25, %v1750_v25  ;;  %v3715_v31 = vsel %vm2118_vm1, %v1750_v25, -inf }
 0x319   :  { %v3776_v16 = vrot.slane %v3775_v50, 1  ;;  %v3789_v46 = vmax.f32 %v3787_v22, %v3788_v33  ;;  %v3795_v48 = vrot.slane %v3794_v45, 2  ;;  %v3716_v42 = vrot.slane %v3715_v31, 4 }
 0x31a   :  { %v3783_v53 = vrot.slane %v3782_v29, 1  ;;  %v1759_v17 = vcombine.high %v1757_v7, %v1757_v7  ;;  %v3722_v27 = vsel %vm2118_vm1, %v1758_v57, -inf  ;;  %v3729_v56 = vsel %vm2118_vm1, %v1757_v7, -inf }
 0x31b   :  { %v3777_v58 = vmax.f32 %v3775_v50, %v3776_v16  ;;  %v3790_v59 = vrot.slane %v3789_v46, 1  ;;  %v3796_v1 = vmax.f32 %v3794_v45, %v3795_v48  ;;  %v3717_v34 = vmax.f32 %v3715_v31, %v3716_v42 }
 0x31c   :  { %v3784_v47 = vmax.f32 %v3782_v29, %v3783_v53  ;;  %v3723_v63 = vrot.slane %v3722_v27, 4  ;;  %v3730_v21 = vrot.slane %v3729_v56, 4  ;;  %v3736_v32 = vsel %vm2118_vm1, %v1759_v17, -inf }
 0x31d   :  { %v3791_v52 = vmax.f32 %v3789_v46, %v3790_v59  ;;  %v3797_v49 = vrot.slane %v3796_v1, 1  ;;  %v3718_v23 = vrot.slane %v3717_v34, 2  ;;  %v3737_v2 = vrot.slane %v3736_v32, 4 }
 0x31e   :  { %v3724_v11 = vmax.f32 %v3722_v27, %v3723_v63  ;;  %v3731_v36 = vmax.f32 %v3729_v56, %v3730_v21  ;;  %v4314_v15 = vsel %vm4211_vm4, %v4026_v55, %v4313_v62  ;;  %v708_v28 = vmax.f32 %v9414_v54, 0.0 }
 0x31f   :  { %v3798_v13 = vmax.f32 %v3796_v1, %v3797_v49  ;;  %v3719_v60 = vmax.f32 %v3717_v34, %v3718_v23  ;;  %v3738_v37 = vmax.f32 %v3736_v32, %v3737_v2  ;;  %v632_v41 = vadd.f32 %v9216_v6, %v9147_v0 }
 0x320   :  { %v3725_v19 = vrot.slane %v3724_v11, 2  ;;  %v3732_v5 = vrot.slane %v3731_v36, 2  ;;  %v1828_v35 = vcombine.high %v708_v28, %v708_v28  ;;  %v1835_v14 = vrot.slane %v708_v28, %v8304_v43 }
 0x321   :  { %v3720_v40 = vrot.slane %v3719_v60, 1  ;;  %v3739_v44 = vrot.slane %v3738_v37, 2  ;;  %v706_v20 = vmax.f32 %v632_v41, 0.0  ;;  %v9438_v61 = vadd.f32 %v9216_v6, %v9167_v12 }
 0x322   :  { %v3726_v30 = vmax.f32 %v3724_v11, %v3725_v19  ;;  %v3733_v54 = vmax.f32 %v3731_v36, %v3732_v5  ;;  %v1842_v9 = vrot.slane %v1828_v35, %v8304_v43  ;;  %v1843_v22 = vcombine.high %v1835_v14, %v1835_v14 }
 0x323   :  { %v3721_v39 = vmax.f32 %v3719_v60, %v3720_v40  ;;  %v3740_v55 = vmax.f32 %v3738_v37, %v3739_v44  ;;  %v3855_v0 = vsel %vm2118_vm1, %v1835_v14, -inf  ;;  %v1794_v26 = vcombine.high %v706_v20, %v706_v20 }
 0x324   :  { %v3727_v8 = vrot.slane %v3726_v30, 1  ;;  %v3734_v25 = vrot.slane %v3733_v54, 1  ;;  %v1844_v62 = vcombine.high %v1842_v9, %v1842_v9  ;;  %v3856_v50 = vrot.slane %v3855_v0, 4 }
 0x325   :  { %v3741_v33 = vrot.slane %v3740_v55, 1  ;;  %v4027_v45 = vmax.f32 %v3721_v39, %v3777_v58  ;;  %v3862_v29 = vsel %vm2118_vm1, %v1843_v22, -inf  ;;  %v3869_v12 = vsel %vm2118_vm1, %v1842_v9, -inf }
 0x326   :  { %v3728_v6 = vmax.f32 %v3726_v30, %v3727_v8  ;;  %v3735_v7 = vmax.f32 %v3733_v54, %v3734_v25  ;;  %v3857_v57 = vmax.f32 %v3855_v0, %v3856_v50  ;;  %v3863_v31 = vrot.slane %v3862_v29, 4  ;;  %v9460_v54 = vld [vmem:[#allocation2 + $0xd1] sm:$0xff] }
 0x327   :  { %v3742_v16 = vmax.f32 %v3740_v55, %v3741_v33  ;;  %v4315_v46 = vsel %vm4213_vm5, %v4027_v45, %v4314_v15  ;;  %v3870_v48 = vrot.slane %v3869_v12, 4  ;;  %v3876_v42 = vsel %vm2118_vm1, %v1844_v62, -inf  ;;  %v9463_v62 = vld [vmem:[#allocation2 + $0xc1] sm:$0xff] }
 0x328   :  { %v4028_v53 = vmax.f32 %v3728_v6, %v3784_v47  ;;  %v4029_v17 = vmax.f32 %v3735_v7, %v3791_v52  ;;  %v3858_v27 = vrot.slane %v3857_v57, 2  ;;  %v3864_v56 = vmax.f32 %v3862_v29, %v3863_v31 }
 0x329   :  { %v4030_v59 = vmax.f32 %v3742_v16, %v3798_v13  ;;  %v3871_v58 = vmax.f32 %v3869_v12, %v3870_v48  ;;  %v3877_v1 = vrot.slane %v3876_v42, 4  ;;  %v1801_v34 = vrot.slane %v706_v20, %v8304_v43 }
 0x32a   :  { %v4316_v63 = vsel %vm4215_vm6, %v4028_v53, %v4315_v46  ;;  %v3859_v21 = vmax.f32 %v3857_v57, %v3858_v27  ;;  %v3865_v32 = vrot.slane %v3864_v56, 2  ;;  %v1808_v49 = vrot.slane %v1794_v26, %v8304_v43 }
 0x32b   :  { %v4317_v23 = vsel %vm4217_vm7, %v4029_v17, %v4316_v63  ;;  %v3872_v2 = vrot.slane %v3871_v58, 2  ;;  %v3878_v11 = vmax.f32 %v3876_v42, %v3877_v1  ;;  %v1809_v36 = vcombine.high %v1801_v34, %v1801_v34 }
 0x32c   :  { %v9451_v47 = vsel %vm4219_vm8, %v4030_v59, %v4317_v23  ;;  %v3860_v52 = vrot.slane %v3859_v21, 1  ;;  %v3866_v15 = vmax.f32 %v3864_v56, %v3865_v32  ;;  %v1810_v28 = vcombine.high %v1808_v49, %v1808_v49 }
 0x32d   :  { %4357 = vst [vmem:[#allocation2 + $0x111] sm:$0xff] %v9451_v47  ;;  %v3873_v13 = vmax.f32 %v3871_v58, %v3872_v2  ;;  %v3879_v60 = vrot.slane %v3878_v11, 2  ;;  %v3799_v37 = vsel %vm2118_vm1, %v1801_v34, -inf  ;;  %v3806_v41 = vsel %vm2118_vm1, %v1809_v36, -inf }
 0x32e   :  { %v9456_v19 = vmax.f32 %v3859_v21, %v3860_v52  ;;  %v3867_v5 = vrot.slane %v3866_v15, 1  ;;  %v3800_v35 = vrot.slane %v3799_v37, 4  ;;  %v3807_v14 = vrot.slane %v3806_v41, 4 }
 0x32f   :  { %v3874_v40 = vrot.slane %v3873_v13, 1  ;;  %v3880_v44 = vmax.f32 %v3878_v11, %v3879_v60  ;;  %v3813_v20 = vsel %vm2118_vm1, %v1808_v49, -inf  ;;  %v3820_v30 = vsel %vm2118_vm1, %v1810_v28, -inf }
 0x330   :  { %v3868_v9 = vmax.f32 %v3866_v15, %v3867_v5  ;;  %v3801_v22 = vmax.f32 %v3799_v37, %v3800_v35  ;;  %v3808_v39 = vmax.f32 %v3806_v41, %v3807_v14  ;;  %v3814_v55 = vrot.slane %v3813_v20, 4 }
 0x331   :  { %v3875_v0 = vmax.f32 %v3873_v13, %v3874_v40  ;;  %v3881_v26 = vrot.slane %v3880_v44, 1  ;;  %v3821_v8 = vrot.slane %v3820_v30, 4  ;;  %v709_v25 = vmax.f32 %v9438_v61, 0.0  ;;  %v8129_v61 = vld [vmem:[%s10113_s2] ss:$0 sm:$0xff] }
 0x332   :  { %v3802_v50 = vrot.slane %v3801_v22, 2  ;;  %v3809_v33 = vrot.slane %v3808_v39, 2  ;;  %v3815_v45 = vmax.f32 %v3813_v20, %v3814_v55  ;;  %v9467_v29 = vpack.c.bf16 %v9460_v54, %v9463_v62 }
 0x333   :  { %v3882_v12 = vmax.f32 %v3880_v44, %v3881_v26  ;;  %v3822_v6 = vmax.f32 %v3820_v30, %v3821_v8  ;;  %v1845_v7 = vcombine.high %v709_v25, %v709_v25  ;;  %v1852_v57 = vrot.slane %v709_v25, %v8304_v43 }
 0x334   :  { %v3803_v31 = vmax.f32 %v3801_v22, %v3802_v50  ;;  %v3810_v16 = vmax.f32 %v3808_v39, %v3809_v33  ;;  %v3816_v46 = vrot.slane %v3815_v45, 2  ;;  %7627 = vmatmul.mubr.bf16.gmra.mrb[72].mxu0 %v9467_v29  ;;  %v635_v48 = vadd.f32 %v8129_v61, %v9191_v4  ;;  %v9487_v50 = vld [vmem:[#allocation2 + $0xe0] sm:$0xff] }
 0x335   :  { %v3823_v42 = vrot.slane %v3822_v6, 2  ;;  %v1859_v53 = vrot.slane %v1845_v7, %v8304_v43  ;;  %v1860_v17 = vcombine.high %v1852_v57, %v1852_v57  ;;  %v3883_v27 = vsel %vm2118_vm1, %v1852_v57, -inf  ;;  %v9491_v7 = vld [vmem:[#allocation2 + $0xd0] sm:$0xff]  ;;  %v9493_v57 = vld [vmem:[#allocation2 + $0xe1] sm:$0xff] }
 0x336   :  { %v3804_v56 = vrot.slane %v3803_v31, 1  ;;  %v3811_v59 = vrot.slane %v3810_v16, 1  ;;  %v3817_v58 = vmax.f32 %v3815_v45, %v3816_v46  ;;  %v3884_v1 = vrot.slane %v3883_v27, 4 }
 0x337   :  { %v3824_v34 = vmax.f32 %v3822_v6, %v3823_v42  ;;  %v1861_v63 = vcombine.high %v1859_v53, %v1859_v53  ;;  %v3890_v21 = vsel %vm2118_vm1, %v1860_v17, -inf  ;;  %v3897_v32 = vsel %vm2118_vm1, %v1859_v53, -inf }
 0x338   :  { %v3805_v49 = vmax.f32 %v3803_v31, %v3804_v56  ;;  %v3812_v23 = vmax.f32 %v3810_v16, %v3811_v59  ;;  %v3818_v2 = vrot.slane %v3817_v58, 1  ;;  %v3885_v4 = vmax.f32 %v3883_v27, %v3884_v1 }
 0x339   :  { %v3825_v11 = vrot.slane %v3824_v34, 1  ;;  %v3891_v36 = vrot.slane %v3890_v21, 4  ;;  %v3898_v52 = vrot.slane %v3897_v32, 4  ;;  %v3904_v15 = vsel %vm2118_vm1, %v1861_v63, -inf  ;;  %v4360_v63 = vld [vmem:[#allocation2 + $0x10] sm:$0xff] }
 0x33a   :  { %v3819_v28 = vmax.f32 %v3817_v58, %v3818_v2  ;;  %v4031_v13 = vmax.f32 %v3805_v49, %v9456_v19  ;;  %v4032_v60 = vmax.f32 %v3812_v23, %v3868_v9  ;;  %v3886_v37 = vrot.slane %v3885_v4, 2 }
 0x33b   :  { %v3826_v41 = vmax.f32 %v3824_v34, %v3825_v11  ;;  %v3892_v5 = vmax.f32 %v3890_v21, %v3891_v36  ;;  %v3899_v35 = vmax.f32 %v3897_v32, %v3898_v52  ;;  %v3905_v14 = vrot.slane %v3904_v15, 4  ;;  %v9504_v34 = vld [vmem:[#allocation2 + $0xf0] sm:$0xff] }
 0x33c   :  { %v4033_v40 = vmax.f32 %v3819_v28, %v3875_v0  ;;  %v4319_v44 = vsel %vm4207_vm2, %v4032_v60, %v4031_v13  ;;  %v707_v20 = vmax.f32 %v635_v48, 0.0  ;;  %v3887_v8 = vmax.f32 %v3885_v4, %v3886_v37  ;;  %v9499_v48 = vld [vmem:[#allocation2 + $0x100] sm:$0xff] }
 0x33d   :  { %v4034_v30 = vmax.f32 %v3826_v41, %v3882_v12  ;;  %v3906_v22 = vmax.f32 %v3904_v15, %v3905_v14  ;;  %v3893_v25 = vrot.slane %v3892_v5, 2  ;;  %v3900_v19 = vrot.slane %v3899_v35, 2  ;;  %v9510_v15 = vld [vmem:[#allocation2] sm:$0xff] }
 0x33e   :  { %v4320_v39 = vsel %vm4209_vm3, %v4033_v40, %v4319_v44  ;;  %v1811_v55 = vcombine.high %v707_v20, %v707_v20  ;;  %v1818_v26 = vrot.slane %v707_v20, %v8304_v43  ;;  %v4953_v61 = vpack.c.bf16 %v9487_v50, %v9491_v7 }
 0x33f   :  { %v9485_v9 = vsel %vm4211_vm4, %v4034_v30, %v4320_v39  ;;  %v3907_v12 = vrot.slane %v3906_v22, 2  ;;  %v3888_v42 = vrot.slane %v3887_v8, 1  ;;  %v3894_v53 = vmax.f32 %v3892_v5, %v3893_v25  ;;  %v4362_v30 = vld [vmem:[#allocation2 + $0x30] sm:$0xff] }
 0x340   :  { %v1825_v0 = vrot.slane %v1811_v55, %v8304_v43  ;;  %v1826_v33 = vcombine.high %v1818_v26, %v1818_v26  ;;  %v3827_v45 = vsel %vm2118_vm1, %v1818_v26, -inf  ;;  %v3901_v17 = vmax.f32 %v3899_v35, %v3900_v19  ;;  %7723 = vmatmul.mubr.bf16.gmra.mrb[8].mxu1 %v4953_v61  ;;  %v4364_v25 = vld [vmem:[#allocation2 + $0x50] sm:$0xff] }
 0x341   :  { %v3828_v6 = vrot.slane %v3827_v45, 4  ;;  %v4421_v1 = vpack.c.bf16 %v9319_v10, %v9493_v57  ;;  %v3908_v21 = vmax.f32 %v3906_v22, %v3907_v12  ;;  %v4954_v23 = vpack.c.bf16 %v9499_v48, %v9504_v34 }
 0x342   :  { %v1827_v31 = vcombine.high %v1825_v0, %v1825_v0  ;;  %v3834_v16 = vsel %vm2118_vm1, %v1826_v33, -inf  ;;  %v3841_v46 = vsel %vm2118_vm1, %v1825_v0, -inf  ;;  %v4422_v11 = vpack.c.bf16 %v9451_v47, %v9391_v38 }
 0x343   :  { %v3829_v27 = vmax.f32 %v3827_v45, %v3828_v6  ;;  %v3835_v56 = vrot.slane %v3834_v16, 4  ;;  %v3842_v59 = vrot.slane %v3841_v46, 4  ;;  %7630 = vmatprep.mubr.bf16.mxu0 %v4421_v1  ;;  %7726 = vmatprep.mubr.bf16.mxu1 %v4954_v23  ;;  %v4375_v10 = vpack.c.bf16 %v4360_v63, %v9510_v15  ;;  %v4361_v45 = vld [vmem:[#allocation2 + $0x20] sm:$0xff]  ;;  %v9533_v1 = vld [vmem:[#allocation2 + $0x71] sm:$0xff] }
 0x344   :  { %v3848_v58 = vsel %vm2118_vm1, %v1827_v31, -inf  ;;  %v3895_v28 = vrot.slane %v3894_v53, 1  ;;  %v3902_v13 = vrot.slane %v3901_v17, 1  ;;  %7631 = vmatmul.mubr.bf16.gmra.mrb[76].mxu0 %v4422_v11  ;;  %v3889_v41 = vmax.f32 %v3887_v8, %v3888_v42  ;;  %v4363_v31 = vld [vmem:[#allocation2 + $0x40] sm:$0xff] }
 0x345   :  { %v3830_v32 = vrot.slane %v3829_v27, 2  ;;  %v3849_v49 = vrot.slane %v3848_v58, 4  ;;  %v3836_v2 = vmax.f32 %v3834_v16, %v3835_v56  ;;  %v3843_v4 = vmax.f32 %v3841_v46, %v3842_v59  ;;  %7650 = vmatprep.mubr.bf16.mxu0 %v4375_v10  ;;  %v8086_v16 = vld [vmem:[%s10114_s3 + $0x88] sm:$0xff]   ;;  %v9525_v56 = vld [vmem:[#allocation2 + $0x31] sm:$0xff] }
 0x346   :  { %v3909_v5 = vrot.slane %v3908_v21, 1  ;;  %v3896_v22 = vmax.f32 %v3894_v53, %v3895_v28  ;;  %v3903_v39 = vmax.f32 %v3901_v17, %v3902_v13  ;;  %v9513_v6 = vpack.c.bf16 %v4362_v30, %v4361_v45  ;;  %v9543_v23 = vld [vmem:[#allocation2 + $0x41] sm:$0xff]  ;;  %v8090_v13 = vld [vmem:[%s10114_s3 + $0x98] sm:$0xff]  }
 0x347   :  { %v3831_v36 = vmax.f32 %v3829_v27, %v3830_v32  ;;  %v3850_v52 = vmax.f32 %v3848_v58, %v3849_v49  ;;  %v3837_v60 = vrot.slane %v3836_v2, 2  ;;  %v3844_v37 = vrot.slane %v3843_v4, 2  ;;  %v9531_v58 = vld [vmem:[#allocation2 + $0x51] sm:$0xff]  ;;  %v9541_v49 = vld [vmem:[#allocation2 + $0x21] sm:$0xff] }
 0x348   :  { %v3910_v19 = vmax.f32 %v3908_v21, %v3909_v5  ;;  %v9520_v42 = vpack.c.bf16 %v4364_v25, %v4363_v31  ;;  %v4366_v21 = vld [vmem:[#allocation2 + $0x70] sm:$0xff]  ;;  %v5151_v30 = vpack.c.bf16 %v9543_v23, %v9525_v56  ;;  %v8093_v45 = vld [vmem:[%s10114_s3 + $0x158] sm:$0xff]   ;;  %v4732_v31 = vld [vmem:[#allocation2 + $0x22] sm:$0xff] }
 0x349   :  { %v3832_v35 = vrot.slane %v3831_v36, 1  ;;  %v3851_v14 = vrot.slane %v3850_v52, 2  ;;  %v3838_v40 = vmax.f32 %v3836_v2, %v3837_v60  ;;  %v3845_v44 = vmax.f32 %v3843_v4, %v3844_v37  ;;  %v9536_v32 = vld [vmem:[#allocation2 + $0xf1] sm:$0xff]  ;;  %v9545_v2 = vld [vmem:[#allocation2 + $0x61] sm:$0xff] }
 0x34a   :  { %v4365_v4 = vld [vmem:[#allocation2 + $0x60] sm:$0xff]  ;;  %v5759_v10 = vpack.c.bf16 %v9533_v1, %v9545_v2  ;;  %v5762_v60 = vpack.c.bf16 %v9536_v32, %v9493_v57  ;;  %v4379_v37 = vpack.c.bf16 %v9403_v24, %v9510_v15  ;;  %v4946_v5 = vld [vmem:[#allocation2 + $0x110] sm:$0xff]  ;;  %v4380_v24 = vpack.c.bf16 %v9491_v7, %v9399_v3 }
 0x34b   :  { %v3833_v38 = vmax.f32 %v3831_v36, %v3832_v35  ;;  %v3852_v20 = vmax.f32 %v3850_v52, %v3851_v14  ;;  %v3839_v55 = vrot.slane %v3838_v40, 1  ;;  %v3846_v26 = vrot.slane %v3845_v44, 1  ;;  %v8096_v3 = vld [vmem:[%s10114_s3 + $0xb0] sm:$0xff]  }
 0x34c   :  { %7651 = vmatmul.mubr.bf16.vlgmr.msra.gmra.mrb[64].mxu0 %v9513_v6  ;;  %v5757_v36 = vpack.c.bf16 %v9525_v56, %v9541_v49  ;;  %v5758_v52 = vpack.c.bf16 %v9531_v58, %v9543_v23  ;;  %v9556_v28 = vpack.c.bf16 %v4366_v21, %v4365_v4  ;;  %v4736_v4 = vld [vmem:[#allocation2 + $0x62] sm:$0xff]  ;;  %v8119_v56 = vld [vmem:[%s10114_s3 + $0x210] sm:$0xff]  }
 0x34d   :  { %v3853_v0 = vrot.slane %v3852_v20, 1  ;;  %v4035_v33 = vmax.f32 %v3833_v38, %v3889_v41  ;;  %v3840_v12 = vmax.f32 %v3838_v40, %v3839_v55  ;;  %v3847_v8 = vmax.f32 %v3845_v44, %v3846_v26  ;;  %7654 = vmatprep.mubr.bf16.mxu0 %v9520_v42  ;;  %7667 = vmatpush3.bf16.msra.mxu0 %v9303_v18  ;;  %v8092_v41 = vld [vmem:[%s10114_s3 + $0xa0] sm:$0xff]   ;;  %v5134_v40 = vld [vmem:[#allocation2 + $0x11] sm:$0xff]  ;;  %v8094_v38 = vld [vmem:[%s10114_s3 + $0xa8] sm:$0xff]  }
 0x34e   :  { %7668 = vmatprep.subr.bf16.mxu0 %v8086_v16  ;;  %v5150_v44 = vpack.c.bf16 %v9541_v49, %v5134_v40  ;;  %v9596_v55 = vpack.c.bf16 %v4946_v5, %v9499_v48  ;;  %v8098_v26 = vld [vmem:[%s10114_s3 + $0xb8] sm:$0xff]  }
 0x34f   :  { %v3854_v46 = vmax.f32 %v3852_v20, %v3853_v0  ;;  %v4322_v61 = vsel %vm4213_vm5, %v4035_v33, %v9485_v9  ;;  %v4036_v53 = vmax.f32 %v3840_v12, %v3896_v22  ;;  %v4037_v17 = vmax.f32 %v3847_v8, %v3903_v39  ;;  %v8088_v9 = vld [vmem:[%s10114_s3 + $0x90] sm:$0xff]   ;;  %v8089_v22 = vld [vmem:[%s10114_s3 + $0x148] sm:$0xff]  }
 0x350   :  { %v9580_v20 = vpack.c.bf16 %v9504_v34, %v9487_v50  ;;  %v4730_v50 = vld [vmem:[#allocation2 + $0x2] sm:$0xff]  ;;  %v9591_v34 = vld [vmem:[#allocation2 + $0x12] sm:$0xff]  ;;  %v5152_v39 = vpack.c.bf16 %v9545_v2, %v9531_v58 }
 0x351   :  { %v4038_v27 = vmax.f32 %v3854_v46, %v3910_v19  ;;  %v4323_v59 = vsel %vm4215_vm6, %v4036_v53, %v4322_v61  ;;  %7669 = vmatpush3.bf16.msra.mxu0 %v8086_v16  ;;  %v4746_v25 = vpack.c.bf16 %v9591_v34, %v4730_v50  ;;  %v8091_v19 = vld [vmem:[%s10114_s3 + $0x150] sm:$0xff]   ;;  %v9607_v0 = vld [vmem:[#allocation2 + $0x81] sm:$0xff]  ;;  %v5352_v40 = vpack.c.bf16 %v4732_v31, %v9591_v34  ;;  %v8120_v58 = vld [vmem:[%s10114_s3 + $0x218] sm:$0xff]  }
 0x352   :  { %v4324_v63 = vsel %vm4217_vm7, %v4037_v17, %v4323_v59  ;;  %7670 = vmatprep.subr.bf16.mxu0 %v8088_v9  ;;  %v4733_v48 = vld [vmem:[#allocation2 + $0x32] sm:$0xff]  ;;  %v4734_v46 = vld [vmem:[#allocation2 + $0x42] sm:$0xff] }
 0x353   :  { %v9539_v18 = vsel %vm4219_vm8, %v4038_v27, %v4324_v63  ;;  %v5142_v33 = vld [vmem:[#allocation2 + $0xb1] sm:$0xff]  ;;  %v9615_v16 = vpack.c.bf16 %v4733_v48, %v4732_v31  ;;  %v8095_v53 = vld [vmem:[%s10114_s3 + $0x160] sm:$0xff]   ;;  %v5155_v27 = vpack.c.bf16 %v9493_v57, %v9460_v54  ;;  %v8097_v59 = vld [vmem:[%s10114_s3 + $0x168] sm:$0xff]  }
 0x354   :  { %4358 = vst [vmem:[#allocation2 + $0x121] sm:$0xff] %v9539_v18  ;;  %v5157_v11 = vpack.c.bf16 %v9539_v18, %v9451_v47  ;;  %7655 = vmatmul.mubr.bf16.gmra.mrb[68].mxu0 %v9556_v28  ;;  %v4735_v12 = vld [vmem:[#allocation2 + $0x52] sm:$0xff]  ;;  %v5154_v8 = vpack.c.bf16 %v9463_v62, %v5142_v33  ;;  %v9624_v62 = vld [vmem:[#allocation2 + $0x101] sm:$0xff]  ;;  %v5353_v47 = vpack.c.bf16 %v4734_v46, %v4733_v48 }
 0x355   :  { %7658 = vmatprep.mubr.bf16.mxu0 %v4379_v37  ;;  %7671 = vmatpush3.bf16.msra.mxu0 %v8088_v9  ;;  %v9617_v61 = vpack.c.bf16 %v4735_v12, %v4734_v46  ;;  %v4737_v17 = vld [vmem:[#allocation2 + $0x72] sm:$0xff]  ;;  %v4738_v9 = vld [vmem:[#allocation2 + $0xa2] sm:$0xff]  ;;  %v5156_v21 = vpack.c.bf16 %v9624_v62, %v9536_v32  ;;  %v5354_v50 = vpack.c.bf16 %v4736_v4, %v4735_v12 }
 0x356   :  { %7672 = vmatprep.subr.bf16.mxu0 %v8090_v13  ;;  %v4739_v63 = vld [vmem:[#allocation2 + $0xb2] sm:$0xff]  ;;  %v4744_v34 = vld [vmem:[#allocation2 + $0x102] sm:$0xff] }
 0x357   :  { %v4750_v37 = vpack.c.bf16 %v4739_v63, %v4738_v9  ;;  %v8099_v54 = vld [vmem:[%s10114_s3 + $0x170] sm:$0xff]   ;;  %v8104_v48 = vld [vmem:[%s10114_s3 + $0x198] sm:$0xff]   ;;  %v8105_v33 = vld [vmem:[%s10114_s3 + $0x1a0] sm:$0xff]  }
 0x358   :  { %v8106_v12 = vld [vmem:[%s10114_s3 + $0x1a8] sm:$0xff]   ;;  %v8107_v31 = vld [vmem:[%s10114_s3 + $0x1b0] sm:$0xff]   ;;  %v5545_v9 = vld [vmem:[#allocation2 + $0x80] sm:$0xff] }
 0x359   :  { %7673 = vmatpush3.bf16.msra.mxu0 %v8090_v13  ;;  %v9633_v13 = vpack.c.bf16 %v4737_v17, %v4736_v4  ;;  %v8112_v4 = vld [vmem:[%s10114_s3 + $0x1d8] sm:$0xff]   ;;  %v8122_v2 = vld [vmem:[%s10114_s3 + $0x228] sm:$0xff]  }
 0x35a   :  { %7674 = vmatprep.subr.bf16.mxu0 %v8092_v41  ;;  %v5748_v49 = vld [vmem:[#allocation2 + $0x91] sm:$0xff] }
 0x35b   :  { %v9569_v35 = vld [vmem:[#allocation2 + $0x120] sm:$0xff]  ;;  %v5754_v23 = vld [vmem:[#allocation2 + $0x111] sm:$0xff] }
 0x35c   :  { %v4955_v14 = vpack.c.bf16 %v9569_v35, %v4946_v5  ;;  %7659 = vmatmul.mubr.bf16.gmra.mrb[72].mxu0 %v4380_v24  ;;  %v8100_v5 = vld [vmem:[%s10114_s3 + $0x178] sm:$0xff]   ;;  %v9679_v46 = vld [vmem:[#allocation2 + $0x122] sm:$0xff] }
 0x35d   :  { %7662 = vmatprep.mubr.bf16.mxu0 %v9580_v20  ;;  %7675 = vmatpush3.bf16.msra.mxu0 %v8092_v41  ;;  %v4741_v41 = vld [vmem:[#allocation2 + $0xd2] sm:$0xff] }
 0x35e   :  { %7727 = vmatmul.mubr.bf16.gmra.mrb[12].mxu1 %v4955_v14  ;;  %7676 = vmatprep.subr.bf16.mxu0 %v8094_v38  ;;  %v4743_v14 = vld [vmem:[#allocation2 + $0xf2] sm:$0xff] }
 0x35f   :  { %7746 = vmatprep.mubr.bf16.mxu1 %v5150_v44  ;;  %v4740_v44 = vld [vmem:[#allocation2 + $0xc2] sm:$0xff]  ;;  %v5950_v57 = vld [vmem:[#allocation2 + $0x92] sm:$0xff] }
 0x360   :  { %v9646_v24 = vpack.c.bf16 %v4741_v41, %v4740_v44 }
 0x361   :  { %7677 = vmatpush3.bf16.msra.mxu0 %v8094_v38  ;;  %v4742_v38 = vld [vmem:[#allocation2 + $0xe2] sm:$0xff] }
 0x362   :  { %7678 = vmatprep.subr.bf16.mxu0 %v8096_v3 }
 0x364   :  { %7663 = vmatmul.mubr.bf16.gmra.mrb[76].mxu0 %v9596_v55 }
 0x365   :  { %7679 = vmatpush3.bf16.msra.mxu0 %v8096_v3  ;;  %7682 = vmatprep.mubr.bf16.mxu0 %v4746_v25  ;;  %v9648_v3 = vpack.c.bf16 %v4743_v14, %v4742_v38  ;;  %v9664_v25 = vld [vmem:[#allocation2 + $0x82] sm:$0xff] }
 0x366   :  { %7747 = vmatmul.mubr.bf16.vlgmr.msra.gmra.mrb[0].mxu1 %v5151_v30  ;;  %7680 = vmatprep.subr.bf16.mxu0 %v8098_v26  ;;  %v8101_v30 = vld [vmem:[%s10114_s3 + $0x180] sm:$0xff]   ;;  %v5962_v32 = vpack.c.bf16 %v5950_v57, %v9664_v25 }
 0x367   :  { %7763 = vmatpush3.bf16.msra.mxu1 %v9345_v51  ;;  %7750 = vmatprep.mubr.bf16.mxu1 %v5152_v39  ;;  %v5153_v51 = vpack.c.bf16 %v9607_v0, %v9533_v1  ;;  %v8121_v1 = vld [vmem:[%s10114_s3 + $0x220] sm:$0xff]  }
 0x368   :  { %7764 = vmatprep.subr.bf16.mxu1 %v8089_v22 }
 0x369   :  { %7681 = vmatpush3.bf16.msra.mxu0 %v8098_v26  ;;  %v8103_v26 = vld [vmem:[%s10114_s3 + $0x190] sm:$0xff]  }
 0x36b   :  { %7765 = vmatpush3.bf16.msra.mxu1 %v8089_v22  ;;  %v4745_v22 = vld [vmem:[#allocation2 + $0x112] sm:$0xff] }
 0x36c   :  { %7766 = vmatprep.subr.bf16.mxu1 %v8091_v19  ;;  %7683 = vmatmul.mubr.bf16.vlgmr.msra.gmra.mrb[64].mxu0 %v9615_v16  ;;  %v9658_v39 = vpack.c.bf16 %v4745_v22, %v4744_v34 }
 0x36d   :  { %7686 = vmatprep.mubr.bf16.mxu0 %v9617_v61 }
 0x36e   :  { %7751 = vmatmul.mubr.bf16.gmra.mrb[4].mxu1 %v5153_v51  ;;  %v5356_v51 = vpack.c.bf16 %v4740_v44, %v4739_v63  ;;  %v5558_v63 = vpack.c.bf16 %v9510_v15, %v5545_v9 }
 0x36f   :  { %7767 = vmatpush3.bf16.msra.mxu1 %v8091_v19  ;;  %7754 = vmatprep.mubr.bf16.mxu1 %v5154_v8  ;;  %v5355_v19 = vpack.c.bf16 %v9664_v25, %v4737_v17  ;;  %v5358_v8 = vpack.c.bf16 %v4744_v34, %v4743_v14  ;;  %v8108_v17 = vld [vmem:[%s10114_s3 + $0x1b8] sm:$0xff]   ;;  %v9793_v34 = vld [vmem:[%s10115_s4] ss:$0 sm:$0xff] }
 0x370   :  { %7768 = vmatprep.subr.bf16.mxu1 %v8093_v45 }
 0x373   :  { %7769 = vmatpush3.bf16.msra.mxu1 %v8093_v45  ;;  %v5357_v45 = vpack.c.bf16 %v4742_v38, %v4741_v41  ;;  %v8116_v41 = vld [vmem:[%s10114_s3 + $0x1f8] sm:$0xff]  }
 0x374   :  { %7770 = vmatprep.subr.bf16.mxu1 %v8095_v53  ;;  %7687 = vmatmul.mubr.bf16.gmra.mrb[68].mxu0 %v9633_v13 }
 0x375   :  { %7690 = vmatprep.mubr.bf16.mxu0 %v4750_v37  ;;  %v8114_v37 = vld [vmem:[%s10114_s3 + $0x1e8] sm:$0xff]  }
 0x376   :  { %7755 = vmatmul.mubr.bf16.gmra.mrb[8].mxu1 %v5155_v27  ;;  %v8109_v27 = vld [vmem:[%s10114_s3 + $0x1c0] sm:$0xff]  }
 0x377   :  { %7771 = vmatpush3.bf16.msra.mxu1 %v8095_v53  ;;  %7758 = vmatprep.mubr.bf16.mxu1 %v5156_v21  ;;  %v5359_v53 = vpack.c.bf16 %v9679_v46, %v4745_v22  ;;  %v5547_v21 = vld [vmem:[#allocation2 + $0xc0] sm:$0xff] }
 0x378   :  { %7772 = vmatprep.subr.bf16.mxu1 %v8097_v59 }
 0x37b   :  { %7773 = vmatpush3.bf16.msra.mxu1 %v8097_v59  ;;  %v8110_v59 = vld [vmem:[%s10114_s3 + $0x1c8] sm:$0xff]  }
 0x37c   :  { %7774 = vmatprep.subr.bf16.mxu1 %v8099_v54  ;;  %7691 = vmatmul.mubr.bf16.gmra.mrb[72].mxu0 %v9646_v24 }
 0x37d   :  { %7694 = vmatprep.mubr.bf16.mxu0 %v9648_v3 }
 0x37e   :  { %7759 = vmatmul.mubr.bf16.gmra.mrb[12].mxu1 %v5157_v11  ;;  %v8102_v11 = vld [vmem:[%s10114_s3 + $0x188] sm:$0xff]  }
 0x37f   :  { %7775 = vmatpush3.bf16.msra.mxu1 %v8099_v54  ;;  %7778 = vmatprep.mubr.bf16.mxu1 %v5352_v40  ;;  %v5562_v54 = vpack.c.bf16 %v9510_v15, %v9569_v35  ;;  %v8118_v15 = vld [vmem:[%s10114_s3 + $0x208] sm:$0xff]  }
 0x380   :  { %7776 = vmatprep.subr.bf16.mxu1 %v8100_v5 }
 0x383   :  { %7777 = vmatpush3.bf16.msra.mxu1 %v8100_v5 }
 0x384   :  { %7794 = vmatprep.subr.bf16.mxu1 %v8101_v30  ;;  %7695 = vmatmul.mubr.bf16.gmra.mrb[76].mxu0 %v9658_v39 }
 0x386   :  { %7779 = vmatmul.mubr.bf16.vlgmr.msra.gmra.mrb[0].mxu1 %v5353_v47 }
 0x387   :  { %7795 = vmatpush3.bf16.msra.mxu1 %v8101_v30  ;;  %7782 = vmatprep.mubr.bf16.mxu1 %v5354_v50 }
 0x388   :  { %7796 = vmatprep.subr.bf16.mxu1 %v8102_v11 }
 0x38b   :  { %7797 = vmatpush3.bf16.msra.mxu1 %v8102_v11 }
 0x38c   :  { %7798 = vmatprep.subr.bf16.mxu1 %v8103_v26 }
 0x38e   :  { %7783 = vmatmul.mubr.bf16.gmra.mrb[4].mxu1 %v5355_v19 }
 0x38f   :  { %7799 = vmatpush3.bf16.msra.mxu1 %v8103_v26  ;;  %7786 = vmatprep.mubr.bf16.mxu1 %v5356_v51 }
 0x390   :  { %7800 = vmatprep.subr.bf16.mxu1 %v8104_v48 }
 0x393   :  { %7801 = vmatpush3.bf16.msra.mxu1 %v8104_v48 }
 0x394   :  { %7802 = vmatprep.subr.bf16.mxu1 %v8105_v33 }
 0x396   :  { %7787 = vmatmul.mubr.bf16.gmra.mrb[8].mxu1 %v5357_v45 }
 0x397   :  { %7803 = vmatpush3.bf16.msra.mxu1 %v8105_v33  ;;  %7790 = vmatprep.mubr.bf16.mxu1 %v5358_v8 }
 0x398   :  { %7804 = vmatprep.subr.bf16.mxu1 %v8106_v12 }
 0x39b   :  { %7805 = vmatpush3.bf16.msra.mxu1 %v8106_v12 }
 0x39c   :  { %7806 = vmatprep.subr.bf16.mxu1 %v8107_v31 }
 0x39e   :  { %7791 = vmatmul.mubr.bf16.gmra.mrb[12].mxu1 %v5359_v53 }
 0x39f   :  { %7807 = vmatpush3.bf16.msra.mxu1 %v8107_v31  ;;  %7810 = vmatprep.mubr.bf16.mxu1 %v9513_v6  ;;  %v8111_v6 = vld [vmem:[%s10114_s3 + $0x1d0] sm:$0xff]  }
 0x3a0   :  { %7808 = vmatprep.subr.bf16.mxu1 %v8108_v17 }
 0x3a3   :  { %7809 = vmatpush3.bf16.msra.mxu1 %v8108_v17 }
 0x3a4   :  { %7826 = vmatprep.subr.bf16.mxu1 %v8109_v27 }
 0x3a6   :  { %7811 = vmatmul.mubr.bf16.vlgmr.msra.gmra.mrb[0].mxu1 %v9520_v42  ;;  %v5559_v42 = vpack.c.bf16 %v9491_v7, %v5547_v21  ;;  %v8115_v7 = vld [vmem:[%s10114_s3 + $0x1f0] sm:$0xff]  }
 0x3a7   :  { %7827 = vmatpush3.bf16.msra.mxu1 %v8109_v27  ;;  %7814 = vmatprep.mubr.bf16.mxu1 %v9556_v28  ;;  %v8113_v28 = vld [vmem:[%s10114_s3 + $0x1e0] sm:$0xff]  }
 0x3a8   :  { %7828 = vmatprep.subr.bf16.mxu1 %v8110_v59 }
 0x3ab   :  { %7829 = vmatpush3.bf16.msra.mxu1 %v8110_v59 }
 0x3ac   :  { %7830 = vmatprep.subr.bf16.mxu1 %v8111_v6 }
 0x3ae   :  { %7815 = vmatmul.mubr.bf16.gmra.mrb[4].mxu1 %v5558_v63 }
 0x3af   :  { %7831 = vmatpush3.bf16.msra.mxu1 %v8111_v6  ;;  %7818 = vmatprep.mubr.bf16.mxu1 %v5559_v42 }
 0x3b0   :  { %7832 = vmatprep.subr.bf16.mxu1 %v8112_v4 }
 0x3b3   :  { %7833 = vmatpush3.bf16.msra.mxu1 %v8112_v4 }
 0x3b4   :  { %7834 = vmatprep.subr.bf16.mxu1 %v8113_v28 }
 0x3b6   :  { %7819 = vmatmul.mubr.bf16.gmra.mrb[8].mxu1 %v9580_v20  ;;  %v8117_v20 = vld [vmem:[%s10114_s3 + $0x200] sm:$0xff]  }
 0x3b7   :  { %7835 = vmatpush3.bf16.msra.mxu1 %v8113_v28  ;;  %7822 = vmatprep.mubr.bf16.mxu1 %v9596_v55  ;;  %v8124_v55 = vld [vmem:[%s10114_s3 + $0x238] sm:$0xff]  }
 0x3b8   :  { %7836 = vmatprep.subr.bf16.mxu1 %v8114_v37 }
 0x3bb   :  { %7837 = vmatpush3.bf16.msra.mxu1 %v8114_v37 }
 0x3bc   :  { %7838 = vmatprep.subr.bf16.mxu1 %v8115_v7 }
 0x3be   :  { %7823 = vmatmul.mubr.bf16.gmra.mrb[12].mxu1 %v5562_v54 }
 0x3bf   :  { %7839 = vmatpush3.bf16.msra.mxu1 %v8115_v7  ;;  %7842 = vmatprep.mubr.bf16.mxu1 %v5757_v36  ;;  %v5760_v36 = vpack.c.bf16 %v5748_v49, %v9607_v0 }
 0x3c0   :  { %7840 = vmatprep.subr.bf16.mxu1 %v8116_v41 }
 0x3c3   :  { %7841 = vmatpush3.bf16.msra.mxu1 %v8116_v41 }
 0x3c4   :  { %7858 = vmatprep.subr.bf16.mxu1 %v8117_v20 }
 0x3c6   :  { %7843 = vmatmul.mubr.bf16.vlgmr.msra.gmra.mrb[0].mxu1 %v5758_v52  ;;  %v5763_v52 = vpack.c.bf16 %v5754_v23, %v9624_v62 }
 0x3c7   :  { %7859 = vmatpush3.bf16.msra.mxu1 %v8117_v20  ;;  %7846 = vmatprep.mubr.bf16.mxu1 %v5759_v10  ;;  %v5756_v10 = vld [vmem:[#allocation2 + $0x131] sm:$0xff] }
 0x3c8   :  { %7860 = vmatprep.subr.bf16.mxu1 %v8118_v15  ;;  %v5764_v35 = vpack.c.bf16 %v5756_v10, %v9539_v18  ;;  %v5958_v18 = vld [vmem:[#allocation2 + $0x132] sm:$0xff] }
 0x3cb   :  { %7861 = vmatpush3.bf16.msra.mxu1 %v8118_v15 }
 0x3cc   :  { %7862 = vmatprep.subr.bf16.mxu1 %v8119_v56 }
 0x3ce   :  { %7847 = vmatmul.mubr.bf16.gmra.mrb[4].mxu1 %v5760_v36 }
 0x3cf   :  { %7863 = vmatpush3.bf16.msra.mxu1 %v8119_v56  ;;  %7850 = vmatprep.mubr.bf16.mxu1 %v9467_v29  ;;  %v8123_v29 = vld [vmem:[%s10114_s3 + $0x230] sm:$0xff]  }
 0x3d0   :  { %7864 = vmatprep.subr.bf16.mxu1 %v8120_v58 }
 0x3d3   :  { %7865 = vmatpush3.bf16.msra.mxu1 %v8120_v58 }
 0x3d4   :  { %7866 = vmatprep.subr.bf16.mxu1 %v8121_v1 }
 0x3d6   :  { %7851 = vmatmul.mubr.bf16.gmra.mrb[8].mxu1 %v5762_v60  ;;  %v5966_v60 = vpack.c.bf16 %v5958_v18, %v9679_v46 }
 0x3d7   :  { %7867 = vmatpush3.bf16.msra.mxu1 %v8121_v1  ;;  %7854 = vmatprep.mubr.bf16.mxu1 %v5763_v52 }
 0x3d8   :  { %7868 = vmatprep.subr.bf16.mxu1 %v8122_v2 }
 0x3db   :  { %7869 = vmatpush3.bf16.msra.mxu1 %v8122_v2 }
 0x3dc   :  { %7870 = vmatprep.subr.bf16.mxu1 %v8123_v29 }
 0x3de   :  { %7855 = vmatmul.mubr.bf16.gmra.mrb[12].mxu1 %v5764_v35 }
 0x3df   :  { %7871 = vmatpush3.bf16.msra.mxu1 %v8123_v29  ;;  %7874 = vmatprep.mubr.bf16.mxu1 %v9615_v16 }
 0x3e0   :  { %7872 = vmatprep.subr.bf16.mxu1 %v8124_v55 }
 0x3e3   :  { %7873 = vmatpush3.bf16.msra.mxu1 %v8124_v55 }
 0x3e6   :  { %7875 = vmatmul.mubr.bf16.vlgmr.msra.gmra.mrb[0].mxu1 %v9617_v61 }
 0x3e7   :  { %7878 = vmatprep.mubr.bf16.mxu1 %v9633_v13 }
 0x3ee   :  { %7879 = vmatmul.mubr.bf16.gmra.mrb[4].mxu1 %v5962_v32 }
 0x3ef   :  { %7882 = vmatprep.mubr.bf16.mxu1 %v9646_v24 }
 0x3f6   :  { %7883 = vmatmul.mubr.bf16.gmra.mrb[8].mxu1 %v9648_v3 }
 0x3f7   :  { %7886 = vmatprep.mubr.bf16.mxu1 %v9658_v39 }
 0x3fe   :  { %7887 = vmatmul.mubr.bf16.gmra.mrb[12].mxu1 %v5966_v60 }
 0x43f   :  { %v7684_v0 = vpop.f32.mrb[64].mxu0 }
 0x440   :  { %v4853_v16 = vpop.f32.mrb[65].mxu0 }
 0x441   :  { %v7685_v62 = vpop.f32.mrb[66].mxu0 }
 0x442   :  { %v4856_v61 = vpop.f32.mrb[67].mxu0 }
 0x447   :  { %v9766_v5 = vpop.f32.mrb[68].mxu0 }
 0x448   :  { %v9768_v13 = vpop.f32.mrb[69].mxu0 }
 0x449   :  { %v9770_v14 = vpop.f32.mrb[70].mxu0 }
 0x44a   :  { %v9772_v40 = vpop.f32.mrb[71].mxu0 }
 0x44f   :  { %v9774_v44 = vpop.f32.mrb[72].mxu0 }
 0x450   :  { %v9776_v24 = vpop.f32.mrb[73].mxu0 }
 0x451   :  { %v9778_v38 = vpop.f32.mrb[74].mxu0 }
 0x452   :  { %v9780_v3 = vpop.f32.mrb[75].mxu0 }
 0x457   :  { %v9782_v30 = vpop.f32.mrb[76].mxu0 }
 0x458   :  { %v9784_v22 = vpop.f32.mrb[77].mxu0 }
 0x459   :  { %v9786_v47 = vpop.f32.mrb[78].mxu0 }
 0x45a   :  { %v9788_v11 = vpop.f32.mrb[79].mxu0 }
 0x4b9   :  { %v7876_v50 = vpop.f32.mrb[0].mxu1 }
 0x4ba   :  { %v7890_v39 = vadd.f32 %v7876_v50, %v7684_v0  ;;  %v6066_v26 = vpop.f32.mrb[1].mxu1 }
 0x4bb   :  { %v7891_v25 = vadd.f32 %v6066_v26, %v4853_v16  ;;  %v7877_v19 = vpop.f32.mrb[2].mxu1 }
 0x4bc   :  { %v6154_v48 = vadd.f32 %v7890_v39, %v9793_v34  ;;  %v7892_v51 = vadd.f32 %v7877_v19, %v7685_v62  ;;  %v6069_v33 = vpop.f32.mrb[3].mxu1 }
 0x4bd   :  { %v6152_v45 = vadd.f32 %v7891_v25, %v9793_v34  ;;  %v7893_v12 = vadd.f32 %v6069_v33, %v4856_v61 }
 0x4be   :  { %v6170_v8 = vmax.f32 %v6154_v48, 0.0  ;;  %v6155_v31 = vadd.f32 %v7892_v51, %v9793_v34 }
 0x4bf   :  { %v6168_v46 = vmax.f32 %v6152_v45, 0.0  ;;  %v6153_v53 = vadd.f32 %v7893_v12, %v9793_v34 }
 0x4c0   :  { %v6234_v17 = vcombine.high %v6170_v8, %v6170_v8  ;;  %v6241_v27 = vrot.slane %v6170_v8, %v8304_v43  ;;  %v9800_v59 = vmax.f32 %v6155_v31, 0.0 }
 0x4c1   :  { %v6200_v6 = vcombine.high %v6168_v46, %v6168_v46  ;;  %v6207_v9 = vrot.slane %v6168_v46, %v8304_v43  ;;  %v9803_v63 = vmax.f32 %v6153_v53, 0.0  ;;  %v9805_v21 = vpop.f32.mrb[4].mxu1 }
 0x4c2   :  { %v6248_v4 = vrot.slane %v6234_v17, %v8304_v43  ;;  %v6249_v42 = vcombine.high %v6241_v27, %v6241_v27  ;;  %v6592_v28 = vsel %vm2118_vm1, %v6241_v27, -inf  ;;  %v6251_v37 = vcombine.high %v9800_v59, %v9800_v59  ;;  %v9811_v7 = vpop.f32.mrb[5].mxu1 }
 0x4c3   :  { %v6593_v54 = vrot.slane %v6592_v28, 4  ;;  %v6214_v41 = vrot.slane %v6200_v6, %v8304_v43  ;;  %v6215_v20 = vcombine.high %v6207_v9, %v6207_v9  ;;  %v6536_v15 = vsel %vm2118_vm1, %v6207_v9, -inf  ;;  %v9815_v56 = vpop.f32.mrb[6].mxu1 }
 0x4c4   :  { %v6250_v49 = vcombine.high %v6248_v4, %v6248_v4  ;;  %v6599_v36 = vsel %vm2118_vm1, %v6249_v42, -inf  ;;  %v6606_v58 = vsel %vm2118_vm1, %v6248_v4, -inf  ;;  %v6537_v1 = vrot.slane %v6536_v15, 4  ;;  %v9819_v23 = vpop.f32.mrb[7].mxu1 }
 0x4c5   :  { %v6594_v2 = vmax.f32 %v6592_v28, %v6593_v54  ;;  %v6600_v52 = vrot.slane %v6599_v36, 4  ;;  %v6607_v29 = vrot.slane %v6606_v58, 4  ;;  %v6216_v10 = vcombine.high %v6214_v41, %v6214_v41 }
 0x4c6   :  { %v6613_v35 = vsel %vm2118_vm1, %v6250_v49, -inf  ;;  %v6538_v55 = vmax.f32 %v6536_v15, %v6537_v1  ;;  %v6543_v57 = vsel %vm2118_vm1, %v6215_v20, -inf  ;;  %v6550_v32 = vsel %vm2118_vm1, %v6214_v41, -inf }
 0x4c7   :  { %v6595_v18 = vrot.slane %v6594_v2, 2  ;;  %v6601_v60 = vmax.f32 %v6599_v36, %v6600_v52  ;;  %v6608_v0 = vmax.f32 %v6606_v58, %v6607_v29  ;;  %v6614_v16 = vrot.slane %v6613_v35, 4 }
 0x4c8   :  { %v6539_v62 = vrot.slane %v6538_v55, 2  ;;  %v6544_v61 = vrot.slane %v6543_v57, 4  ;;  %v6551_v50 = vrot.slane %v6550_v32, 4  ;;  %v6557_v39 = vsel %vm2118_vm1, %v6216_v10, -inf }
 0x4c9   :  { %v6596_v26 = vmax.f32 %v6594_v2, %v6595_v18  ;;  %v6602_v25 = vrot.slane %v6601_v60, 2  ;;  %v6609_v19 = vrot.slane %v6608_v0, 2  ;;  %v6615_v48 = vmax.f32 %v6613_v35, %v6614_v16  ;;  %v9825_v51 = vpop.f32.mrb[8].mxu1 }
 0x4ca   :  { %v6540_v33 = vmax.f32 %v6538_v55, %v6539_v62  ;;  %v6545_v45 = vmax.f32 %v6543_v57, %v6544_v61  ;;  %v6552_v12 = vmax.f32 %v6550_v32, %v6551_v50  ;;  %v6558_v8 = vrot.slane %v6557_v39, 4  ;;  %v9827_v31 = vpop.f32.mrb[9].mxu1 }
 0x4cb   :  { %v6597_v46 = vrot.slane %v6596_v26, 1  ;;  %v6603_v53 = vmax.f32 %v6601_v60, %v6602_v25  ;;  %v6610_v17 = vmax.f32 %v6608_v0, %v6609_v19  ;;  %v6616_v27 = vrot.slane %v6615_v48, 2  ;;  %v9829_v6 = vpop.f32.mrb[10].mxu1 }
 0x4cc   :  { %v6541_v9 = vrot.slane %v6540_v33, 1  ;;  %v6546_v4 = vrot.slane %v6545_v45, 2  ;;  %v6553_v42 = vrot.slane %v6552_v12, 2  ;;  %v6559_v28 = vmax.f32 %v6557_v39, %v6558_v8  ;;  %v9831_v54 = vpop.f32.mrb[11].mxu1 }
 0x4cd   :  { %v9833_v41 = vmax.f32 %v6596_v26, %v6597_v46  ;;  %v6604_v20 = vrot.slane %v6603_v53, 1  ;;  %v6611_v15 = vrot.slane %v6610_v17, 1  ;;  %v6617_v49 = vmax.f32 %v6615_v48, %v6616_v27 }
 0x4ce   :  { %v9835_v36 = vmax.f32 %v6540_v33, %v6541_v9  ;;  %v6547_v58 = vmax.f32 %v6545_v45, %v6546_v4  ;;  %v6554_v1 = vmax.f32 %v6552_v12, %v6553_v42  ;;  %v6560_v2 = vrot.slane %v6559_v28, 2 }
 0x4cf   :  { %v9837_v52 = vmax.f32 %v6603_v53, %v6604_v20  ;;  %v9839_v29 = vmax.f32 %v6610_v17, %v6611_v15  ;;  %v6618_v10 = vrot.slane %v6617_v49, 1  ;;  %v6258_v35 = vrot.slane %v9800_v59, %v8304_v43 }
 0x4d0   :  { %v6548_v55 = vrot.slane %v6547_v58, 1  ;;  %v6555_v57 = vrot.slane %v6554_v1, 1  ;;  %v6561_v32 = vmax.f32 %v6559_v28, %v6560_v2  ;;  %v6265_v18 = vrot.slane %v6251_v37, %v8304_v43 }
 0x4d1   :  { %v9847_v60 = vmax.f32 %v6617_v49, %v6618_v10  ;;  %v6266_v0 = vcombine.high %v6258_v35, %v6258_v35  ;;  %v6620_v16 = vsel %vm2118_vm1, %v6258_v35, -inf  ;;  %v6217_v62 = vcombine.high %v9803_v63, %v9803_v63  ;;  %v9852_v61 = vpop.f32.mrb[12].mxu1 }
 0x4d2   :  { %v9854_v50 = vmax.f32 %v6547_v58, %v6548_v55  ;;  %v9856_v39 = vmax.f32 %v6554_v1, %v6555_v57  ;;  %v6562_v26 = vrot.slane %v6561_v32, 1  ;;  %v6267_v25 = vcombine.high %v6265_v18, %v6265_v18  ;;  %v9858_v19 = vpop.f32.mrb[13].mxu1 }
 0x4d3   :  { %v6621_v59 = vrot.slane %v6620_v16, 4  ;;  %v6627_v37 = vsel %vm2118_vm1, %v6266_v0, -inf  ;;  %v6634_v48 = vsel %vm2118_vm1, %v6265_v18, -inf  ;;  %v6224_v33 = vrot.slane %v9803_v63, %v8304_v43  ;;  %v9864_v45 = vpop.f32.mrb[14].mxu1 }
 0x4d4   :  { %v9866_v12 = vmax.f32 %v6561_v32, %v6562_v26  ;;  %v6628_v8 = vrot.slane %v6627_v37, 4  ;;  %v6635_v46 = vrot.slane %v6634_v48, 4  ;;  %v6641_v53 = vsel %vm2118_vm1, %v6267_v25, -inf  ;;  %v9869_v17 = vpop.f32.mrb[15].mxu1 }
 0x4d5   :  { %v6622_v27 = vmax.f32 %v6620_v16, %v6621_v59  ;;  %v6642_v9 = vrot.slane %v6641_v53, 4  ;;  %v6231_v4 = vrot.slane %v6217_v62, %v8304_v43  ;;  %v6232_v42 = vcombine.high %v6224_v33, %v6224_v33 }
 0x4d6   :  { %v6629_v28 = vmax.f32 %v6627_v37, %v6628_v8  ;;  %v6636_v20 = vmax.f32 %v6634_v48, %v6635_v46  ;;  %v6564_v15 = vsel %vm2118_vm1, %v6224_v33, -inf  ;;  %v7894_v63 = vadd.f32 %v9805_v21, %v9766_v5 }
 0x4d7   :  { %v6623_v49 = vrot.slane %v6622_v27, 2  ;;  %v6643_v58 = vmax.f32 %v6641_v53, %v6642_v9  ;;  %v6233_v1 = vcombine.high %v6231_v4, %v6231_v4  ;;  %v6565_v2 = vrot.slane %v6564_v15, 4 }
 0x4d8   :  { %v6630_v10 = vrot.slane %v6629_v28, 2  ;;  %v6637_v35 = vrot.slane %v6636_v20, 2  ;;  %v6571_v55 = vsel %vm2118_vm1, %v6232_v42, -inf  ;;  %v6578_v57 = vsel %vm2118_vm1, %v6231_v4, -inf }
 0x4d9   :  { %v6624_v32 = vmax.f32 %v6622_v27, %v6623_v49  ;;  %v6644_v18 = vrot.slane %v6643_v58, 2  ;;  %v6566_v0 = vmax.f32 %v6564_v15, %v6565_v2  ;;  %v6572_v16 = vrot.slane %v6571_v55, 4 }
 0x4da   :  { %v6631_v62 = vmax.f32 %v6629_v28, %v6630_v10  ;;  %v6638_v26 = vmax.f32 %v6636_v20, %v6637_v35  ;;  %v6579_v25 = vrot.slane %v6578_v57, 4  ;;  %v6585_v59 = vsel %vm2118_vm1, %v6233_v1, -inf }
 0x4db   :  { %v6625_v5 = vrot.slane %v6624_v32, 1  ;;  %v6645_v21 = vmax.f32 %v6643_v58, %v6644_v18  ;;  %v6567_v37 = vrot.slane %v6566_v0, 2  ;;  %v6573_v48 = vmax.f32 %v6571_v55, %v6572_v16 }
 0x4dc   :  { %v6632_v33 = vrot.slane %v6631_v62, 1  ;;  %v6639_v8 = vrot.slane %v6638_v26, 1  ;;  %v6580_v46 = vmax.f32 %v6578_v57, %v6579_v25  ;;  %v6586_v53 = vrot.slane %v6585_v59, 4 }
 0x4dd   :  { %v6626_v9 = vmax.f32 %v6624_v32, %v6625_v5  ;;  %v6646_v42 = vrot.slane %v6645_v21, 1  ;;  %v6568_v4 = vmax.f32 %v6566_v0, %v6567_v37  ;;  %v6574_v27 = vrot.slane %v6573_v48, 2 }
 0x4de   :  { %v6633_v49 = vmax.f32 %v6631_v62, %v6632_v33  ;;  %v6640_v15 = vmax.f32 %v6638_v26, %v6639_v8  ;;  %v6581_v2 = vrot.slane %v6580_v46, 2  ;;  %v6587_v28 = vmax.f32 %v6585_v59, %v6586_v53 }
 0x4df   :  { %v6647_v20 = vmax.f32 %v6645_v21, %v6646_v42  ;;  %v6988_v10 = vmax.f32 %v9833_v41, %v6626_v9  ;;  %v6569_v1 = vrot.slane %v6568_v4, 1  ;;  %v6575_v35 = vmax.f32 %v6573_v48, %v6574_v27 }
 0x4e0   :  { %v6989_v58 = vmax.f32 %v9837_v52, %v6633_v49  ;;  %v6990_v55 = vmax.f32 %v9839_v29, %v6640_v15  ;;  %v6582_v18 = vmax.f32 %v6580_v46, %v6581_v2  ;;  %v6588_v57 = vrot.slane %v6587_v28, 2 }
 0x4e1   :  { %v6991_v32 = vmax.f32 %v9847_v60, %v6647_v20  ;;  %v6570_v16 = vmax.f32 %v6568_v4, %v6569_v1  ;;  %v6576_v0 = vrot.slane %v6575_v35, 1  ;;  %v6158_v62 = vadd.f32 %v7894_v63, %v9793_v34 }
 0x4e2   :  { %v7051_v26 = vsel %vm4207_vm2, %v6989_v58, %v6988_v10  ;;  %v6583_v25 = vrot.slane %v6582_v18, 1  ;;  %v6589_v59 = vmax.f32 %v6587_v28, %v6588_v57  ;;  %v7895_v41 = vadd.f32 %v9811_v7, %v9768_v13 }
 0x4e3   :  { %v7052_v5 = vsel %vm4209_vm3, %v6990_v55, %v7051_v26  ;;  %v6577_v52 = vmax.f32 %v6575_v35, %v6576_v0  ;;  %v6984_v29 = vmax.f32 %v9835_v36, %v6570_v16  ;;  %v6174_v21 = vmax.f32 %v6158_v62, 0.0 }
 0x4e4   :  { %v7053_v37 = vsel %vm4211_vm4, %v6991_v32, %v7052_v5  ;;  %v6584_v60 = vmax.f32 %v6582_v18, %v6583_v25  ;;  %v6590_v48 = vrot.slane %v6589_v59, 1  ;;  %v6156_v33 = vadd.f32 %v7895_v41, %v9793_v34 }
 0x4e5   :  { %7081 = vst [vmem:[%s10116_s5 + $0x4] sm:$0xf] %v7053_v37  ;;  %v6985_v63 = vmax.f32 %v9854_v50, %v6577_v52  ;;  %v6302_v8 = vcombine.high %v6174_v21, %v6174_v21  ;;  %v6309_v13 = vrot.slane %v6174_v21, %v8304_v43  ;;  %v7896_v7 = vadd.f32 %v9815_v56, %v9770_v14 }
 0x4e6   :  { %v6591_v36 = vmax.f32 %v6589_v59, %v6590_v48  ;;  %v6986_v46 = vmax.f32 %v9856_v39, %v6584_v60  ;;  %v6172_v53 = vmax.f32 %v6156_v33, 0.0  ;;  %v9900_v9 = vadd.f32 %v9819_v23, %v9772_v40 }
 0x4e7   :  { %v7048_v42 = vsel %vm4207_vm2, %v6985_v63, %v6984_v29  ;;  %v6316_v4 = vrot.slane %v6302_v8, %v8304_v43  ;;  %v6317_v27 = vcombine.high %v6309_v13, %v6309_v13  ;;  %v6704_v50 = vsel %vm2118_vm1, %v6309_v13, -inf }
 0x4e8   :  { %v6987_v49 = vmax.f32 %v9866_v12, %v6591_v36  ;;  %v7049_v15 = vsel %vm4209_vm3, %v6986_v46, %v7048_v42  ;;  %v6705_v14 = vrot.slane %v6704_v50, 4  ;;  %v6268_v56 = vcombine.high %v6172_v53, %v6172_v53 }
 0x4e9   :  { %v6318_v2 = vcombine.high %v6316_v4, %v6316_v4  ;;  %v6711_v39 = vsel %vm2118_vm1, %v6317_v27, -inf  ;;  %v6718_v28 = vsel %vm2118_vm1, %v6316_v4, -inf  ;;  %v6275_v40 = vrot.slane %v6172_v53, %v8304_v43 }
 0x4ea   :  { %v7050_v23 = vsel %vm4211_vm4, %v6987_v49, %v7049_v15  ;;  %v6706_v20 = vmax.f32 %v6704_v50, %v6705_v14  ;;  %v6712_v10 = vrot.slane %v6711_v39, 4  ;;  %v6719_v1 = vrot.slane %v6718_v28, 4 }
 0x4eb   :  { %7080 = vst [vmem:[%s10116_s5] sm:$0xf] %v7050_v23  ;;  %v6725_v12 = vsel %vm2118_vm1, %v6318_v2, -inf  ;;  %v6282_v35 = vrot.slane %v6268_v56, %v8304_v43  ;;  %v6283_v58 = vcombine.high %v6275_v40, %v6275_v40  ;;  %v6648_v55 = vsel %vm2118_vm1, %v6275_v40, -inf }
 0x4ec   :  { %v6707_v18 = vrot.slane %v6706_v20, 2  ;;  %v6713_v57 = vmax.f32 %v6711_v39, %v6712_v10  ;;  %v6720_v32 = vmax.f32 %v6718_v28, %v6719_v1  ;;  %v6726_v16 = vrot.slane %v6725_v12, 4 }
 0x4ed   :  { %v6284_v0 = vcombine.high %v6282_v35, %v6282_v35  ;;  %v6649_v62 = vrot.slane %v6648_v55, 4  ;;  %v6655_v26 = vsel %vm2118_vm1, %v6283_v58, -inf  ;;  %v6662_v25 = vsel %vm2118_vm1, %v6282_v35, -inf }
 0x4ee   :  { %v6708_v59 = vmax.f32 %v6706_v20, %v6707_v18  ;;  %v6714_v41 = vrot.slane %v6713_v57, 2  ;;  %v6721_v5 = vrot.slane %v6720_v32, 2  ;;  %v6727_v52 = vmax.f32 %v6725_v12, %v6726_v16 }
 0x4ef   :  { %v6650_v29 = vmax.f32 %v6648_v55, %v6649_v62  ;;  %v6656_v21 = vrot.slane %v6655_v26, 4  ;;  %v6663_v37 = vrot.slane %v6662_v25, 4  ;;  %v6669_v60 = vsel %vm2118_vm1, %v6284_v0, -inf }
 0x4f0   :  { %v6709_v48 = vrot.slane %v6708_v59, 1  ;;  %v6715_v33 = vmax.f32 %v6713_v57, %v6714_v41  ;;  %v6722_v63 = vmax.f32 %v6720_v32, %v6721_v5  ;;  %v6728_v8 = vrot.slane %v6727_v52, 2 }
 0x4f1   :  { %v6651_v13 = vrot.slane %v6650_v29, 2  ;;  %v6657_v36 = vmax.f32 %v6655_v26, %v6656_v21  ;;  %v6664_v46 = vmax.f32 %v6662_v25, %v6663_v37  ;;  %v6670_v53 = vrot.slane %v6669_v60, 4 }
 0x4f2   :  { %v9920_v42 = vmax.f32 %v6708_v59, %v6709_v48  ;;  %v6716_v4 = vrot.slane %v6715_v33, 1  ;;  %v6723_v27 = vrot.slane %v6722_v63, 1  ;;  %v6729_v50 = vmax.f32 %v6727_v52, %v6728_v8 }
 0x4f3   :  { %v6652_v49 = vmax.f32 %v6650_v29, %v6651_v13  ;;  %v6658_v15 = vrot.slane %v6657_v36, 2  ;;  %v6665_v14 = vrot.slane %v6664_v46, 2  ;;  %v6671_v56 = vmax.f32 %v6669_v60, %v6670_v53 }
 0x4f4   :  { %v9922_v2 = vmax.f32 %v6715_v33, %v6716_v4  ;;  %v9924_v39 = vmax.f32 %v6722_v63, %v6723_v27  ;;  %v6730_v28 = vrot.slane %v6729_v50, 1  ;;  %v6159_v40 = vadd.f32 %v7896_v7, %v9793_v34 }
 0x4f5   :  { %v6653_v23 = vrot.slane %v6652_v49, 1  ;;  %v6659_v20 = vmax.f32 %v6657_v36, %v6658_v15  ;;  %v6666_v10 = vmax.f32 %v6664_v46, %v6665_v14  ;;  %v6672_v1 = vrot.slane %v6671_v56, 2 }
 0x4f6   :  { %v9927_v12 = vmax.f32 %v6729_v50, %v6730_v28  ;;  %v6175_v35 = vmax.f32 %v6159_v40, 0.0  ;;  %v6157_v58 = vadd.f32 %v9900_v9, %v9793_v34  ;;  %v7898_v55 = vadd.f32 %v9825_v51, %v9774_v44 }
 0x4f7   :  { %v9933_v18 = vmax.f32 %v6652_v49, %v6653_v23  ;;  %v6660_v57 = vrot.slane %v6659_v20, 1  ;;  %v6667_v32 = vrot.slane %v6666_v10, 1  ;;  %v6673_v16 = vmax.f32 %v6671_v56, %v6672_v1 }
 0x4f8   :  { %v6319_v0 = vcombine.high %v6175_v35, %v6175_v35  ;;  %v6326_v7 = vrot.slane %v6175_v35, %v8304_v43  ;;  %v6173_v62 = vmax.f32 %v6157_v58, 0.0  ;;  %v6162_v26 = vadd.f32 %v7898_v55, %v9793_v34 }
 0x4f9   :  { %v9937_v25 = vmax.f32 %v6659_v20, %v6660_v57  ;;  %v9939_v59 = vmax.f32 %v6666_v10, %v6667_v32  ;;  %v6674_v41 = vrot.slane %v6673_v16, 1  ;;  %v9943_v9 = vadd.f32 %v9827_v31, %v9776_v24 }
 0x4fa   :  { %v6333_v44 = vrot.slane %v6319_v0, %v8304_v43  ;;  %v6334_v51 = vcombine.high %v6326_v7, %v6326_v7  ;;  %v6732_v5 = vsel %vm2118_vm1, %v6326_v7, -inf  ;;  %v6285_v52 = vcombine.high %v6173_v62, %v6173_v62 }
 0x4fb   :  { %v9947_v29 = vmax.f32 %v6673_v16, %v6674_v41  ;;  %v6733_v21 = vrot.slane %v6732_v5, 4  ;;  %v6292_v37 = vrot.slane %v6173_v62, %v8304_v43  ;;  %v9950_v60 = vmax.f32 %v6162_v26, 0.0 }
 0x4fc   :  { %v6335_v48 = vcombine.high %v6333_v44, %v6333_v44  ;;  %v6739_v33 = vsel %vm2118_vm1, %v6334_v51, -inf  ;;  %v6746_v63 = vsel %vm2118_vm1, %v6333_v44, -inf  ;;  %v6299_v24 = vrot.slane %v6285_v52, %v8304_v43 }
 0x4fd   :  { %v6734_v31 = vmax.f32 %v6732_v5, %v6733_v21  ;;  %v6740_v8 = vrot.slane %v6739_v33, 4  ;;  %v6747_v13 = vrot.slane %v6746_v63, 4  ;;  %v6300_v36 = vcombine.high %v6292_v37, %v6292_v37 }
 0x4fe   :  { %v6753_v46 = vsel %vm2118_vm1, %v6335_v48, -inf  ;;  %v6301_v53 = vcombine.high %v6299_v24, %v6299_v24  ;;  %v6676_v4 = vsel %vm2118_vm1, %v6292_v37, -inf  ;;  %v6690_v27 = vsel %vm2118_vm1, %v6299_v24, -inf }
 0x4ff   :  { %v6735_v50 = vrot.slane %v6734_v31, 2  ;;  %v6741_v49 = vmax.f32 %v6739_v33, %v6740_v8  ;;  %v6748_v15 = vmax.f32 %v6746_v63, %v6747_v13  ;;  %v6754_v14 = vrot.slane %v6753_v46, 4 }
 0x500   :  { %v6677_v56 = vrot.slane %v6676_v4, 4  ;;  %v6683_v28 = vsel %vm2118_vm1, %v6300_v36, -inf  ;;  %v6691_v40 = vrot.slane %v6690_v27, 4  ;;  %v6697_v23 = vsel %vm2118_vm1, %v6301_v53, -inf }
 0x501   :  { %v6736_v20 = vmax.f32 %v6734_v31, %v6735_v50  ;;  %v6742_v10 = vrot.slane %v6741_v49, 2  ;;  %v6749_v1 = vrot.slane %v6748_v15, 2  ;;  %v6755_v35 = vmax.f32 %v6753_v46, %v6754_v14 }
 0x502   :  { %v6678_v58 = vmax.f32 %v6676_v4, %v6677_v56  ;;  %v6684_v55 = vrot.slane %v6683_v28, 4  ;;  %v6692_v57 = vmax.f32 %v6690_v27, %v6691_v40  ;;  %v6698_v32 = vrot.slane %v6697_v23, 4 }
 0x503   :  { %v6737_v16 = vrot.slane %v6736_v20, 1  ;;  %v6743_v0 = vmax.f32 %v6741_v49, %v6742_v10  ;;  %v6750_v7 = vmax.f32 %v6748_v15, %v6749_v1  ;;  %v6756_v62 = vrot.slane %v6755_v35, 2 }
 0x504   :  { %v6679_v26 = vrot.slane %v6678_v58, 2  ;;  %v6685_v41 = vmax.f32 %v6683_v28, %v6684_v55  ;;  %v6693_v44 = vrot.slane %v6692_v57, 2  ;;  %v6699_v51 = vmax.f32 %v6697_v23, %v6698_v32 }
 0x505   :  { %v6738_v5 = vmax.f32 %v6736_v20, %v6737_v16  ;;  %v6744_v52 = vrot.slane %v6743_v0, 1  ;;  %v6751_v21 = vrot.slane %v6750_v7, 1  ;;  %v6757_v37 = vmax.f32 %v6755_v35, %v6756_v62 }
 0x506   :  { %v6680_v48 = vmax.f32 %v6678_v58, %v6679_v26  ;;  %v6686_v33 = vrot.slane %v6685_v41, 2  ;;  %v6694_v63 = vmax.f32 %v6692_v57, %v6693_v44  ;;  %v6700_v24 = vrot.slane %v6699_v51, 2 }
 0x507   :  { %v6745_v31 = vmax.f32 %v6743_v0, %v6744_v52  ;;  %v6752_v8 = vmax.f32 %v6750_v7, %v6751_v21  ;;  %v6758_v13 = vrot.slane %v6757_v37, 1  ;;  %v6996_v36 = vmax.f32 %v9920_v42, %v6738_v5 }
 0x508   :  { %v6681_v46 = vrot.slane %v6680_v48, 1  ;;  %v6687_v53 = vmax.f32 %v6685_v41, %v6686_v33  ;;  %v6695_v4 = vrot.slane %v6694_v63, 1  ;;  %v6701_v27 = vmax.f32 %v6699_v51, %v6700_v24 }
 0x509   :  { %v6759_v50 = vmax.f32 %v6757_v37, %v6758_v13  ;;  %v6997_v49 = vmax.f32 %v9922_v2, %v6745_v31  ;;  %v6998_v15 = vmax.f32 %v9924_v39, %v6752_v8  ;;  %v6370_v14 = vcombine.high %v9950_v60, %v9950_v60 }
 0x50a   :  { %v6682_v56 = vmax.f32 %v6680_v48, %v6681_v46  ;;  %v6688_v28 = vrot.slane %v6687_v53, 1  ;;  %v6696_v40 = vmax.f32 %v6694_v63, %v6695_v4  ;;  %v6702_v23 = vrot.slane %v6701_v27, 1 }
 0x50b   :  { %v6999_v20 = vmax.f32 %v9927_v12, %v6759_v50  ;;  %v7057_v42 = vsel %vm4207_vm2, %v6997_v49, %v6996_v36  ;;  %v6377_v10 = vrot.slane %v9950_v60, %v8304_v43  ;;  %v6384_v1 = vrot.slane %v6370_v14, %v8304_v43 }
 0x50c   :  { %v7058_v2 = vsel %vm4209_vm3, %v6998_v15, %v7057_v42  ;;  %v6689_v35 = vmax.f32 %v6687_v53, %v6688_v28  ;;  %v6703_v39 = vmax.f32 %v6701_v27, %v6702_v23  ;;  %v6992_v58 = vmax.f32 %v9933_v18, %v6682_v56 }
 0x50d   :  { %v7059_v55 = vsel %vm4211_vm4, %v6999_v20, %v7058_v2  ;;  %v6994_v57 = vmax.f32 %v9939_v59, %v6696_v40  ;;  %v6385_v32 = vcombine.high %v6377_v10, %v6377_v10  ;;  %v6386_v16 = vcombine.high %v6384_v1, %v6384_v1 }
 0x50e   :  { %7083 = vst [vmem:[%s10116_s5 + $0xc] sm:$0xf] %v7059_v55  ;;  %v6993_v12 = vmax.f32 %v9937_v25, %v6689_v35  ;;  %v6995_v60 = vmax.f32 %v9947_v29, %v6703_v39  ;;  %v6816_v0 = vsel %vm2118_vm1, %v6377_v10, -inf  ;;  %v6830_v7 = vsel %vm2118_vm1, %v6384_v1, -inf }
 0x50f   :  { %v6817_v62 = vrot.slane %v6816_v0, 4  ;;  %v6823_v18 = vsel %vm2118_vm1, %v6385_v32, -inf  ;;  %v6831_v26 = vrot.slane %v6830_v7, 4  ;;  %v6837_v59 = vsel %vm2118_vm1, %v6386_v16, -inf }
 0x510   :  { %v7054_v41 = vsel %vm4207_vm2, %v6993_v12, %v6992_v58  ;;  %v6824_v44 = vrot.slane %v6823_v18, 4  ;;  %v6838_v51 = vrot.slane %v6837_v59, 4  ;;  %v6160_v5 = vadd.f32 %v9943_v9, %v9793_v34 }
 0x511   :  { %v7055_v25 = vsel %vm4209_vm3, %v6994_v57, %v7054_v41  ;;  %v6818_v29 = vmax.f32 %v6816_v0, %v6817_v62  ;;  %v6832_v52 = vmax.f32 %v6830_v7, %v6831_v26  ;;  %v7900_v21 = vadd.f32 %v9829_v6, %v9778_v38 }
 0x512   :  { %v7056_v37 = vsel %vm4211_vm4, %v6995_v60, %v7055_v25  ;;  %v6825_v48 = vmax.f32 %v6823_v18, %v6824_v44  ;;  %v6839_v33 = vmax.f32 %v6837_v59, %v6838_v51  ;;  %v6176_v63 = vmax.f32 %v6160_v5, 0.0 }
 0x513   :  { %7082 = vst [vmem:[%s10116_s5 + $0x8] sm:$0xf] %v7056_v37  ;;  %v6819_v24 = vrot.slane %v6818_v29, 2  ;;  %v6833_v31 = vrot.slane %v6832_v52, 2  ;;  %v6163_v9 = vadd.f32 %v7900_v21, %v9793_v34  ;;  %v7901_v8 = vadd.f32 %v9831_v54, %v9780_v3 }
 0x514   :  { %v6826_v13 = vrot.slane %v6825_v48, 2  ;;  %v6840_v36 = vrot.slane %v6839_v33, 2  ;;  %v6336_v46 = vcombine.high %v6176_v63, %v6176_v63  ;;  %v6343_v38 = vrot.slane %v6176_v63, %v8304_v43 }
 0x515   :  { %v6820_v6 = vmax.f32 %v6818_v29, %v6819_v24  ;;  %v6834_v53 = vmax.f32 %v6832_v52, %v6833_v31  ;;  %v6179_v4 = vmax.f32 %v6163_v9, 0.0  ;;  %v6161_v27 = vadd.f32 %v7901_v8, %v9793_v34 }
 0x516   :  { %v6827_v50 = vmax.f32 %v6825_v48, %v6826_v13  ;;  %v6841_v49 = vmax.f32 %v6839_v33, %v6840_v36  ;;  %v6350_v15 = vrot.slane %v6336_v46, %v8304_v43  ;;  %v6351_v14 = vcombine.high %v6343_v38, %v6343_v38 }
 0x517   :  { %v6821_v56 = vrot.slane %v6820_v6, 1  ;;  %v6835_v28 = vrot.slane %v6834_v53, 1  ;;  %v6760_v40 = vsel %vm2118_vm1, %v6343_v38, -inf  ;;  %v6387_v3 = vcombine.high %v6179_v4, %v6179_v4 }
 0x518   :  { %v6828_v54 = vrot.slane %v6827_v50, 1  ;;  %v6842_v23 = vrot.slane %v6841_v49, 1  ;;  %v6352_v20 = vcombine.high %v6350_v15, %v6350_v15  ;;  %v6761_v42 = vrot.slane %v6760_v40, 4 }
 0x519   :  { %v10000_v10 = vmax.f32 %v6820_v6, %v6821_v56  ;;  %v10002_v1 = vmax.f32 %v6834_v53, %v6835_v28  ;;  %v6767_v2 = vsel %vm2118_vm1, %v6351_v14, -inf  ;;  %v6774_v35 = vsel %vm2118_vm1, %v6350_v15, -inf }
 0x51a   :  { %v10006_v39 = vmax.f32 %v6827_v50, %v6828_v54  ;;  %v10008_v58 = vmax.f32 %v6841_v49, %v6842_v23  ;;  %v6762_v55 = vmax.f32 %v6760_v40, %v6761_v42  ;;  %v6768_v57 = vrot.slane %v6767_v2, 4 }
 0x51b   :  { %v6775_v32 = vrot.slane %v6774_v35, 4  ;;  %v6781_v16 = vsel %vm2118_vm1, %v6352_v20, -inf  ;;  %v6394_v12 = vrot.slane %v6179_v4, %v8304_v43  ;;  %v6401_v60 = vrot.slane %v6387_v3, %v8304_v43 }
 0x51c   :  { %v6763_v0 = vrot.slane %v6762_v55, 2  ;;  %v6769_v7 = vmax.f32 %v6767_v2, %v6768_v57  ;;  %v6782_v62 = vrot.slane %v6781_v16, 4  ;;  %v6177_v18 = vmax.f32 %v6161_v27, 0.0 }
 0x51d   :  { %v6776_v26 = vmax.f32 %v6774_v35, %v6775_v32  ;;  %v6402_v59 = vcombine.high %v6394_v12, %v6394_v12  ;;  %v6403_v41 = vcombine.high %v6401_v60, %v6401_v60  ;;  %v6844_v44 = vsel %vm2118_vm1, %v6394_v12, -inf }
 0x51e   :  { %v6764_v51 = vmax.f32 %v6762_v55, %v6763_v0  ;;  %v6770_v5 = vrot.slane %v6769_v7, 2  ;;  %v6783_v25 = vmax.f32 %v6781_v16, %v6782_v62  ;;  %v6845_v29 = vrot.slane %v6844_v44, 4 }
 0x51f   :  { %v6777_v52 = vrot.slane %v6776_v26, 2  ;;  %v6851_v21 = vsel %vm2118_vm1, %v6402_v59, -inf  ;;  %v6858_v37 = vsel %vm2118_vm1, %v6401_v60, -inf  ;;  %v6865_v48 = vsel %vm2118_vm1, %v6403_v41, -inf }
 0x520   :  { %v6765_v33 = vrot.slane %v6764_v51, 1  ;;  %v6771_v63 = vmax.f32 %v6769_v7, %v6770_v5  ;;  %v6784_v24 = vrot.slane %v6783_v25, 2  ;;  %v6846_v31 = vmax.f32 %v6844_v44, %v6845_v29 }
 0x521   :  { %v6778_v9 = vmax.f32 %v6776_v26, %v6777_v52  ;;  %v6852_v8 = vrot.slane %v6851_v21, 4  ;;  %v6859_v13 = vrot.slane %v6858_v37, 4  ;;  %v6866_v36 = vrot.slane %v6865_v48, 4 }
 0x522   :  { %v10017_v46 = vmax.f32 %v6764_v51, %v6765_v33  ;;  %v6772_v38 = vrot.slane %v6771_v63, 1  ;;  %v6785_v6 = vmax.f32 %v6783_v25, %v6784_v24  ;;  %v6847_v53 = vrot.slane %v6846_v31, 2 }
 0x523   :  { %v6779_v4 = vrot.slane %v6778_v9, 1  ;;  %v6853_v27 = vmax.f32 %v6851_v21, %v6852_v8  ;;  %v6860_v50 = vmax.f32 %v6858_v37, %v6859_v13  ;;  %v6867_v49 = vmax.f32 %v6865_v48, %v6866_v36 }
 0x524   :  { %v10019_v15 = vmax.f32 %v6771_v63, %v6772_v38  ;;  %v6786_v14 = vrot.slane %v6785_v6, 1  ;;  %v6848_v56 = vmax.f32 %v6846_v31, %v6847_v53  ;;  %v6353_v28 = vcombine.high %v6177_v18, %v6177_v18 }
 0x525   :  { %v10021_v40 = vmax.f32 %v6778_v9, %v6779_v4  ;;  %v6854_v3 = vrot.slane %v6853_v27, 2  ;;  %v6861_v54 = vrot.slane %v6860_v50, 2  ;;  %v6868_v23 = vrot.slane %v6867_v49, 2 }
 0x526   :  { %v10023_v20 = vmax.f32 %v6785_v6, %v6786_v14  ;;  %v6849_v42 = vrot.slane %v6848_v56, 1  ;;  %v6360_v2 = vrot.slane %v6177_v18, %v8304_v43  ;;  %v6367_v35 = vrot.slane %v6353_v28, %v8304_v43 }
 0x527   :  { %v6855_v55 = vmax.f32 %v6853_v27, %v6854_v3  ;;  %v6862_v57 = vmax.f32 %v6860_v50, %v6861_v54  ;;  %v6869_v32 = vmax.f32 %v6867_v49, %v6868_v23  ;;  %v7902_v16 = vadd.f32 %v9852_v61, %v9782_v30 }
 0x528   :  { %v6850_v12 = vmax.f32 %v6848_v56, %v6849_v42  ;;  %v6368_v60 = vcombine.high %v6360_v2, %v6360_v2  ;;  %v6369_v0 = vcombine.high %v6367_v35, %v6367_v35  ;;  %v6788_v7 = vsel %vm2118_vm1, %v6360_v2, -inf }
 0x529   :  { %v6856_v62 = vrot.slane %v6855_v55, 1  ;;  %v6863_v26 = vrot.slane %v6862_v57, 1  ;;  %v6870_v59 = vrot.slane %v6869_v32, 1  ;;  %v6789_v41 = vrot.slane %v6788_v7, 4 }
 0x52a   :  { %v7004_v44 = vmax.f32 %v10000_v10, %v6850_v12  ;;  %v6795_v18 = vsel %vm2118_vm1, %v6368_v60, -inf  ;;  %v6802_v51 = vsel %vm2118_vm1, %v6367_v35, -inf  ;;  %v6809_v5 = vsel %vm2118_vm1, %v6369_v0, -inf }
 0x52b   :  { %v6857_v25 = vmax.f32 %v6855_v55, %v6856_v62  ;;  %v6864_v29 = vmax.f32 %v6862_v57, %v6863_v26  ;;  %v6871_v30 = vmax.f32 %v6869_v32, %v6870_v59  ;;  %v6790_v61 = vmax.f32 %v6788_v7, %v6789_v41 }
 0x52c   :  { %v6796_v52 = vrot.slane %v6795_v18, 4  ;;  %v6803_v21 = vrot.slane %v6802_v51, 4  ;;  %v6810_v37 = vrot.slane %v6809_v5, 4  ;;  %v6166_v48 = vadd.f32 %v7902_v16, %v9793_v34 }
 0x52d   :  { %v7005_v33 = vmax.f32 %v10006_v39, %v6857_v25  ;;  %v7006_v63 = vmax.f32 %v10002_v1, %v6864_v29  ;;  %v7007_v10 = vmax.f32 %v10008_v58, %v6871_v30  ;;  %v6791_v24 = vrot.slane %v6790_v61, 2 }
 0x52e   :  { %v6797_v31 = vmax.f32 %v6795_v18, %v6796_v52  ;;  %v6804_v9 = vmax.f32 %v6802_v51, %v6803_v21  ;;  %v6811_v8 = vmax.f32 %v6809_v5, %v6810_v37  ;;  %v6182_v13 = vmax.f32 %v6166_v48, 0.0 }
 0x52f   :  { %v7063_v36 = vsel %vm4207_vm2, %v7005_v33, %v7004_v44  ;;  %v6792_v38 = vmax.f32 %v6790_v61, %v6791_v24  ;;  %v7903_v6 = vadd.f32 %v9858_v19, %v9784_v22  ;;  %v7904_v53 = vadd.f32 %v9864_v45, %v9786_v47 }
 0x530   :  { %v7064_v39 = vsel %vm4209_vm3, %v7006_v63, %v7063_v36  ;;  %v6798_v4 = vrot.slane %v6797_v31, 2  ;;  %v6805_v1 = vrot.slane %v6804_v9, 2  ;;  %v6812_v27 = vrot.slane %v6811_v8, 2 }
 0x531   :  { %v7065_v58 = vsel %vm4211_vm4, %v7007_v10, %v7064_v39  ;;  %v6793_v50 = vrot.slane %v6792_v38, 1  ;;  %v6438_v49 = vcombine.high %v6182_v13, %v6182_v13  ;;  %v6445_v14 = vrot.slane %v6182_v13, %v8304_v43 }
 0x532   :  { %7085 = vst [vmem:[%s10116_s5 + $0x14] sm:$0xf] %v7065_v58  ;;  %v6799_v56 = vmax.f32 %v6797_v31, %v6798_v4  ;;  %v6806_v22 = vmax.f32 %v6804_v9, %v6805_v1  ;;  %v6813_v19 = vmax.f32 %v6811_v8, %v6812_v27  ;;  %v6164_v47 = vadd.f32 %v7903_v6, %v9793_v34 }
 0x533   :  { %v6794_v45 = vmax.f32 %v6792_v38, %v6793_v50  ;;  %v6452_v28 = vrot.slane %v6438_v49, %v8304_v43  ;;  %v6453_v3 = vcombine.high %v6445_v14, %v6445_v14  ;;  %v6928_v54 = vsel %vm2118_vm1, %v6445_v14, -inf }
 0x534   :  { %v6800_v23 = vrot.slane %v6799_v56, 1  ;;  %v6807_v42 = vrot.slane %v6806_v22, 1  ;;  %v6814_v2 = vrot.slane %v6813_v19, 1  ;;  %v6929_v35 = vrot.slane %v6928_v54, 4 }
 0x535   :  { %v7000_v55 = vmax.f32 %v10017_v46, %v6794_v45  ;;  %v6454_v57 = vcombine.high %v6452_v28, %v6452_v28  ;;  %v6935_v32 = vsel %vm2118_vm1, %v6453_v3, -inf  ;;  %v6942_v16 = vsel %vm2118_vm1, %v6452_v28, -inf }
 0x536   :  { %v6801_v12 = vmax.f32 %v6799_v56, %v6800_v23  ;;  %v6808_v60 = vmax.f32 %v6806_v22, %v6807_v42  ;;  %v6815_v34 = vmax.f32 %v6813_v19, %v6814_v2  ;;  %v6930_v0 = vmax.f32 %v6928_v54, %v6929_v35 }
 0x537   :  { %v6936_v7 = vrot.slane %v6935_v32, 4  ;;  %v6943_v62 = vrot.slane %v6942_v16, 4  ;;  %v6949_v26 = vsel %vm2118_vm1, %v6454_v57, -inf  ;;  %v6180_v59 = vmax.f32 %v6164_v47, 0.0 }
 0x538   :  { %v7001_v41 = vmax.f32 %v10019_v15, %v6801_v12  ;;  %v7002_v44 = vmax.f32 %v10021_v40, %v6808_v60  ;;  %v7003_v46 = vmax.f32 %v10023_v20, %v6815_v34  ;;  %v6931_v18 = vrot.slane %v6930_v0, 2  ;;  %v8131_v15 = vld [vmem:[%s10115_s4] ss:$0 sm:$0xff] }
 0x539   :  { %v6937_v51 = vmax.f32 %v6935_v32, %v6936_v7  ;;  %v6944_v5 = vmax.f32 %v6942_v16, %v6943_v62  ;;  %v6950_v25 = vrot.slane %v6949_v26, 4  ;;  %v6404_v29 = vcombine.high %v6180_v59, %v6180_v59 }
 0x53a   :  { %v7060_v30 = vsel %vm4207_vm2, %v7001_v41, %v7000_v55  ;;  %v6411_v61 = vrot.slane %v6180_v59, %v8304_v43  ;;  %v6167_v37 = vadd.f32 %v8131_v15, %v7904_v53  ;;  %v6932_v63 = vmax.f32 %v6930_v0, %v6931_v18 }
 0x53b   :  { %v7061_v52 = vsel %vm4209_vm3, %v7002_v44, %v7060_v30  ;;  %v6951_v21 = vmax.f32 %v6949_v26, %v6950_v25  ;;  %v6938_v20 = vrot.slane %v6937_v51, 2  ;;  %v6418_v48 = vrot.slane %v6404_v29, %v8304_v43 }
 0x53c   :  { %v7062_v40 = vsel %vm4211_vm4, %v7003_v46, %v7061_v52  ;;  %v6419_v33 = vcombine.high %v6411_v61, %v6411_v61  ;;  %v6945_v10 = vrot.slane %v6944_v5, 2  ;;  %v6872_v24 = vsel %vm2118_vm1, %v6411_v61, -inf }
 0x53d   :  { %7084 = vst [vmem:[%s10116_s5 + $0x10] sm:$0xf] %v7062_v40  ;;  %v6952_v31 = vrot.slane %v6951_v21, 2  ;;  %v6873_v9 = vrot.slane %v6872_v24, 4  ;;  %v6420_v13 = vcombine.high %v6418_v48, %v6418_v48  ;;  %v6939_v36 = vmax.f32 %v6937_v51, %v6938_v20 }
 0x53e   :  { %v6879_v8 = vsel %vm2118_vm1, %v6419_v33, -inf  ;;  %v6183_v6 = vmax.f32 %v6167_v37, 0.0  ;;  %v6933_v53 = vrot.slane %v6932_v63, 1  ;;  %v6946_v39 = vmax.f32 %v6944_v5, %v6945_v10 }
 0x53f   :  { %v6880_v38 = vrot.slane %v6879_v8, 4  ;;  %v6886_v4 = vsel %vm2118_vm1, %v6418_v48, -inf  ;;  %v6953_v1 = vmax.f32 %v6951_v21, %v6952_v31  ;;  %v6874_v27 = vmax.f32 %v6872_v24, %v6873_v9 }
 0x540   :  { %v6455_v58 = vcombine.high %v6183_v6, %v6183_v6  ;;  %v6893_v50 = vsel %vm2118_vm1, %v6420_v13, -inf  ;;  %v6462_v49 = vrot.slane %v6183_v6, %v8304_v43  ;;  %v7905_v14 = vadd.f32 %v9869_v17, %v9788_v11 }
 0x541   :  { %v6940_v56 = vrot.slane %v6939_v36, 1  ;;  %v6881_v22 = vmax.f32 %v6879_v8, %v6880_v38  ;;  %v6887_v19 = vrot.slane %v6886_v4, 4  ;;  %v10078_v45 = vmax.f32 %v6932_v63, %v6933_v53 }
 0x542   :  { %v6469_v47 = vrot.slane %v6455_v58, %v8304_v43  ;;  %v6947_v28 = vrot.slane %v6946_v39, 1  ;;  %v6470_v3 = vcombine.high %v6462_v49, %v6462_v49  ;;  %v6956_v54 = vsel %vm2118_vm1, %v6462_v49, -inf }
 0x543   :  { %v6954_v23 = vrot.slane %v6953_v1, 1  ;;  %v6875_v42 = vrot.slane %v6874_v27, 2  ;;  %v6894_v2 = vrot.slane %v6893_v50, 4  ;;  %v6957_v55 = vrot.slane %v6956_v54, 4 }
 0x544   :  { %v6471_v35 = vcombine.high %v6469_v47, %v6469_v47  ;;  %v6963_v57 = vsel %vm2118_vm1, %v6470_v3, -inf  ;;  %v6970_v11 = vsel %vm2118_vm1, %v6469_v47, -inf  ;;  %v6165_v17 = vadd.f32 %v8131_v15, %v7905_v14 }
 0x545   :  { %v6941_v32 = vmax.f32 %v6939_v36, %v6940_v56  ;;  %v6882_v16 = vrot.slane %v6881_v22, 2  ;;  %v6888_v12 = vmax.f32 %v6886_v4, %v6887_v19  ;;  %v6964_v60 = vrot.slane %v6963_v57, 4 }
 0x546   :  { %v6948_v34 = vmax.f32 %v6946_v39, %v6947_v28  ;;  %v6958_v0 = vmax.f32 %v6956_v54, %v6957_v55  ;;  %v6971_v7 = vrot.slane %v6970_v11, 4  ;;  %v6977_v62 = vsel %vm2118_vm1, %v6471_v35, -inf }
 0x547   :  { %v10084_v26 = vmax.f32 %v6874_v27, %v6875_v42  ;;  %v6895_v59 = vmax.f32 %v6893_v50, %v6894_v2  ;;  %v6965_v41 = vmax.f32 %v6963_v57, %v6964_v60  ;;  %v6978_v44 = vrot.slane %v6977_v62, 4 }
 0x548   :  { %v6955_v46 = vmax.f32 %v6953_v1, %v6954_v23  ;;  %v6959_v18 = vrot.slane %v6958_v0, 2  ;;  %v6972_v51 = vmax.f32 %v6970_v11, %v6971_v7  ;;  %v6181_v5 = vmax.f32 %v6165_v17, 0.0 }
 0x549   :  { %v10086_v25 = vmax.f32 %v6881_v22, %v6882_v16  ;;  %v6889_v29 = vrot.slane %v6888_v12, 2  ;;  %v6966_v30 = vrot.slane %v6965_v41, 2  ;;  %v6979_v61 = vmax.f32 %v6977_v62, %v6978_v44 }
 0x54a   :  { %v6960_v52 = vmax.f32 %v6958_v0, %v6959_v18  ;;  %v6973_v21 = vrot.slane %v6972_v51, 2  ;;  %v6421_v15 = vcombine.high %v6181_v5, %v6181_v5  ;;  %v6428_v37 = vrot.slane %v6181_v5, %v8304_v43 }
 0x54b   :  { %v6877_v40 = vrot.slane %v10084_v26, 1  ;;  %v6896_v20 = vrot.slane %v6895_v59, 2  ;;  %v6967_v48 = vmax.f32 %v6965_v41, %v6966_v30  ;;  %v6980_v33 = vrot.slane %v6979_v61, 2 }
 0x54c   :  { %v6961_v63 = vrot.slane %v6960_v52, 1  ;;  %v6974_v10 = vmax.f32 %v6972_v51, %v6973_v21  ;;  %v6435_v24 = vrot.slane %v6421_v15, %v8304_v43  ;;  %v6436_v31 = vcombine.high %v6428_v37, %v6428_v37 }
 0x54d   :  { %v6890_v9 = vmax.f32 %v6888_v12, %v6889_v29  ;;  %v6968_v8 = vrot.slane %v6967_v48, 1  ;;  %v6981_v13 = vmax.f32 %v6979_v61, %v6980_v33  ;;  %v6900_v36 = vsel %vm2118_vm1, %v6428_v37, -inf }
 0x54e   :  { %v6962_v38 = vmax.f32 %v6960_v52, %v6961_v63  ;;  %v6975_v6 = vrot.slane %v6974_v10, 1  ;;  %v6437_v53 = vcombine.high %v6435_v24, %v6435_v24  ;;  %v6901_v39 = vrot.slane %v6900_v36, 4 }
 0x54f   :  { %v6969_v4 = vmax.f32 %v6967_v48, %v6968_v8  ;;  %v6982_v1 = vrot.slane %v6981_v13, 1  ;;  %v6907_v27 = vsel %vm2118_vm1, %v6436_v31, -inf  ;;  %v6914_v58 = vsel %vm2118_vm1, %v6435_v24, -inf }
 0x550   :  { %v6976_v50 = vmax.f32 %v6974_v10, %v6975_v6  ;;  %v7012_v49 = vmax.f32 %v10078_v45, %v6962_v38  ;;  %v6902_v43 = vmax.f32 %v6900_v36, %v6901_v39  ;;  %v6908_v14 = vrot.slane %v6907_v27, 4 }
 0x551   :  { %v6983_v56 = vmax.f32 %v6981_v13, %v6982_v1  ;;  %v7013_v22 = vmax.f32 %v6941_v32, %v6969_v4  ;;  %v6915_v19 = vrot.slane %v6914_v58, 4  ;;  %v6921_v47 = vsel %vm2118_vm1, %v6437_v53, -inf }
 0x552   :  { %v7014_v28 = vmax.f32 %v6948_v34, %v6976_v50  ;;  %v6903_v3 = vrot.slane %v6902_v43, 2  ;;  %v6909_v54 = vmax.f32 %v6907_v27, %v6908_v14  ;;  %v6922_v23 = vrot.slane %v6921_v47, 4 }
 0x553   :  { %v6897_v42 = vmax.f32 %v6895_v59, %v6896_v20  ;;  %v7015_v2 = vmax.f32 %v6955_v46, %v6983_v56  ;;  %v7069_v35 = vsel %vm4207_vm2, %v7013_v22, %v7012_v49  ;;  %v6916_v55 = vmax.f32 %v6914_v58, %v6915_v19 }
 0x554   :  { %v7070_v57 = vsel %vm4209_vm3, %v7014_v28, %v7069_v35  ;;  %v6904_v11 = vmax.f32 %v6902_v43, %v6903_v3  ;;  %v6910_v45 = vrot.slane %v6909_v54, 2  ;;  %v6923_v17 = vmax.f32 %v6921_v47, %v6922_v23 }
 0x555   :  { %v7071_v16 = vsel %vm4211_vm4, %v7015_v2, %v7070_v57  ;;  %v6917_v32 = vrot.slane %v6916_v55, 2  ;;  %v6884_v12 = vrot.slane %v10086_v25, 1  ;;  %v6878_v7 = vmax.f32 %v10084_v26, %v6877_v40 }
 0x556   :  { %7087 = vst [vmem:[%s10116_s5 + $0x1c] sm:$0xf] %v7071_v16  ;;  %v6905_v60 = vrot.slane %v6904_v11, 1  ;;  %v6911_v34 = vmax.f32 %v6909_v54, %v6910_v45  ;;  %v6924_v0 = vrot.slane %v6923_v17, 2  ;;  %v6891_v62 = vrot.slane %v6890_v9, 1 }
 0x557   :  { %v6918_v59 = vmax.f32 %v6916_v55, %v6917_v32  ;;  %v6898_v41 = vrot.slane %v6897_v42, 1  ;;  %v6885_v5 = vmax.f32 %v10086_v25, %v6884_v12 }
 0x558   :  { %v6906_v44 = vmax.f32 %v6904_v11, %v6905_v60  ;;  %v6912_v46 = vrot.slane %v6911_v34, 1  ;;  %v6925_v18 = vmax.f32 %v6923_v17, %v6924_v0  ;;  %v6892_v52 = vmax.f32 %v6890_v9, %v6891_v62 }
 0x559   :  { %v6919_v51 = vrot.slane %v6918_v59, 1  ;;  %v6899_v15 = vmax.f32 %v6897_v42, %v6898_v41 }
 0x55a   :  { %v6913_v29 = vmax.f32 %v6911_v34, %v6912_v46  ;;  %v6926_v30 = vrot.slane %v6925_v18, 1  ;;  %v7008_v61 = vmax.f32 %v6878_v7, %v6906_v44 }
 0x55b   :  { %v6920_v21 = vmax.f32 %v6918_v59, %v6919_v51 }
 0x55c   :  { %v6927_v37 = vmax.f32 %v6925_v18, %v6926_v30  ;;  %v7009_v20 = vmax.f32 %v6885_v5, %v6913_v29 }
 0x55d   :  { %v7010_v48 = vmax.f32 %v6892_v52, %v6920_v21 }
 0x55e   :  { %v7011_v33 = vmax.f32 %v6899_v15, %v6927_v37  ;;  %v7066_v26 = vsel %vm4207_vm2, %v7009_v20, %v7008_v61 }
 0x55f   :  { %v7067_v40 = vsel %vm4209_vm3, %v7010_v48, %v7066_v26 }
 0x560   :  { %v7068_v63 = vsel %vm4211_vm4, %v7011_v33, %v7067_v40 }
 0x561   :  { %7086 = vst [vmem:[%s10116_s5 + $0x18] sm:$0xf] %v7068_v63 }

</bundles_post_ra>
